<compile_context>
chip_gen: v7x
topology: tpu7x:2x2x1
jax: 0.10.0
libtpu: 0.0.40
codegen_flags: <defaults>
</compile_context>

<pallas_src>
import functools

import jax
import jax.numpy as jnp
from jax.experimental import pallas as pl
from jax.experimental.pallas import tpu as pltpu


# ---------------------------------------------------------------------------
# in-kernel helpers
# ---------------------------------------------------------------------------
def _conv3x3_bn(pad_ref, xb, w9_ref, s_ref, b_ref, mask_c0, mask_cl, W):
    """3x3 'same' conv (stride 1) + folded BN on a (Cin, H*W) bf16 slab.

    Nine accumulated MXU dots (Cout, Cin) @ (Cin, H*W), bf16 operands with f32
    accumulation.  Tap shifts are static lane slices of the zero-padded VMEM
    scratch `pad_ref`; the horizontal image border is handled by pre-zeroing
    the first (last) column of the slab variant used by the ox=+1 (ox=-1)
    taps, so the flat-index wrap at row boundaries reads zeros.
    Returns (Cout, H*W) float32.
    """
    C, HW = xb.shape
    Cout = w9_ref.shape[1]
    off = W + 1                                    # left zero-pad width (flat)

    # write the three slab variants into the (pre-zeroed) padded scratch
    pad_ref[0, :, pl.ds(off, HW)] = xb                                  # ox == 0
    pad_ref[1, :, pl.ds(off, HW)] = jnp.where(mask_c0, 0.0, xb).astype(xb.dtype)  # ox == +1
    pad_ref[2, :, pl.ds(off, HW)] = jnp.where(mask_cl, 0.0, xb).astype(xb.dtype)  # ox == -1
    variant = {0: 0, 1: 1, -1: 2}

    acc = jnp.zeros((Cout, HW), jnp.float32)
    for oy in (-1, 0, 1):
        for ox in (-1, 0, 1):
            t = (oy + 1) * 3 + (ox + 1)            # tap index (ky*3 + kx)
            start = off + oy * W + ox              # static flat offset
            slab = pad_ref[variant[ox], :, pl.ds(start, HW)]
            acc = acc + jnp.dot(w9_ref[t], slab,
                                preferred_element_type=jnp.float32)
    return acc * s_ref[...] + b_ref[...]           # folded BN, (Cout, HW) f32


# ---------------------------------------------------------------------------
# fused kernel: BT images per grid step, end-to-end
# ---------------------------------------------------------------------------
def basic_block_kernel(W,
                       x_ref, w1_ref, s1_ref, b1_ref, w2_ref, s2_ref, b2_ref,
                       caw1_ref, cab1_ref, caw2_ref, cab2_ref,
                       ba_ref, bm_ref, sab_ref,
                       o_ref, pad_ref):
    BT, C, HW = x_ref.shape

    # re-zero the padded scratch every grid step (megacore-safe: each core has
    # its own scratch); only the centre region is overwritten by the convs.
    pad_ref[...] = jnp.zeros_like(pad_ref)

    # column-index masks for the horizontal border (hoisted out of the loops)
    col = jax.lax.broadcasted_iota(jnp.int32, (C, HW), 1) % W
    mask_c0 = col == 0            # first column of each image row
    mask_cl = col == W - 1        # last column of each image row

    for b in range(BT):
        x = x_ref[b]                                              # (C, HW) f32

        # ---- conv1 -> bn1 (folded) -> relu ----
        out1 = jnp.maximum(
            _conv3x3_bn(pad_ref, x.astype(jnp.bfloat16), w1_ref, s1_ref,
                        b1_ref, mask_c0, mask_cl, W), 0.0)

        # ---- conv2 -> bn2 (folded) ----
        out2 = _conv3x3_bn(pad_ref, out1.astype(jnp.bfloat16), w2_ref, s2_ref,
                           b2_ref, mask_c0, mask_cl, W)

        # ---- channel attention: avg/max pool -> shared 1x1 MLP -> sigmoid --
        p_avg = jnp.sum(out2, axis=1, keepdims=True) * (1.0 / HW)   # (C, 1)
        p_max = jnp.max(out2, axis=1, keepdims=True)                # (C, 1)
        pools = jnp.concatenate([p_avg, p_max], axis=1)             # (C, 2)
        h = jnp.maximum(
            jnp.dot(caw1_ref[...], pools, preferred_element_type=jnp.float32)
            + cab1_ref[...], 0.0)                                   # (Cr, 2)
        z = (jnp.dot(caw2_ref[...], h, preferred_element_type=jnp.float32)
             + cab2_ref[...])                                       # (C, 2)
        ca = jax.nn.sigmoid(z[:, 0:1] + z[:, 1:2])                  # (C, 1)
        out_ca = out2 * ca                                          # (C, HW)

        # ---- spatial attention: channel mean/max -> 7x7 conv (two MXU dots
        #      against precomputed banded matrices) -> sigmoid ----
        avg_map = jnp.sum(out_ca, axis=0, keepdims=True) * (1.0 / C)  # (1, HW)
        max_map = jnp.max(out_ca, axis=0, keepdims=True)              # (1, HW)
        sa_pre = (jnp.dot(avg_map, ba_ref[...],
                          preferred_element_type=jnp.float32)
                  + jnp.dot(max_map, bm_ref[...],
                            preferred_element_type=jnp.float32)
                  + sab_ref[0])
        sa = jax.nn.sigmoid(sa_pre)                                   # (1, HW)

        # ---- scale, residual add, relu (lane-dense 256-wide store) ----
        o_ref[b] = jnp.maximum(sa * out_ca + x, 0.0)


# ---------------------------------------------------------------------------
# wrapper
# ---------------------------------------------------------------------------
def _sa_band_matrices(sa_w_full, H, W):
    """Build (H*W, H*W) banded matrices B_a, B_m such that the 'SAME' 7x7 conv
    of the 2-channel [avg, max] map equals  avg_flat @ B_a + max_flat @ B_m."""
    HW = H * W
    idx = jnp.arange(HW)
    yi, xi = (idx // W)[:, None], (idx % W)[:, None]      # input  (row of B)
    yo, xo = (idx // W)[None, :], (idx % W)[None, :]      # output (col of B)
    dy, dx = yi - yo + 3, xi - xo + 3
    valid = (dy >= 0) & (dy <= 6) & (dx >= 0) & (dx <= 6)
    dyc, dxc = jnp.clip(dy, 0, 6), jnp.clip(dx, 0, 6)
    b_a = jnp.where(valid, sa_w_full[dyc, dxc, 0, 0], 0.0).astype(jnp.float32)
    b_m = jnp.where(valid, sa_w_full[dyc, dxc, 1, 0], 0.0).astype(jnp.float32)
    return b_a, b_m


def basic_block_forward(x_nchw, p, *, block_n=None):
    """x_nchw: (N, C, H, W) float32 (PyTorch NCHW).  stride=1, downsample=None."""
    N, C, H, W = x_nchw.shape
    HW = H * W
    f32 = jnp.float32
    cout = p['w1'].shape[3]
    assert cout == C, "stride=1 / downsample=None path requires inplanes == planes"

    # batch images per grid step; keep the grid length >= 2 so both v7x
    # TensorCores get work under dimension_semantics=("parallel",).
    if block_n is None:
        block_n = 2 if (N % 2 == 0 and N > 2) else 1
    bt = block_n
    assert N % bt == 0

    x = x_nchw.reshape(N, C, HW)

    # 3x3 conv weights as per-tap matrices (9, Cout, Cin), bf16 MXU operands
    w1 = jnp.transpose(p['w1'], (0, 1, 3, 2)).reshape(9, C, C).astype(jnp.bfloat16)
    w2 = jnp.transpose(p['w2'], (0, 1, 3, 2)).reshape(9, C, C).astype(jnp.bfloat16)
    s1 = p['scale1'].reshape(C, 1)
    b1 = p['bias1'].reshape(C, 1)
    s2 = p['scale2'].reshape(C, 1)
    b2 = p['bias2'].reshape(C, 1)

    # channel-attention MLP oriented for (Cr,C)@(C,2) / (C,Cr)@(Cr,2)
    caw1 = p['ca_w1'].T                 # (Cr, C)
    cab1 = p['ca_b1'].reshape(-1, 1)    # (Cr, 1)
    caw2 = p['ca_w2'].T                 # (C, Cr)
    cab2 = p['ca_b2'].reshape(-1, 1)    # (C, 1)

    # 7x7 spatial-attention conv as banded matmul matrices
    b_a, b_m = _sa_band_matrices(p['sa_w_full'], H, W)
    sa_b = p['sa_b'].reshape(1).astype(f32)

    def inv(a):          # grid-invariant whole-array VMEM spec
        nd = a.ndim
        return pl.BlockSpec(a.shape, lambda n, _nd=nd: (0,) * _nd)

    smem = pl.BlockSpec(memory_space=pltpu.MemorySpace.SMEM)

    out = pl.pallas_call(
        functools.partial(basic_block_kernel, W),
        out_shape=jax.ShapeDtypeStruct((N, C, HW), f32),
        grid=(N // bt,),
        in_specs=[
            pl.BlockSpec((bt, C, HW), lambda n: (n, 0, 0)),        # x
            inv(w1), inv(s1), inv(b1),
            inv(w2), inv(s2), inv(b2),
            inv(caw1), inv(cab1), inv(caw2), inv(cab2),
            inv(b_a), inv(b_m),
            smem,                                                  # sa bias
        ],
        out_specs=pl.BlockSpec((bt, C, HW), lambda n: (n, 0, 0)),
        scratch_shapes=[pltpu.VMEM((3, C, HW + 2 * (W + 1)), jnp.bfloat16)],
        compiler_params=pltpu.CompilerParams(
            dimension_semantics=("parallel",),
            vmem_limit_bytes=32 * 1024 * 1024),
    )(x, w1, s1, b1, w2, s2, b2, caw1, cab1, caw2, cab2, b_a, b_m, sa_b)

    return out.reshape(N, C, H, W)


# ---------------------------------------------------------------------------
# deterministic parameter init (matches the module's __init__ shapes)
# ---------------------------------------------------------------------------
def init_params(key, inplanes, planes, reduction=16, eps=1e-5):
    assert inplanes == planes, "stride=1 / downsample=None path only"
    ks = jax.random.split(key, 16)
    cr = max(planes // reduction, 1)

    def bn(kg, kb, km, kv, c):
        gamma = jax.random.uniform(kg, (c,), jnp.float32, 0.5, 1.5)
        beta = 0.1 * jax.random.normal(kb, (c,), jnp.float32)
        mean = 0.1 * jax.random.normal(km, (c,), jnp.float32)
        var = jax.random.uniform(kv, (c,), jnp.float32, 0.5, 1.5)
        scale = gamma / jnp.sqrt(var + eps)
        bias = beta - mean * scale
        return scale, bias

    scale1, bias1 = bn(ks[0], ks[1], ks[2], ks[3], planes)
    scale2, bias2 = bn(ks[4], ks[5], ks[6], ks[7], planes)
    w1 = 0.1 * jax.random.normal(ks[8], (3, 3, inplanes, planes), jnp.float32)
    w2 = 0.1 * jax.random.normal(ks[9], (3, 3, planes, planes), jnp.float32)
    ca_w1 = 0.2 * jax.random.normal(ks[10], (planes, cr), jnp.float32)
    ca_b1 = 0.1 * jax.random.normal(ks[11], (1, cr), jnp.float32)
    ca_w2 = 0.2 * jax.random.normal(ks[12], (cr, planes), jnp.float32)
    ca_b2 = 0.1 * jax.random.normal(ks[13], (1, planes), jnp.float32)
    sa_w_full = 0.1 * jax.random.normal(ks[14], (7, 7, 2, 1), jnp.float32)
    sa_b = 0.1 * jax.random.normal(ks[15], (1,), jnp.float32)
    return dict(
        w1=w1, scale1=scale1, bias1=bias1,
        w2=w2, scale2=scale2, bias2=bias2,
        ca_w1=ca_w1, ca_b1=ca_b1, ca_w2=ca_w2, ca_b2=ca_b2,
        sa_w_full=sa_w_full, sa_b=sa_b,
    )


# ---------------------------------------------------------------------------
# pure-JAX reference (independent of the kernel) for validation, NHWC
# ---------------------------------------------------------------------------
def reference_forward(x, p):
    """Same numeric contract as the kernel: bf16 conv operands, f32 accum."""
    dn = ('NHWC', 'HWIO', 'NHWC')
    bf16 = jnp.bfloat16

    def conv3x3(a, w):
        return jax.lax.conv_general_dilated(
            a.astype(bf16), w.astype(bf16), (1, 1), 'SAME',
            dimension_numbers=dn, preferred_element_type=jnp.float32)

    out = jnp.maximum(conv3x3(x, p['w1']) * p['scale1'] + p['bias1'], 0.0)
    out2 = conv3x3(out, p['w2']) * p['scale2'] + p['bias2']

    avg_pool = jnp.mean(out2, axis=(1, 2))
    max_pool = jnp.max(out2, axis=(1, 2))

    def mlp(v):
        h = jnp.maximum(v @ p['ca_w1'] + p['ca_b1'], 0.0)
        return h @ p['ca_w2'] + p['ca_b2']

    ca = jax.nn.sigmoid(mlp(avg_pool) + mlp(max_pool))
    out_ca = out2 * ca[:, None, None, :]

    avg_map = jnp.mean(out_ca, axis=3, keepdims=True)
    max_map = jnp.max(out_ca, axis=3, keepdims=True)
    sa_in = jnp.concatenate([avg_map, max_map], axis=3)
    sa = jax.nn.sigmoid(
        jax.lax.conv_general_dilated(
            sa_in, p['sa_w_full'], (1, 1), 'SAME', dimension_numbers=dn,
            precision=jax.lax.Precision.HIGHEST) + p['sa_b'][0])
    return jnp.maximum(sa * out_ca + x, 0.0)


# ---------------------------------------------------------------------------
if __name__ == "__main__":
    N, C, H, W = 2, 32, 16, 16          # inplanes = planes = 32, stride = 1
    key = jax.random.PRNGKey(0)
    kx, kp = jax.random.split(key)

    x_nchw = jax.random.normal(kx, (N, C, H, W), jnp.float32)   # PyTorch layout
    params = init_params(kp, C, C)

    out_nchw = jax.block_until_ready(basic_block_forward(x_nchw, params))

    x_nhwc = jnp.transpose(x_nchw, (0, 2, 3, 1))
    ref_nchw = jnp.transpose(reference_forward(x_nhwc, params), (0, 3, 1, 2))

    max_err = float(jnp.max(jnp.abs(out_nchw - ref_nchw)))
    if not bool(jnp.allclose(out_nchw, ref_nchw, atol=3e-2, rtol=3e-2)):
        raise SystemExit(f"mismatch vs reference: max abs err = {max_err}")
    print("KERNEL_OK")
</pallas_src>

<mosaic_0001>
module attributes {stable_mosaic.version = 11 : i64} {
  func.func @basic_block_kernel(%arg0: i32, %arg1: memref<1x32x256xf32, #tpu.memory_space<vmem>>, %arg2: memref<9x32x32xbf16, #tpu.memory_space<vmem>>, %arg3: memref<32x1xf32, #tpu.memory_space<vmem>>, %arg4: memref<32x1xf32, #tpu.memory_space<vmem>>, %arg5: memref<9x32x32xbf16, #tpu.memory_space<vmem>>, %arg6: memref<32x1xf32, #tpu.memory_space<vmem>>, %arg7: memref<32x1xf32, #tpu.memory_space<vmem>>, %arg8: memref<2x32xf32, #tpu.memory_space<vmem>>, %arg9: memref<2x1xf32, #tpu.memory_space<vmem>>, %arg10: memref<32x2xf32, #tpu.memory_space<vmem>>, %arg11: memref<32x1xf32, #tpu.memory_space<vmem>>, %arg12: memref<256x256xf32, #tpu.memory_space<vmem>>, %arg13: memref<256x256xf32, #tpu.memory_space<vmem>>, %arg14: memref<1xf32, #tpu.memory_space<smem>>, %arg15: memref<1x32x256xf32, #tpu.memory_space<vmem>>, %arg16: memref<3x32x290xbf16, #tpu.memory_space<vmem>>) attributes {dimension_semantics = [#tpu.dimension_semantics<parallel>], iteration_bounds = array<i64: 2>, scalar_prefetch = 0 : i64, scratch_operands = 1 : i64, tpu.core_type = #tpu.core_type<tc>, window_params = [{transform_indices = @transform_0, window_bounds = array<i64: 1, 32, 256>}, {pipeline_mode = #tpu.pipeline_mode<synchronous>, transform_indices = @transform_1, window_bounds = array<i64: 9, 32, 32>}, {pipeline_mode = #tpu.pipeline_mode<synchronous>, transform_indices = @transform_2, window_bounds = array<i64: 32, 1>}, {pipeline_mode = #tpu.pipeline_mode<synchronous>, transform_indices = @transform_3, window_bounds = array<i64: 32, 1>}, {pipeline_mode = #tpu.pipeline_mode<synchronous>, transform_indices = @transform_4, window_bounds = array<i64: 9, 32, 32>}, {pipeline_mode = #tpu.pipeline_mode<synchronous>, transform_indices = @transform_5, window_bounds = array<i64: 32, 1>}, {pipeline_mode = #tpu.pipeline_mode<synchronous>, transform_indices = @transform_6, window_bounds = array<i64: 32, 1>}, {pipeline_mode = #tpu.pipeline_mode<synchronous>, transform_indices = @transform_7, window_bounds = array<i64: 2, 32>}, {pipeline_mode = #tpu.pipeline_mode<synchronous>, transform_indices = @transform_8, window_bounds = array<i64: 2, 1>}, {pipeline_mode = #tpu.pipeline_mode<synchronous>, transform_indices = @transform_9, window_bounds = array<i64: 32, 2>}, {pipeline_mode = #tpu.pipeline_mode<synchronous>, transform_indices = @transform_10, window_bounds = array<i64: 32, 1>}, {pipeline_mode = #tpu.pipeline_mode<synchronous>, transform_indices = @transform_11, window_bounds = array<i64: 256, 256>}, {pipeline_mode = #tpu.pipeline_mode<synchronous>, transform_indices = @transform_12, window_bounds = array<i64: 256, 256>}, {transform_indices = @transform_13, window_bounds = array<i64: 1>}, {transform_indices = @transform_14, window_bounds = array<i64: 1, 32, 256>}]} {
    %cst = arith.constant 0.000000e+00 : bf16
    %0 = vector.broadcast %cst : bf16 to vector<3x32x290xbf16>
    %c0 = arith.constant 0 : index
    %c0_0 = arith.constant 0 : index
    %c0_1 = arith.constant 0 : index
    %1 = vector.load %arg16[%c0, %c0_0, %c0_1] : memref<3x32x290xbf16, #tpu.memory_space<vmem>>, vector<3x32x290xbf16>
    tpu.vector_store %arg16[%c0, %c0_0, %c0_1], %0 {strides = array<i32>} : memref<3x32x290xbf16, #tpu.memory_space<vmem>>, vector<3x32x290xbf16>,
    %2 = tpu.iota {dimensions = array<i32: 1>} : vector<32x256xi32>
    %c16_i32 = arith.constant 16 : i32
    %c0_i32 = arith.constant 0 : i32
    %3 = arith.cmpi eq, %c16_i32, %c0_i32 : i32
    %c1_i32 = arith.constant 1 : i32
    %4 = arith.select %3, %c1_i32, %c16_i32 : i32
    %5 = vector.broadcast %4 : i32 to vector<32x256xi32>
    %6 = arith.remsi %2, %5 : vector<32x256xi32>
    %c0_i32_2 = arith.constant 0 : i32
    %7 = vector.broadcast %c0_i32_2 : i32 to vector<32x256xi32>
    %8 = arith.cmpi ne, %6, %7 : vector<32x256xi32>
    %c0_i32_3 = arith.constant 0 : i32
    %9 = vector.broadcast %c0_i32_3 : i32 to vector<32x256xi32>
    %10 = arith.cmpi slt, %6, %9 : vector<32x256xi32>
    %c0_i32_4 = arith.constant 0 : i32
    %11 = arith.cmpi slt, %4, %c0_i32_4 : i32
    %12 = vector.broadcast %11 : i1 to vector<32x256xi1>
    %13 = vector.broadcast %12 : vector<32x256xi1> to vector<32x256xi1>
    %14 = arith.xori %10, %13 : vector<32x256xi1>
    %15 = arith.andi %14, %8 : vector<32x256xi1>
    %16 = vector.broadcast %4 : i32 to vector<32x256xi32>
    %17 = arith.addi %6, %16 : vector<32x256xi32>
    %18 = arith.select %15, %17, %6 : vector<32x256xi1>, vector<32x256xi32>
    %c0_i32_5 = arith.constant 0 : i32
    %19 = vector.broadcast %c0_i32_5 : i32 to vector<32x256xi32>
    %20 = arith.cmpi eq, %18, %19 : vector<32x256xi32>
    %c15_i32 = arith.constant 15 : i32
    %21 = vector.broadcast %c15_i32 : i32 to vector<32x256xi32>
    %22 = arith.cmpi eq, %18, %21 : vector<32x256xi32>
    %c0_6 = arith.constant 0 : index
    %c0_7 = arith.constant 0 : index
    %c0_8 = arith.constant 0 : index
    %23 = vector.load %arg1[%c0_6, %c0_7, %c0_8] : memref<1x32x256xf32, #tpu.memory_space<vmem>>, vector<1x32x256xf32>
    %24 = vector.shape_cast %23 : vector<1x32x256xf32> to vector<32x256xf32>
    %25 = arith.truncf %24 : vector<32x256xf32> to vector<32x256xbf16>
    %c0_9 = arith.constant 0 : index
    %c0_10 = arith.constant 0 : index
    %c17 = arith.constant 17 : index
    %26 = vector.load %arg16[%c0_9, %c0_10, %c17] : memref<3x32x290xbf16, #tpu.memory_space<vmem>>, vector<1x32x256xbf16>
    %27 = vector.shape_cast %26 : vector<1x32x256xbf16> to vector<32x256xbf16>
    %28 = vector.shape_cast %25 : vector<32x256xbf16> to vector<1x32x256xbf16>
    tpu.vector_store %arg16[%c0_9, %c0_10, %c17], %28 {strides = array<i32>} : memref<3x32x290xbf16, #tpu.memory_space<vmem>>, vector<1x32x256xbf16>,
    %cst_11 = arith.constant 0.000000e+00 : f32
    %29 = arith.truncf %cst_11 : f32 to bf16
    %30 = vector.broadcast %29 : bf16 to vector<32x256xbf16>
    %31 = arith.select %20, %30, %25 : vector<32x256xi1>, vector<32x256xbf16>
    %c1 = arith.constant 1 : index
    %c0_12 = arith.constant 0 : index
    %c17_13 = arith.constant 17 : index
    %32 = vector.load %arg16[%c1, %c0_12, %c17_13] : memref<3x32x290xbf16, #tpu.memory_space<vmem>>, vector<1x32x256xbf16>
    %33 = vector.shape_cast %32 : vector<1x32x256xbf16> to vector<32x256xbf16>
    %34 = vector.shape_cast %31 : vector<32x256xbf16> to vector<1x32x256xbf16>
    tpu.vector_store %arg16[%c1, %c0_12, %c17_13], %34 {strides = array<i32>} : memref<3x32x290xbf16, #tpu.memory_space<vmem>>, vector<1x32x256xbf16>,
    %cst_14 = arith.constant 0.000000e+00 : f32
    %35 = arith.truncf %cst_14 : f32 to bf16
    %36 = vector.broadcast %35 : bf16 to vector<32x256xbf16>
    %37 = arith.select %22, %36, %25 : vector<32x256xi1>, vector<32x256xbf16>
    %c2 = arith.constant 2 : index
    %c0_15 = arith.constant 0 : index
    %c17_16 = arith.constant 17 : index
    %38 = vector.load %arg16[%c2, %c0_15, %c17_16] : memref<3x32x290xbf16, #tpu.memory_space<vmem>>, vector<1x32x256xbf16>
    %39 = vector.shape_cast %38 : vector<1x32x256xbf16> to vector<32x256xbf16>
    %40 = vector.shape_cast %37 : vector<32x256xbf16> to vector<1x32x256xbf16>
    tpu.vector_store %arg16[%c2, %c0_15, %c17_16], %40 {strides = array<i32>} : memref<3x32x290xbf16, #tpu.memory_space<vmem>>, vector<1x32x256xbf16>,
    %cst_17 = arith.constant 0.000000e+00 : f32
    %41 = vector.broadcast %cst_17 : f32 to vector<32x256xf32>
    %c2_18 = arith.constant 2 : index
    %c0_19 = arith.constant 0 : index
    %c0_20 = arith.constant 0 : index
    %42 = vector.load %arg16[%c2_18, %c0_19, %c0_20] : memref<3x32x290xbf16, #tpu.memory_space<vmem>>, vector<1x32x256xbf16>
    %43 = vector.shape_cast %42 : vector<1x32x256xbf16> to vector<32x256xbf16>
    %c0_21 = arith.constant 0 : index
    %c0_22 = arith.constant 0 : index
    %c0_23 = arith.constant 0 : index
    %44 = vector.load %arg2[%c0_21, %c0_22, %c0_23] : memref<9x32x32xbf16, #tpu.memory_space<vmem>>, vector<1x32x32xbf16>
    %45 = vector.shape_cast %44 : vector<1x32x32xbf16> to vector<32x32xbf16>
    %cst_24 = arith.constant dense<0.000000e+00> : vector<32x256xf32>
    %46 = tpu.matmul %45, %43, %cst_24 {dimension_numbers = #tpu.dot_dimension_numbers<[1], [0], [0], [1], [0, 0, 1, 1], [], []>} : vector<32x32xbf16>, vector<32x256xbf16>, vector<32x256xf32> -> vector<32x256xf32>
    %47 = arith.addf %41, %46 : vector<32x256xf32>
    %c0_25 = arith.constant 0 : index
    %c0_26 = arith.constant 0 : index
    %c1_27 = arith.constant 1 : index
    %48 = vector.load %arg16[%c0_25, %c0_26, %c1_27] : memref<3x32x290xbf16, #tpu.memory_space<vmem>>, vector<1x32x256xbf16>
    %49 = vector.shape_cast %48 : vector<1x32x256xbf16> to vector<32x256xbf16>
    %c1_28 = arith.constant 1 : index
    %c0_29 = arith.constant 0 : index
    %c0_30 = arith.constant 0 : index
    %50 = vector.load %arg2[%c1_28, %c0_29, %c0_30] : memref<9x32x32xbf16, #tpu.memory_space<vmem>>, vector<1x32x32xbf16>
    %51 = vector.shape_cast %50 : vector<1x32x32xbf16> to vector<32x32xbf16>
    %cst_31 = arith.constant dense<0.000000e+00> : vector<32x256xf32>
    %52 = tpu.matmul %51, %49, %cst_31 {dimension_numbers = #tpu.dot_dimension_numbers<[1], [0], [0], [1], [0, 0, 1, 1], [], []>} : vector<32x32xbf16>, vector<32x256xbf16>, vector<32x256xf32> -> vector<32x256xf32>
    %53 = arith.addf %47, %52 : vector<32x256xf32>
    %c1_32 = arith.constant 1 : index
    %c0_33 = arith.constant 0 : index
    %c2_34 = arith.constant 2 : index
    %54 = vector.load %arg16[%c1_32, %c0_33, %c2_34] : memref<3x32x290xbf16, #tpu.memory_space<vmem>>, vector<1x32x256xbf16>
    %55 = vector.shape_cast %54 : vector<1x32x256xbf16> to vector<32x256xbf16>
    %c2_35 = arith.constant 2 : index
    %c0_36 = arith.constant 0 : index
    %c0_37 = arith.constant 0 : index
    %56 = vector.load %arg2[%c2_35, %c0_36, %c0_37] : memref<9x32x32xbf16, #tpu.memory_space<vmem>>, vector<1x32x32xbf16>
    %57 = vector.shape_cast %56 : vector<1x32x32xbf16> to vector<32x32xbf16>
    %cst_38 = arith.constant dense<0.000000e+00> : vector<32x256xf32>
    %58 = tpu.matmul %57, %55, %cst_38 {dimension_numbers = #tpu.dot_dimension_numbers<[1], [0], [0], [1], [0, 0, 1, 1], [], []>} : vector<32x32xbf16>, vector<32x256xbf16>, vector<32x256xf32> -> vector<32x256xf32>
    %59 = arith.addf %53, %58 : vector<32x256xf32>
    %c2_39 = arith.constant 2 : index
    %c0_40 = arith.constant 0 : index
    %c16 = arith.constant 16 : index
    %60 = vector.load %arg16[%c2_39, %c0_40, %c16] : memref<3x32x290xbf16, #tpu.memory_space<vmem>>, vector<1x32x256xbf16>
    %61 = vector.shape_cast %60 : vector<1x32x256xbf16> to vector<32x256xbf16>
    %c3 = arith.constant 3 : index
    %c0_41 = arith.constant 0 : index
    %c0_42 = arith.constant 0 : index
    %62 = vector.load %arg2[%c3, %c0_41, %c0_42] : memref<9x32x32xbf16, #tpu.memory_space<vmem>>, vector<1x32x32xbf16>
    %63 = vector.shape_cast %62 : vector<1x32x32xbf16> to vector<32x32xbf16>
    %cst_43 = arith.constant dense<0.000000e+00> : vector<32x256xf32>
    %64 = tpu.matmul %63, %61, %cst_43 {dimension_numbers = #tpu.dot_dimension_numbers<[1], [0], [0], [1], [0, 0, 1, 1], [], []>} : vector<32x32xbf16>, vector<32x256xbf16>, vector<32x256xf32> -> vector<32x256xf32>
    %65 = arith.addf %59, %64 : vector<32x256xf32>
    %c0_44 = arith.constant 0 : index
    %c0_45 = arith.constant 0 : index
    %c17_46 = arith.constant 17 : index
    %66 = vector.load %arg16[%c0_44, %c0_45, %c17_46] : memref<3x32x290xbf16, #tpu.memory_space<vmem>>, vector<1x32x256xbf16>
    %67 = vector.shape_cast %66 : vector<1x32x256xbf16> to vector<32x256xbf16>
    %c4 = arith.constant 4 : index
    %c0_47 = arith.constant 0 : index
    %c0_48 = arith.constant 0 : index
    %68 = vector.load %arg2[%c4, %c0_47, %c0_48] : memref<9x32x32xbf16, #tpu.memory_space<vmem>>, vector<1x32x32xbf16>
    %69 = vector.shape_cast %68 : vector<1x32x32xbf16> to vector<32x32xbf16>
    %cst_49 = arith.constant dense<0.000000e+00> : vector<32x256xf32>
    %70 = tpu.matmul %69, %67, %cst_49 {dimension_numbers = #tpu.dot_dimension_numbers<[1], [0], [0], [1], [0, 0, 1, 1], [], []>} : vector<32x32xbf16>, vector<32x256xbf16>, vector<32x256xf32> -> vector<32x256xf32>
    %71 = arith.addf %65, %70 : vector<32x256xf32>
    %c1_50 = arith.constant 1 : index
    %c0_51 = arith.constant 0 : index
    %c18 = arith.constant 18 : index
    %72 = vector.load %arg16[%c1_50, %c0_51, %c18] : memref<3x32x290xbf16, #tpu.memory_space<vmem>>, vector<1x32x256xbf16>
    %73 = vector.shape_cast %72 : vector<1x32x256xbf16> to vector<32x256xbf16>
    %c5 = arith.constant 5 : index
    %c0_52 = arith.constant 0 : index
    %c0_53 = arith.constant 0 : index
    %74 = vector.load %arg2[%c5, %c0_52, %c0_53] : memref<9x32x32xbf16, #tpu.memory_space<vmem>>, vector<1x32x32xbf16>
    %75 = vector.shape_cast %74 : vector<1x32x32xbf16> to vector<32x32xbf16>
    %cst_54 = arith.constant dense<0.000000e+00> : vector<32x256xf32>
    %76 = tpu.matmul %75, %73, %cst_54 {dimension_numbers = #tpu.dot_dimension_numbers<[1], [0], [0], [1], [0, 0, 1, 1], [], []>} : vector<32x32xbf16>, vector<32x256xbf16>, vector<32x256xf32> -> vector<32x256xf32>
    %77 = arith.addf %71, %76 : vector<32x256xf32>
    %c2_55 = arith.constant 2 : index
    %c0_56 = arith.constant 0 : index
    %c32 = arith.constant 32 : index
    %78 = vector.load %arg16[%c2_55, %c0_56, %c32] : memref<3x32x290xbf16, #tpu.memory_space<vmem>>, vector<1x32x256xbf16>
    %79 = vector.shape_cast %78 : vector<1x32x256xbf16> to vector<32x256xbf16>
    %c6 = arith.constant 6 : index
    %c0_57 = arith.constant 0 : index
    %c0_58 = arith.constant 0 : index
    %80 = vector.load %arg2[%c6, %c0_57, %c0_58] : memref<9x32x32xbf16, #tpu.memory_space<vmem>>, vector<1x32x32xbf16>
    %81 = vector.shape_cast %80 : vector<1x32x32xbf16> to vector<32x32xbf16>
    %cst_59 = arith.constant dense<0.000000e+00> : vector<32x256xf32>
    %82 = tpu.matmul %81, %79, %cst_59 {dimension_numbers = #tpu.dot_dimension_numbers<[1], [0], [0], [1], [0, 0, 1, 1], [], []>} : vector<32x32xbf16>, vector<32x256xbf16>, vector<32x256xf32> -> vector<32x256xf32>
    %83 = arith.addf %77, %82 : vector<32x256xf32>
    %c0_60 = arith.constant 0 : index
    %c0_61 = arith.constant 0 : index
    %c33 = arith.constant 33 : index
    %84 = vector.load %arg16[%c0_60, %c0_61, %c33] : memref<3x32x290xbf16, #tpu.memory_space<vmem>>, vector<1x32x256xbf16>
    %85 = vector.shape_cast %84 : vector<1x32x256xbf16> to vector<32x256xbf16>
    %c7 = arith.constant 7 : index
    %c0_62 = arith.constant 0 : index
    %c0_63 = arith.constant 0 : index
    %86 = vector.load %arg2[%c7, %c0_62, %c0_63] : memref<9x32x32xbf16, #tpu.memory_space<vmem>>, vector<1x32x32xbf16>
    %87 = vector.shape_cast %86 : vector<1x32x32xbf16> to vector<32x32xbf16>
    %cst_64 = arith.constant dense<0.000000e+00> : vector<32x256xf32>
    %88 = tpu.matmul %87, %85, %cst_64 {dimension_numbers = #tpu.dot_dimension_numbers<[1], [0], [0], [1], [0, 0, 1, 1], [], []>} : vector<32x32xbf16>, vector<32x256xbf16>, vector<32x256xf32> -> vector<32x256xf32>
    %89 = arith.addf %83, %88 : vector<32x256xf32>
    %c1_65 = arith.constant 1 : index
    %c0_66 = arith.constant 0 : index
    %c34 = arith.constant 34 : index
    %90 = vector.load %arg16[%c1_65, %c0_66, %c34] : memref<3x32x290xbf16, #tpu.memory_space<vmem>>, vector<1x32x256xbf16>
    %91 = vector.shape_cast %90 : vector<1x32x256xbf16> to vector<32x256xbf16>
    %c8 = arith.constant 8 : index
    %c0_67 = arith.constant 0 : index
    %c0_68 = arith.constant 0 : index
    %92 = vector.load %arg2[%c8, %c0_67, %c0_68] : memref<9x32x32xbf16, #tpu.memory_space<vmem>>, vector<1x32x32xbf16>
    %93 = vector.shape_cast %92 : vector<1x32x32xbf16> to vector<32x32xbf16>
    %cst_69 = arith.constant dense<0.000000e+00> : vector<32x256xf32>
    %94 = tpu.matmul %93, %91, %cst_69 {dimension_numbers = #tpu.dot_dimension_numbers<[1], [0], [0], [1], [0, 0, 1, 1], [], []>} : vector<32x32xbf16>, vector<32x256xbf16>, vector<32x256xf32> -> vector<32x256xf32>
    %95 = arith.addf %89, %94 : vector<32x256xf32>
    %c0_70 = arith.constant 0 : index
    %c0_71 = arith.constant 0 : index
    %96 = vector.load %arg3[%c0_70, %c0_71] : memref<32x1xf32, #tpu.memory_space<vmem>>, vector<32x1xf32>
    %97 = vector.broadcast %96 : vector<32x1xf32> to vector<32x256xf32>
    %98 = arith.mulf %95, %97 : vector<32x256xf32>
    %c0_72 = arith.constant 0 : index
    %c0_73 = arith.constant 0 : index
    %99 = vector.load %arg4[%c0_72, %c0_73] : memref<32x1xf32, #tpu.memory_space<vmem>>, vector<32x1xf32>
    %100 = vector.broadcast %99 : vector<32x1xf32> to vector<32x256xf32>
    %101 = arith.addf %98, %100 : vector<32x256xf32>
    %cst_74 = arith.constant 0.000000e+00 : f32
    %102 = vector.broadcast %cst_74 : f32 to vector<32x256xf32>
    %103 = arith.maximumf %101, %102 : vector<32x256xf32>
    %104 = arith.truncf %103 : vector<32x256xf32> to vector<32x256xbf16>
    %c0_75 = arith.constant 0 : index
    %c0_76 = arith.constant 0 : index
    %c17_77 = arith.constant 17 : index
    %105 = vector.load %arg16[%c0_75, %c0_76, %c17_77] : memref<3x32x290xbf16, #tpu.memory_space<vmem>>, vector<1x32x256xbf16>
    %106 = vector.shape_cast %105 : vector<1x32x256xbf16> to vector<32x256xbf16>
    %107 = vector.shape_cast %104 : vector<32x256xbf16> to vector<1x32x256xbf16>
    tpu.vector_store %arg16[%c0_75, %c0_76, %c17_77], %107 {strides = array<i32>} : memref<3x32x290xbf16, #tpu.memory_space<vmem>>, vector<1x32x256xbf16>,
    %cst_78 = arith.constant 0.000000e+00 : f32
    %108 = arith.truncf %cst_78 : f32 to bf16
    %109 = vector.broadcast %108 : bf16 to vector<32x256xbf16>
    %110 = arith.select %20, %109, %104 : vector<32x256xi1>, vector<32x256xbf16>
    %c1_79 = arith.constant 1 : index
    %c0_80 = arith.constant 0 : index
    %c17_81 = arith.constant 17 : index
    %111 = vector.load %arg16[%c1_79, %c0_80, %c17_81] : memref<3x32x290xbf16, #tpu.memory_space<vmem>>, vector<1x32x256xbf16>
    %112 = vector.shape_cast %111 : vector<1x32x256xbf16> to vector<32x256xbf16>
    %113 = vector.shape_cast %110 : vector<32x256xbf16> to vector<1x32x256xbf16>
    tpu.vector_store %arg16[%c1_79, %c0_80, %c17_81], %113 {strides = array<i32>} : memref<3x32x290xbf16, #tpu.memory_space<vmem>>, vector<1x32x256xbf16>,
    %cst_82 = arith.constant 0.000000e+00 : f32
    %114 = arith.truncf %cst_82 : f32 to bf16
    %115 = vector.broadcast %114 : bf16 to vector<32x256xbf16>
    %116 = arith.select %22, %115, %104 : vector<32x256xi1>, vector<32x256xbf16>
    %c2_83 = arith.constant 2 : index
    %c0_84 = arith.constant 0 : index
    %c17_85 = arith.constant 17 : index
    %117 = vector.load %arg16[%c2_83, %c0_84, %c17_85] : memref<3x32x290xbf16, #tpu.memory_space<vmem>>, vector<1x32x256xbf16>
    %118 = vector.shape_cast %117 : vector<1x32x256xbf16> to vector<32x256xbf16>
    %119 = vector.shape_cast %116 : vector<32x256xbf16> to vector<1x32x256xbf16>
    tpu.vector_store %arg16[%c2_83, %c0_84, %c17_85], %119 {strides = array<i32>} : memref<3x32x290xbf16, #tpu.memory_space<vmem>>, vector<1x32x256xbf16>,
    %cst_86 = arith.constant 0.000000e+00 : f32
    %120 = vector.broadcast %cst_86 : f32 to vector<32x256xf32>
    %c2_87 = arith.constant 2 : index
    %c0_88 = arith.constant 0 : index
    %c0_89 = arith.constant 0 : index
    %121 = vector.load %arg16[%c2_87, %c0_88, %c0_89] : memref<3x32x290xbf16, #tpu.memory_space<vmem>>, vector<1x32x256xbf16>
    %122 = vector.shape_cast %121 : vector<1x32x256xbf16> to vector<32x256xbf16>
    %c0_90 = arith.constant 0 : index
    %c0_91 = arith.constant 0 : index
    %c0_92 = arith.constant 0 : index
    %123 = vector.load %arg5[%c0_90, %c0_91, %c0_92] : memref<9x32x32xbf16, #tpu.memory_space<vmem>>, vector<1x32x32xbf16>
    %124 = vector.shape_cast %123 : vector<1x32x32xbf16> to vector<32x32xbf16>
    %cst_93 = arith.constant dense<0.000000e+00> : vector<32x256xf32>
    %125 = tpu.matmul %124, %122, %cst_93 {dimension_numbers = #tpu.dot_dimension_numbers<[1], [0], [0], [1], [0, 0, 1, 1], [], []>} : vector<32x32xbf16>, vector<32x256xbf16>, vector<32x256xf32> -> vector<32x256xf32>
    %126 = arith.addf %120, %125 : vector<32x256xf32>
    %c0_94 = arith.constant 0 : index
    %c0_95 = arith.constant 0 : index
    %c1_96 = arith.constant 1 : index
    %127 = vector.load %arg16[%c0_94, %c0_95, %c1_96] : memref<3x32x290xbf16, #tpu.memory_space<vmem>>, vector<1x32x256xbf16>
    %128 = vector.shape_cast %127 : vector<1x32x256xbf16> to vector<32x256xbf16>
    %c1_97 = arith.constant 1 : index
    %c0_98 = arith.constant 0 : index
    %c0_99 = arith.constant 0 : index
    %129 = vector.load %arg5[%c1_97, %c0_98, %c0_99] : memref<9x32x32xbf16, #tpu.memory_space<vmem>>, vector<1x32x32xbf16>
    %130 = vector.shape_cast %129 : vector<1x32x32xbf16> to vector<32x32xbf16>
    %cst_100 = arith.constant dense<0.000000e+00> : vector<32x256xf32>
    %131 = tpu.matmul %130, %128, %cst_100 {dimension_numbers = #tpu.dot_dimension_numbers<[1], [0], [0], [1], [0, 0, 1, 1], [], []>} : vector<32x32xbf16>, vector<32x256xbf16>, vector<32x256xf32> -> vector<32x256xf32>
    %132 = arith.addf %126, %131 : vector<32x256xf32>
    %c1_101 = arith.constant 1 : index
    %c0_102 = arith.constant 0 : index
    %c2_103 = arith.constant 2 : index
    %133 = vector.load %arg16[%c1_101, %c0_102, %c2_103] : memref<3x32x290xbf16, #tpu.memory_space<vmem>>, vector<1x32x256xbf16>
    %134 = vector.shape_cast %133 : vector<1x32x256xbf16> to vector<32x256xbf16>
    %c2_104 = arith.constant 2 : index
    %c0_105 = arith.constant 0 : index
    %c0_106 = arith.constant 0 : index
    %135 = vector.load %arg5[%c2_104, %c0_105, %c0_106] : memref<9x32x32xbf16, #tpu.memory_space<vmem>>, vector<1x32x32xbf16>
    %136 = vector.shape_cast %135 : vector<1x32x32xbf16> to vector<32x32xbf16>
    %cst_107 = arith.constant dense<0.000000e+00> : vector<32x256xf32>
    %137 = tpu.matmul %136, %134, %cst_107 {dimension_numbers = #tpu.dot_dimension_numbers<[1], [0], [0], [1], [0, 0, 1, 1], [], []>} : vector<32x32xbf16>, vector<32x256xbf16>, vector<32x256xf32> -> vector<32x256xf32>
    %138 = arith.addf %132, %137 : vector<32x256xf32>
    %c2_108 = arith.constant 2 : index
    %c0_109 = arith.constant 0 : index
    %c16_110 = arith.constant 16 : index
    %139 = vector.load %arg16[%c2_108, %c0_109, %c16_110] : memref<3x32x290xbf16, #tpu.memory_space<vmem>>, vector<1x32x256xbf16>
    %140 = vector.shape_cast %139 : vector<1x32x256xbf16> to vector<32x256xbf16>
    %c3_111 = arith.constant 3 : index
    %c0_112 = arith.constant 0 : index
    %c0_113 = arith.constant 0 : index
    %141 = vector.load %arg5[%c3_111, %c0_112, %c0_113] : memref<9x32x32xbf16, #tpu.memory_space<vmem>>, vector<1x32x32xbf16>
    %142 = vector.shape_cast %141 : vector<1x32x32xbf16> to vector<32x32xbf16>
    %cst_114 = arith.constant dense<0.000000e+00> : vector<32x256xf32>
    %143 = tpu.matmul %142, %140, %cst_114 {dimension_numbers = #tpu.dot_dimension_numbers<[1], [0], [0], [1], [0, 0, 1, 1], [], []>} : vector<32x32xbf16>, vector<32x256xbf16>, vector<32x256xf32> -> vector<32x256xf32>
    %144 = arith.addf %138, %143 : vector<32x256xf32>
    %c0_115 = arith.constant 0 : index
    %c0_116 = arith.constant 0 : index
    %c17_117 = arith.constant 17 : index
    %145 = vector.load %arg16[%c0_115, %c0_116, %c17_117] : memref<3x32x290xbf16, #tpu.memory_space<vmem>>, vector<1x32x256xbf16>
    %146 = vector.shape_cast %145 : vector<1x32x256xbf16> to vector<32x256xbf16>
    %c4_118 = arith.constant 4 : index
    %c0_119 = arith.constant 0 : index
    %c0_120 = arith.constant 0 : index
    %147 = vector.load %arg5[%c4_118, %c0_119, %c0_120] : memref<9x32x32xbf16, #tpu.memory_space<vmem>>, vector<1x32x32xbf16>
    %148 = vector.shape_cast %147 : vector<1x32x32xbf16> to vector<32x32xbf16>
    %cst_121 = arith.constant dense<0.000000e+00> : vector<32x256xf32>
    %149 = tpu.matmul %148, %146, %cst_121 {dimension_numbers = #tpu.dot_dimension_numbers<[1], [0], [0], [1], [0, 0, 1, 1], [], []>} : vector<32x32xbf16>, vector<32x256xbf16>, vector<32x256xf32> -> vector<32x256xf32>
    %150 = arith.addf %144, %149 : vector<32x256xf32>
    %c1_122 = arith.constant 1 : index
    %c0_123 = arith.constant 0 : index
    %c18_124 = arith.constant 18 : index
    %151 = vector.load %arg16[%c1_122, %c0_123, %c18_124] : memref<3x32x290xbf16, #tpu.memory_space<vmem>>, vector<1x32x256xbf16>
    %152 = vector.shape_cast %151 : vector<1x32x256xbf16> to vector<32x256xbf16>
    %c5_125 = arith.constant 5 : index
    %c0_126 = arith.constant 0 : index
    %c0_127 = arith.constant 0 : index
    %153 = vector.load %arg5[%c5_125, %c0_126, %c0_127] : memref<9x32x32xbf16, #tpu.memory_space<vmem>>, vector<1x32x32xbf16>
    %154 = vector.shape_cast %153 : vector<1x32x32xbf16> to vector<32x32xbf16>
    %cst_128 = arith.constant dense<0.000000e+00> : vector<32x256xf32>
    %155 = tpu.matmul %154, %152, %cst_128 {dimension_numbers = #tpu.dot_dimension_numbers<[1], [0], [0], [1], [0, 0, 1, 1], [], []>} : vector<32x32xbf16>, vector<32x256xbf16>, vector<32x256xf32> -> vector<32x256xf32>
    %156 = arith.addf %150, %155 : vector<32x256xf32>
    %c2_129 = arith.constant 2 : index
    %c0_130 = arith.constant 0 : index
    %c32_131 = arith.constant 32 : index
    %157 = vector.load %arg16[%c2_129, %c0_130, %c32_131] : memref<3x32x290xbf16, #tpu.memory_space<vmem>>, vector<1x32x256xbf16>
    %158 = vector.shape_cast %157 : vector<1x32x256xbf16> to vector<32x256xbf16>
    %c6_132 = arith.constant 6 : index
    %c0_133 = arith.constant 0 : index
    %c0_134 = arith.constant 0 : index
    %159 = vector.load %arg5[%c6_132, %c0_133, %c0_134] : memref<9x32x32xbf16, #tpu.memory_space<vmem>>, vector<1x32x32xbf16>
    %160 = vector.shape_cast %159 : vector<1x32x32xbf16> to vector<32x32xbf16>
    %cst_135 = arith.constant dense<0.000000e+00> : vector<32x256xf32>
    %161 = tpu.matmul %160, %158, %cst_135 {dimension_numbers = #tpu.dot_dimension_numbers<[1], [0], [0], [1], [0, 0, 1, 1], [], []>} : vector<32x32xbf16>, vector<32x256xbf16>, vector<32x256xf32> -> vector<32x256xf32>
    %162 = arith.addf %156, %161 : vector<32x256xf32>
    %c0_136 = arith.constant 0 : index
    %c0_137 = arith.constant 0 : index
    %c33_138 = arith.constant 33 : index
    %163 = vector.load %arg16[%c0_136, %c0_137, %c33_138] : memref<3x32x290xbf16, #tpu.memory_space<vmem>>, vector<1x32x256xbf16>
    %164 = vector.shape_cast %163 : vector<1x32x256xbf16> to vector<32x256xbf16>
    %c7_139 = arith.constant 7 : index
    %c0_140 = arith.constant 0 : index
    %c0_141 = arith.constant 0 : index
    %165 = vector.load %arg5[%c7_139, %c0_140, %c0_141] : memref<9x32x32xbf16, #tpu.memory_space<vmem>>, vector<1x32x32xbf16>
    %166 = vector.shape_cast %165 : vector<1x32x32xbf16> to vector<32x32xbf16>
    %cst_142 = arith.constant dense<0.000000e+00> : vector<32x256xf32>
    %167 = tpu.matmul %166, %164, %cst_142 {dimension_numbers = #tpu.dot_dimension_numbers<[1], [0], [0], [1], [0, 0, 1, 1], [], []>} : vector<32x32xbf16>, vector<32x256xbf16>, vector<32x256xf32> -> vector<32x256xf32>
    %168 = arith.addf %162, %167 : vector<32x256xf32>
    %c1_143 = arith.constant 1 : index
    %c0_144 = arith.constant 0 : index
    %c34_145 = arith.constant 34 : index
    %169 = vector.load %arg16[%c1_143, %c0_144, %c34_145] : memref<3x32x290xbf16, #tpu.memory_space<vmem>>, vector<1x32x256xbf16>
    %170 = vector.shape_cast %169 : vector<1x32x256xbf16> to vector<32x256xbf16>
    %c8_146 = arith.constant 8 : index
    %c0_147 = arith.constant 0 : index
    %c0_148 = arith.constant 0 : index
    %171 = vector.load %arg5[%c8_146, %c0_147, %c0_148] : memref<9x32x32xbf16, #tpu.memory_space<vmem>>, vector<1x32x32xbf16>
    %172 = vector.shape_cast %171 : vector<1x32x32xbf16> to vector<32x32xbf16>
    %cst_149 = arith.constant dense<0.000000e+00> : vector<32x256xf32>
    %173 = tpu.matmul %172, %170, %cst_149 {dimension_numbers = #tpu.dot_dimension_numbers<[1], [0], [0], [1], [0, 0, 1, 1], [], []>} : vector<32x32xbf16>, vector<32x256xbf16>, vector<32x256xf32> -> vector<32x256xf32>
    %174 = arith.addf %168, %173 : vector<32x256xf32>
    %c0_150 = arith.constant 0 : index
    %c0_151 = arith.constant 0 : index
    %175 = vector.load %arg6[%c0_150, %c0_151] : memref<32x1xf32, #tpu.memory_space<vmem>>, vector<32x1xf32>
    %176 = vector.broadcast %175 : vector<32x1xf32> to vector<32x256xf32>
    %177 = arith.mulf %174, %176 : vector<32x256xf32>
    %c0_152 = arith.constant 0 : index
    %c0_153 = arith.constant 0 : index
    %178 = vector.load %arg7[%c0_152, %c0_153] : memref<32x1xf32, #tpu.memory_space<vmem>>, vector<32x1xf32>
    %179 = vector.broadcast %178 : vector<32x1xf32> to vector<32x256xf32>
    %180 = arith.addf %177, %179 : vector<32x256xf32>
    %cst_154 = arith.constant dense<0.000000e+00> : vector<32xf32>
    %181 = vector.multi_reduction <add>, %180, %cst_154 [1] : vector<32x256xf32> to vector<32xf32>
    %182 = vector.shape_cast %181 : vector<32xf32> to vector<32x1xf32>
    %cst_155 = arith.constant 3.906250e-03 : f32
    %183 = vector.broadcast %cst_155 : f32 to vector<32x1xf32>
    %184 = arith.mulf %182, %183 : vector<32x1xf32>
    %cst_156 = arith.constant dense<0xFF800000> : vector<32xf32>
    %185 = vector.multi_reduction <maximumf>, %180, %cst_156 [1] : vector<32x256xf32> to vector<32xf32>
    %186 = vector.shape_cast %185 : vector<32xf32> to vector<32x1xf32>
    %187 = tpu.concatenate %184, %186 in 1 : vector<32x1xf32>, vector<32x1xf32> -> vector<32x2xf32>
    %c0_157 = arith.constant 0 : index
    %c0_158 = arith.constant 0 : index
    %188 = vector.load %arg8[%c0_157, %c0_158] : memref<2x32xf32, #tpu.memory_space<vmem>>, vector<2x32xf32>
    %cst_159 = arith.constant dense<0.000000e+00> : vector<2x2xf32>
    %189 = tpu.matmul %188, %187, %cst_159 {dimension_numbers = #tpu.dot_dimension_numbers<[1], [0], [0], [1], [0, 0, 1, 1], [], []>} : vector<2x32xf32>, vector<32x2xf32>, vector<2x2xf32> -> vector<2x2xf32>
    %c0_160 = arith.constant 0 : index
    %c0_161 = arith.constant 0 : index
    %190 = vector.load %arg9[%c0_160, %c0_161] : memref<2x1xf32, #tpu.memory_space<vmem>>, vector<2x1xf32>
    %191 = vector.broadcast %190 : vector<2x1xf32> to vector<2x2xf32>
    %192 = arith.addf %189, %191 : vector<2x2xf32>
    %cst_162 = arith.constant 0.000000e+00 : f32
    %193 = vector.broadcast %cst_162 : f32 to vector<2x2xf32>
    %194 = arith.maximumf %192, %193 : vector<2x2xf32>
    %c0_163 = arith.constant 0 : index
    %c0_164 = arith.constant 0 : index
    %195 = vector.load %arg10[%c0_163, %c0_164] : memref<32x2xf32, #tpu.memory_space<vmem>>, vector<32x2xf32>
    %cst_165 = arith.constant dense<0.000000e+00> : vector<32x2xf32>
    %196 = tpu.matmul %195, %194, %cst_165 {dimension_numbers = #tpu.dot_dimension_numbers<[1], [0], [0], [1], [0, 0, 1, 1], [], []>} : vector<32x2xf32>, vector<2x2xf32>, vector<32x2xf32> -> vector<32x2xf32>
    %c0_166 = arith.constant 0 : index
    %c0_167 = arith.constant 0 : index
    %197 = vector.load %arg11[%c0_166, %c0_167] : memref<32x1xf32, #tpu.memory_space<vmem>>, vector<32x1xf32>
    %198 = vector.broadcast %197 : vector<32x1xf32> to vector<32x2xf32>
    %199 = arith.addf %196, %198 : vector<32x2xf32>
    %200 = vector.extract_strided_slice %199 {offsets = [0, 0], sizes = [32, 1], strides = [1, 1]} : vector<32x2xf32> to vector<32x1xf32>
    %201 = vector.extract_strided_slice %199 {offsets = [0, 1], sizes = [32, 1], strides = [1, 1]} : vector<32x2xf32> to vector<32x1xf32>
    %202 = arith.addf %200, %201 : vector<32x1xf32>
    %203 = arith.negf %202 : vector<32x1xf32>
    %204 = math.exp %203 : vector<32x1xf32>
    %cst_168 = arith.constant 1.000000e+00 : f32
    %205 = vector.broadcast %cst_168 : f32 to vector<32x1xf32>
    %206 = arith.addf %205, %204 : vector<32x1xf32>
    %207 = arith.divf %205, %206 : vector<32x1xf32>
    %208 = vector.broadcast %207 : vector<32x1xf32> to vector<32x256xf32>
    %209 = arith.mulf %180, %208 : vector<32x256xf32>
    %cst_169 = arith.constant dense<0.000000e+00> : vector<256xf32>
    %210 = vector.multi_reduction <add>, %209, %cst_169 [0] : vector<32x256xf32> to vector<256xf32>
    %211 = vector.shape_cast %210 : vector<256xf32> to vector<1x256xf32>
    %cst_170 = arith.constant 3.125000e-02 : f32
    %212 = vector.broadcast %cst_170 : f32 to vector<1x256xf32>
    %213 = arith.mulf %211, %212 : vector<1x256xf32>
    %cst_171 = arith.constant dense<0xFF800000> : vector<256xf32>
    %214 = vector.multi_reduction <maximumf>, %209, %cst_171 [0] : vector<32x256xf32> to vector<256xf32>
    %215 = vector.shape_cast %214 : vector<256xf32> to vector<1x256xf32>
    %c0_172 = arith.constant 0 : index
    %c0_173 = arith.constant 0 : index
    %216 = vector.load %arg12[%c0_172, %c0_173] : memref<256x256xf32, #tpu.memory_space<vmem>>, vector<256x256xf32>
    %cst_174 = arith.constant dense<0.000000e+00> : vector<1x256xf32>
    %217 = tpu.matmul %213, %216, %cst_174 {dimension_numbers = #tpu.dot_dimension_numbers<[1], [0], [0], [1], [0, 0, 1, 1], [], []>} : vector<1x256xf32>, vector<256x256xf32>, vector<1x256xf32> -> vector<1x256xf32>
    %c0_175 = arith.constant 0 : index
    %c0_176 = arith.constant 0 : index
    %218 = vector.load %arg13[%c0_175, %c0_176] : memref<256x256xf32, #tpu.memory_space<vmem>>, vector<256x256xf32>
    %cst_177 = arith.constant dense<0.000000e+00> : vector<1x256xf32>
    %219 = tpu.matmul %215, %218, %cst_177 {dimension_numbers = #tpu.dot_dimension_numbers<[1], [0], [0], [1], [0, 0, 1, 1], [], []>} : vector<1x256xf32>, vector<256x256xf32>, vector<1x256xf32> -> vector<1x256xf32>
    %220 = arith.addf %217, %219 : vector<1x256xf32>
    %c0_178 = arith.constant 0 : index
    %221 = memref.load %arg14[%c0_178] : memref<1xf32, #tpu.memory_space<smem>>
    %222 = vector.broadcast %221 : f32 to vector<1x256xf32>
    %223 = arith.addf %220, %222 : vector<1x256xf32>
    %224 = arith.negf %223 : vector<1x256xf32>
    %225 = math.exp %224 : vector<1x256xf32>
    %cst_179 = arith.constant 1.000000e+00 : f32
    %226 = vector.broadcast %cst_179 : f32 to vector<1x256xf32>
    %227 = arith.addf %226, %225 : vector<1x256xf32>
    %228 = arith.divf %226, %227 : vector<1x256xf32>
    %229 = vector.broadcast %228 : vector<1x256xf32> to vector<32x256xf32>
    %230 = arith.mulf %229, %209 : vector<32x256xf32>
    %231 = arith.addf %230, %24 : vector<32x256xf32>
    %cst_180 = arith.constant 0.000000e+00 : f32
    %232 = vector.broadcast %cst_180 : f32 to vector<32x256xf32>
    %233 = arith.maximumf %231, %232 : vector<32x256xf32>
    %c0_181 = arith.constant 0 : index
    %c0_182 = arith.constant 0 : index
    %c0_183 = arith.constant 0 : index
    %234 = vector.load %arg15[%c0_181, %c0_182, %c0_183] : memref<1x32x256xf32, #tpu.memory_space<vmem>>, vector<1x32x256xf32>
    %235 = vector.shape_cast %234 : vector<1x32x256xf32> to vector<32x256xf32>
    %236 = vector.shape_cast %233 : vector<32x256xf32> to vector<1x32x256xf32>
    tpu.vector_store %arg15[%c0_181, %c0_182, %c0_183], %236 {strides = array<i32>} : memref<1x32x256xf32, #tpu.memory_space<vmem>>, vector<1x32x256xf32>,
    return
  }
  func.func @transform_0(%arg0: i32) -> (i32, i32, i32) {
    %c0_i32 = arith.constant 0 : i32
    %c0_i32_0 = arith.constant 0 : i32
    %c0_i32_1 = arith.constant 0 : i32
    return %arg0, %c0_i32, %c0_i32_0 : i32, i32, i32
  }
  func.func @transform_1(%arg0: i32) -> (i32, i32, i32) {
    %c0_i32 = arith.constant 0 : i32
    %c0_i32_0 = arith.constant 0 : i32
    %c0_i32_1 = arith.constant 0 : i32
    %c0_i32_2 = arith.constant 0 : i32
    return %c0_i32, %c0_i32_0, %c0_i32_1 : i32, i32, i32
  }
  func.func @transform_2(%arg0: i32) -> (i32, i32) {
    %c0_i32 = arith.constant 0 : i32
    %c0_i32_0 = arith.constant 0 : i32
    %c0_i32_1 = arith.constant 0 : i32
    return %c0_i32, %c0_i32_0 : i32, i32
  }
  func.func @transform_3(%arg0: i32) -> (i32, i32) {
    %c0_i32 = arith.constant 0 : i32
    %c0_i32_0 = arith.constant 0 : i32
    %c0_i32_1 = arith.constant 0 : i32
    return %c0_i32, %c0_i32_0 : i32, i32
  }
  func.func @transform_4(%arg0: i32) -> (i32, i32, i32) {
    %c0_i32 = arith.constant 0 : i32
    %c0_i32_0 = arith.constant 0 : i32
    %c0_i32_1 = arith.constant 0 : i32
    %c0_i32_2 = arith.constant 0 : i32
    return %c0_i32, %c0_i32_0, %c0_i32_1 : i32, i32, i32
  }
  func.func @transform_5(%arg0: i32) -> (i32, i32) {
    %c0_i32 = arith.constant 0 : i32
    %c0_i32_0 = arith.constant 0 : i32
    %c0_i32_1 = arith.constant 0 : i32
    return %c0_i32, %c0_i32_0 : i32, i32
  }
  func.func @transform_6(%arg0: i32) -> (i32, i32) {
    %c0_i32 = arith.constant 0 : i32
    %c0_i32_0 = arith.constant 0 : i32
    %c0_i32_1 = arith.constant 0 : i32
    return %c0_i32, %c0_i32_0 : i32, i32
  }
  func.func @transform_7(%arg0: i32) -> (i32, i32) {
    %c0_i32 = arith.constant 0 : i32
    %c0_i32_0 = arith.constant 0 : i32
    %c0_i32_1 = arith.constant 0 : i32
    return %c0_i32, %c0_i32_0 : i32, i32
  }
  func.func @transform_8(%arg0: i32) -> (i32, i32) {
    %c0_i32 = arith.constant 0 : i32
    %c0_i32_0 = arith.constant 0 : i32
    %c0_i32_1 = arith.constant 0 : i32
    return %c0_i32, %c0_i32_0 : i32, i32
  }
  func.func @transform_9(%arg0: i32) -> (i32, i32) {
    %c0_i32 = arith.constant 0 : i32
    %c0_i32_0 = arith.constant 0 : i32
    %c0_i32_1 = arith.constant 0 : i32
    return %c0_i32, %c0_i32_0 : i32, i32
  }
  func.func @transform_10(%arg0: i32) -> (i32, i32) {
    %c0_i32 = arith.constant 0 : i32
    %c0_i32_0 = arith.constant 0 : i32
    %c0_i32_1 = arith.constant 0 : i32
    return %c0_i32, %c0_i32_0 : i32, i32
  }
  func.func @transform_11(%arg0: i32) -> (i32, i32) {
    %c0_i32 = arith.constant 0 : i32
    %c0_i32_0 = arith.constant 0 : i32
    %c0_i32_1 = arith.constant 0 : i32
    return %c0_i32, %c0_i32_0 : i32, i32
  }
  func.func @transform_12(%arg0: i32) -> (i32, i32) {
    %c0_i32 = arith.constant 0 : i32
    %c0_i32_0 = arith.constant 0 : i32
    %c0_i32_1 = arith.constant 0 : i32
    return %c0_i32, %c0_i32_0 : i32, i32
  }
  func.func @transform_13(%arg0: i32) -> i32 {
    %c0_i32 = arith.constant 0 : i32
    %c0_i32_0 = arith.constant 0 : i32
    return %c0_i32 : i32
  }
  func.func @transform_14(%arg0: i32) -> (i32, i32, i32) {
    %c0_i32 = arith.constant 0 : i32
    %c0_i32_0 = arith.constant 0 : i32
    %c0_i32_1 = arith.constant 0 : i32
    return %arg0, %c0_i32, %c0_i32_0 : i32, i32, i32
  }
}

</mosaic_0001>

<bundles_post_ra>
// kernel: tpu_custom_call.1
= control target key start
LH: loop header
LB: loop body
LE: loop exit
PB: predicated region body
PF: predicated region fallthrough
CT: control target
= control target key end

     0   :  { %s5460_s0 = inlined_call_operand.hbm [shape: f32[2,32,256], index: 0, kind: input, shape index: {}]   ;;  %s5461_s1 = inlined_call_operand.vmem [shape: bf16[9,32,32], index: 1, kind: input, shape index: {}]   ;;  %s5462_s2 = inlined_call_operand.vmem [shape: f32[32,1], index: 2, kind: input, shape index: {}]   ;;  %s5463_s3 = inlined_call_operand.vmem [shape: f32[32,1], index: 3, kind: input, shape index: {}]   ;;  %s5464_s4 = inlined_call_operand.hbm [shape: bf16[9,32,32], index: 4, kind: input, shape index: {}]   ;;  %s5465_s5 = inlined_call_operand.vmem [shape: f32[32,1], index: 5, kind: input, shape index: {}]   ;;  %s5466_s6 = inlined_call_operand.vmem [shape: f32[32,1], index: 6, kind: input, shape index: {}]   ;;  %s5467_s7 = inlined_call_operand.vmem [shape: f32[2,32], index: 7, kind: input, shape index: {}]   ;;  %s5468_s8 = inlined_call_operand.vmem [shape: f32[2,1], index: 8, kind: input, shape index: {}]   ;;  %s5469_s9 = inlined_call_operand.vmem [shape: f32[32,2], index: 9, kind: input, shape index: {}]   ;;  %s5470_s10 = inlined_call_operand.vmem [shape: f32[32,1], index: 10, kind: input, shape index: {}]   ;;  %s5471_s11 = inlined_call_operand.hbm [shape: f32[256,256], index: 11, kind: input, shape index: {}]   ;;  %s5472_s12 = inlined_call_operand.hbm [shape: f32[256,256], index: 12, kind: input, shape index: {}]   ;;  %s5473_s13 = inlined_call_operand.<no memory space> [shape: f32[1], index: 13, kind: input, shape index: {}]   ;;  %s5474_s14 = inlined_call_operand.hbm [shape: f32[2,32,256], index: 14, kind: output, shape index: {}]  }
   0x1   :  { %5490 = sst [smem:[#allocation19_spill]] %s5464_s4 }
   0x2   :  { %5491 = sst [smem:[#allocation20_spill]] %s5467_s7 }
   0x3   :  { %5492 = sst [smem:[#allocation21_spill]] %s5468_s8 }
   0x4   :  { %5493 = sst [smem:[#allocation22_spill]] %s5469_s9 }
   0x5   :  { %5494 = sst [smem:[#allocation23_spill]] %s5470_s10 }
   0x6   :  { %5495 = sst [smem:[#allocation24_spill]] %s5474_s14 }
   0x7   :  { %19 = sst [smem:[#allocation3]] %s5473_s13 }
   0x8   :  { %20 = vsyncpa [#allocation5], 0 }
   0x9   :  { %22 = vsyncpa [#allocation5 + $0x1], 0 }
   0xa   :  { %23 = vsyncpa [#allocation8], 0 }
   0xb   :  { %24 = vsyncpa [#allocation11], 0 }
   0xc   :  { %25 = vsyncpa [#allocation6], 0 }
   0xd   :  { %27 = vsyncpa [#allocation6 + $0x1], 0  ;;  %s4473_s15 = smov 0   ;;  %s4475_s16 = smov 0  }
   0xe   :  { %s4477_s17 = smov 0   ;;  %s4479_s18 = smov 0  }
   0xf LB: > { %5496 = sst [smem:[#allocation17_spill]] %s4357_s15  ;;  %s4494_s13 = sadd.s32 4294967295, %s4369_s18   ;;  %s4369_s18 = sphi %s4479_s18, %s5537_s18   ;;  %s4365_s17 = sphi %s4477_s17, %s5536_s17   ;;  %s4361_s16 = sphi %s4475_s16, %s5535_s16   ;;  %s4357_s15 = sphi %s4473_s15, %s5534_s15  }
  0x10   : > { %s3584_s19 = sadd.s32 4294967294, %s4369_s18   ;;  %p53_p0 = scmp.ne.s32.totalorder %s4361_s16, %s4357_s15 }
  0x11   : > { %p5477_p1 = scmp.eq.s32.totalorder %s4494_s13, 0  ;;  %p356_p3 = scmp.eq.s32.totalorder %s3584_s19, 1 }
  0x12   : > { %p3585_p5 = scmp.ge.s32.totalorder %s4369_s18, 1  ;;  %p363_p7 = scmp.lt.s32.totalorder %s4369_s18, 3 }
  0x13   : > { %p4503_p4 = por %p5477_p1, %p53_p0  ;;  %p4508_p6 = por %p356_p3, %p53_p0 }
  0x14   : > { %p4513_p8 = pnand %p3585_p5, %p363_p7  ;;  %s4371_s23 = smov [#allocation7]  }
  0x15   : > { %s5497_s20 = scalar_select %p4503_p4, 1, 0 }
  0x16   : > { %s5498_s21 = scalar_select %p4508_p6, 1, 0 }
  0x17   : > { %s5500_s22 = scalar_select %p4513_p8, 1, 0 }
  0x18   : > { %5499 = sst [smem:[#allocation18_spill]] %s5498_s21  ;;  %s384_s24 = sshll.u32 %s4371_s23, 4  ;;  %s4517_s24 = int_to_ptr.vmem [resolvable:$true] %s384_s24 }
  0x19   : > { %p4031_p9 = pneg %p4513_p8  ;;  %s4372_s26 = smov [#allocation9]  }
  0x1a   : > { %s415_s27 = sshll.u32 %s4372_s26, 4  ;;  %s5502_s4 = sld [smem:[#allocation19_spill]]  ;;  %s4528_s27 = int_to_ptr.vmem [resolvable:$true] %s415_s27 }
  0x1b   : > { %p4524_p11 = pnand %p4031_p9, %p5477_p1 }
  0x1d   : > { %p4538_p13 = pneg %p4524_p11 }
  0x20   : > { %s4181_s30 = scalar_lea.hbm %s5502_s4, 2304 }
  0x21   : > { %p4182_p12 = scmp.ne.s32.totalorder %s5502_s4, %s4181_s30  ;;  %p4188_p5 = scmp.lt.u32.totalorder %s4181_s30, %s5502_s4 }
  0x23   : > { %p4184_p0 = pnand %p4538_p13, %p4182_p12 }
  0x25   : > { %p4185_p3 = pneg %p4184_p0 }
  0x27   : > { %p4190_p7 = pnand %p4188_p5, %p4185_p3 }
  0x29   : > { %4193 = shalt.err (!%p4190_p7)
}
  0x2a   : > { %s4194_s28 = scalar_lea.vmem %s4517_s24, 2304  ;;  %p4202_p2 = scmp.lt.s32.totalorder %s4517_s24, %s4517_s24 }
  0x2b   : > { %p4195_p9 = scmp.ne.s32.totalorder %s4517_s24, %s4194_s28  ;;  %p4203_p6 = scmp.lt.s32.totalorder %s4194_s28, %s4194_s28 }
  0x2d   : > { %p4197_p10 = pnand %p4195_p9, %p4538_p13  ;;  %p4204_p12 = por %p4203_p6, %p4202_p2 }
  0x2f   : > { %p4198_p1 = pneg %p4197_p10 }
  0x31   : > { %p4205_p0 = pnand %p4204_p12, %p4198_p1 }
  0x33   : > { %4208 = shalt.err (!%p4205_p0)
}
  0x34   : > { %s4373_s29 = smov 64   ;;  %s4374_s15 = smov 4  }
  0x35   : > { %4034 = dma.hbm_to_vmem [thread:$0]  (!%p4524_p11), %s5502_s4, 2304, %s4517_s24, [#allocation8], %s4373_s29, %s4373_s29, %s4374_s15  }
  0x36   : > { %s4209_s14 = scalar_lea.hbm %s5471_s11, 8192 }
  0x37   : > { %p4210_p2 = scmp.ne.s32.totalorder %s5471_s11, %s4209_s14  ;;  %p4216_p10 = scmp.lt.u32.totalorder %s4209_s14, %s5471_s11 }
  0x39   : > { %p4212_p1 = pnand %p4210_p2, %p4538_p13 }
  0x3b   : > { %p4213_p6 = pneg %p4212_p1 }
  0x3d   : > { %p4218_p3 = pnand %p4216_p10, %p4213_p6 }
  0x3f   : > { %4221 = shalt.err (!%p4218_p3)
}
  0x40   : > { %s4222_s24 = scalar_lea.vmem %s4528_s27, 8192  ;;  %p4230_p12 = scmp.lt.s32.totalorder %s4528_s27, %s4528_s27 }
  0x41   : > { %p4223_p5 = scmp.ne.s32.totalorder %s4528_s27, %s4222_s24  ;;  %p4231_p0 = scmp.lt.s32.totalorder %s4222_s24, %s4222_s24 }
  0x43   : > { %p4225_p7 = pnand %p4223_p5, %p4538_p13  ;;  %p4232_p2 = por %p4231_p0, %p4230_p12 }
  0x45   : > { %p4226_p9 = pneg %p4225_p7 }
  0x47   : > { %p4233_p1 = pnand %p4232_p2, %p4226_p9 }
  0x49   : > { %4236 = shalt.err (!%p4233_p1)
}
  0x4a   : > { %s4375_s7 = smov 256   ;;  %s4376_s8 = smov 16  }
  0x4b   : > { %4037 = dma.hbm_to_vmem [thread:$0]  (!%p4524_p11), %s5471_s11, 8192, %s4528_s27, [#allocation8], %s4375_s7, %s4375_s7, %s4376_s8  }
  0x4c   : > { %s4377_s29 = smov [#allocation10]   ;;  %s4586_s30 = sadd.s32 1, %s4369_s18  }
  0x4d   : > { %s428_s15 = sshll.u32 %s4377_s29, 4  ;;  %s4237_s26 = scalar_lea.hbm %s5472_s12, 8192  ;;  %s429_s15 = int_to_ptr.vmem [resolvable:$true] %s428_s15 }
  0x4e   : > { %p4238_p6 = scmp.ne.s32.totalorder %s5472_s12, %s4237_s26  ;;  %p4244_p5 = scmp.lt.u32.totalorder %s4237_s26, %s5472_s12 }
  0x50   : > { %p4240_p10 = pnand %p4238_p6, %p4538_p13 }
  0x52   : > { %p4241_p3 = pneg %p4240_p10 }
  0x54   : > { %p4246_p7 = pnand %p4244_p5, %p4241_p3 }
  0x56   : > { %4249 = shalt.err (!%p4246_p7)
}
  0x57   : > { %s4250_s27 = scalar_lea.vmem %s429_s15, 8192  ;;  %p4258_p2 = scmp.lt.s32.totalorder %s429_s15, %s429_s15 }
  0x58   : > { %p4251_p9 = scmp.ne.s32.totalorder %s429_s15, %s4250_s27  ;;  %p4259_p1 = scmp.lt.s32.totalorder %s4250_s27, %s4250_s27 }
  0x5a   : > { %p4253_p12 = pnand %p4251_p9, %p4538_p13  ;;  %p4260_p4 = por %p4259_p1, %p4258_p2 }
  0x5c   : > { %p4254_p0 = pneg %p4253_p12 }
  0x5e   : > { %p4261_p8 = pnand %p4260_p4, %p4254_p0 }
  0x60   : > { %4264 = shalt.err (!%p4261_p8)
}
  0x61   : > { %4040 = dma.hbm_to_vmem [thread:$0]  (!%p4524_p11), %s5472_s12, 8192, %s429_s15, [#allocation11], %s4375_s7, %s4375_s7, %s4376_s8  }
  0x62   : > { %s37_s21 = ssub.s32 %s4369_s18, %s4586_s30  ;;  %s40_s25 = sadd.s32 1, %s4365_s17 }
  0x63   : > { %p38_p4 = scmp.eq.s32.totalorder %s37_s21, 0  ;;  %p47_p8 = scmp.ne.s32.totalorder %s4365_s17, %s4361_s16 }
  0x64   : > { %p48_p13 = scmp.eq.s32.totalorder %s4369_s18, 0  ;;  %p4052_p6 = scmp.lt.s32.totalorder %s4369_s18, 2 }
  0x65   : > { %s4617_s9 = scalar_select %p38_p4, %s4365_s17, %s40_s25  }
  0x66   : > { %p49_p10 = por %p48_p13, %p47_p8  ;;  %p5504_p3 = scmp.eq.s32.totalorder %s4494_s13, 1 }
  0x67   : > { %s445_s29 = sand.u32 1, %s4365_s17   ;;  %s3720_s19 = sshll.u32 %s4369_s18, 10 }
  0x68   : > { %p4621_p5 = por %p5504_p3, %p47_p8  ;;  %s3590_s23 = sshll.u32 %s445_s29, 6 }
  0x69   : > { %s4630_s15 = scalar_lea.hbm %s5460_s0, %s3720_s19  ;;  %s449_s24 = scalar_lea.vmem [#allocation4], %s3590_s23 }
  0x6a   : > { %s456_s27 = sshll.u32 %s449_s24, 4  ;;  %p4632_p11 = pnand %p4052_p6, %p49_p10  ;;  %s4636_s27 = int_to_ptr.vmem [resolvable:$true] %s456_s27 }
  0x6b   : > { %s4638_s10 = scalar_lea.sflag [#allocation5], %s445_s29  ;;  %s4265_s21 = scalar_lea.hbm %s4630_s15, 1024 }
  0x6c   : > { %p4266_p7 = scmp.ne.s32.totalorder %s4630_s15, %s4265_s21  ;;  %p4267_p9 = pneg %p4632_p11 }
  0x6d   : > { %s4270_s23 = scalar_lea.hbm %s5460_s0, 2048  ;;  %p4271_p2 = scmp.lt.u32.totalorder %s4630_s15, %s5460_s0 }
  0x6e   : > { %p4268_p12 = pnand %p4267_p9, %p4266_p7  ;;  %p4272_p1 = scmp.lt.u32.totalorder %s4270_s23, %s4265_s21 }
  0x6f   : > { %p4274_p8 = scmp.lt.u32.totalorder %s4265_s21, %s4630_s15 }
  0x70   : > { %p4269_p0 = pneg %p4268_p12  ;;  %p4273_p4 = por %p4272_p1, %p4271_p2 }
  0x72   : > { %p4275_p13 = por %p4274_p8, %p4273_p4 }
  0x74   : > { %p4276_p6 = pnand %p4275_p13, %p4269_p0 }
  0x76   : > { %4279 = shalt.err (!%p4276_p6)
}
  0x77   : > { %s4280_s29 = scalar_lea.vmem %s4636_s27, 1024  ;;  %s4378_s24 = smov [#allocation4]  }
  0x78   : > { %p4281_p10 = scmp.ne.s32.totalorder %s4636_s27, %s4280_s29  ;;  %s4285_s25 = sshll.u32 %s4378_s24, 4  ;;  %s4286_s25 = int_to_ptr.vmem [resolvable:$false] %s4285_s25 }
  0x79   : > { %s4287_s19 = scalar_lea.vmem %s4286_s25, 2048  ;;  %p4288_p12 = scmp.lt.s32.totalorder %s4636_s27, %s4286_s25 }
  0x7a   : > { %p4283_p3 = pnand %p4281_p10, %p4267_p9  ;;  %p4289_p2 = scmp.lt.s32.totalorder %s4287_s19, %s4280_s29 }
  0x7c   : > { %p4284_p7 = pneg %p4283_p3  ;;  %p4290_p1 = por %p4289_p2, %p4288_p12 }
  0x7e   : > { %p4291_p4 = pnand %p4290_p1, %p4284_p7 }
  0x80   : > { %4294 = shalt.err (!%p4291_p4)
}
  0x81   : > { %4044 = dma.hbm_to_vmem [thread:$0]  (!%p4632_p11), %s4630_s15, 1024, %s4636_s27, %s4638_s10, %s4375_s7, %s4375_s7, %s4376_s8  }
  0x82   : > { %p5507_p9 = scmp.ne.s32.totalorder %s5500_s22, 0 }
  0x83   : > { %s4672_s21 = sand.u32 (!%p5507_p9), 1, %s4361_s16   ;;  %p5508_p0 = scmp.ne.s32.totalorder (!%p5507_p9), %s5497_s20, 0 }
  0x84   : > { %468 = sbr.rel (%p5507_p9) target bundleno = 2513 (0x9d1), region = 76  ;;  %s5483_s23 = sshll.u32 (!%p5507_p9), %s4672_s21, 6 }
  0x85   : > { %s471_s26 = scalar_lea.sflag (!%p5507_p9), [#allocation5], %s4672_s21  ;;  %s4678_s4 = scalar_lea.vmem (!%p5507_p9), [#allocation4], %s5483_s23 }
  0x8b   : > { %4340 = dma.done.wait (%p5508_p0), %s471_s26, 1024  }
  0x8c   : > { %4342 = vsyncadd (%p5508_p0), %s471_s26, 4294966272  ;;  %p5509_p11 = scmp.eq.s32.totalorder %s4494_s13, 0 }
  0x8e   : > { %4344 = dma.done.wait (%p5509_p11), [#allocation8], 10496   ;;  %p5510_p8 = pmov %p5509_p11 }
  0x90   : > { %4346 = vsyncadd (%p5510_p8), [#allocation8], 4294956800  ;;  %p5511_p13 = pmov %p5510_p8 }
  0x91   : > { %p5512_p6 = pmov %p5510_p8 }
  0x92   : > { %4348 = dma.done.wait (%p5511_p13), [#allocation11], 8192  }
  0x93   : > { %4350 = vsyncadd (%p5512_p6), [#allocation11], 4294959104  ;;  %v553_v0 = vlaneseq  ;;  %vm536_vm0 = vcmask 277504   ;;  %v4379_v1 = vmov 0   ;;  %v588_v8 = vld [vmem:[%s4678_s4 + $0x20] sm:$0xff]  ;;  %v590_v9 = vld [vmem:[%s4678_s4 + $0x30] sm:$0xff] }
  0x94   : > { %534 = vst [vmem:[#allocation2] sm:$0xff] %v4379_v1  ;;  %538 = vst [vmem:[#allocation2 + $0x18] sm:$0xff] %v4379_v1  ;;  %806 = vmatprep.mubr.bf16.mxu0 %v4379_v1  ;;  %4112 = vset.pattern.permute.xlu1 %v4379_v1  ;;  %v584_v10 = vld [vmem:[%s4678_s4] sm:$0xff]  ;;  %v594_v14 = vpack.c.bf16 %v590_v9, %v588_v8  ;;  %v586_v15 = vld [vmem:[%s4678_s4 + $0x10] sm:$0xff]  ;;  %s4380_s20 = smov 17   ;;  %vm617_vm11 = vcmask 1047688  }
  0x95   : > { %541 = vst [vmem:[#allocation2 + $0x30] sm:$0xff] %v4379_v1  ;;  %544 = vst [vmem:[#allocation2 + $0x48] sm:$0xff] %v4379_v1  ;;  %v554_v2 = vand.u32 127, %v553_v0  ;;  %4111 = vset.pattern.permute.xlu0 %v4379_v1  ;;  %1896 = vmatprep.mubr.bf16.mxu1 %v4379_v1  ;;  %v628_v3 = vshrl.u32 %v553_v0, 7  ;;  %v589_v16 = vld [vmem:[%s4678_s4 + $0x28] sm:$0xff]  ;;  %v591_v17 = vld [vmem:[%s4678_s4 + $0x38] sm:$0xff]  ;;  %v592_v18 = vpack.c.bf16 %v586_v15, %v584_v10 }
  0x96   : > { %547 = vst [vmem:[#allocation2 + $0x60] sm:$0xff] %v4379_v1  ;;  %550 = vst [vmem:[#allocation2 + $0x78] sm:$0xff] %v4379_v1  ;;  %v585_v19 = vld [vmem:[%s4678_s4 + $0x8] sm:$0xff]  ;;  %v587_v20 = vld [vmem:[%s4678_s4 + $0x18] sm:$0xff]  ;;  %604 = vrot.lane.b32.xlu1 %v594_v14, %s4380_s20  ;;  %v595_v21 = vpack.c.bf16 %v591_v17, %v589_v16  ;;  %vm608_vm12 = vcmask 138240   ;;  %s4381_s22 = smov 127  }
  0x97   : > { %540 = vst.msk [vmem:[#allocation2 + $0x28] sm:$0xff] %vm536_vm0, %v4379_v1  ;;  %537 = vst.msk [vmem:[#allocation2 + $0x10] sm:$0xff] %vm536_vm0, %v4379_v1  ;;  %v555_v4 = vadd.s32 128, %v554_v2  ;;  %v560_v5 = vand.u32 15, %v554_v2  ;;  %v4715_v11 = vsub.s32 0, %v628_v3  ;;  %v633_v12 = vsub.s32 4, %v628_v3  ;;  %600 = vrot.lane.b32.xlu0 %v592_v18, %s4380_s20 }
  0x98   : > { %543 = vst.msk [vmem:[#allocation2 + $0x40] sm:$0xff] %vm536_vm0, %v4379_v1  ;;  %546 = vst.msk [vmem:[#allocation2 + $0x58] sm:$0xff] %vm536_vm0, %v4379_v1  ;;  %v593_v23 = vpack.c.bf16 %v587_v20, %v585_v19  ;;  %s4382_s7 = smov 126   ;;  %s4383_s8 = smov 112   ;;  %vm758_vm13 = vcmask 1039360   ;;  %vm767_vm14 = vcmask 261120  }
  0x99   : > { %549 = vst.msk [vmem:[#allocation2 + $0x70] sm:$0xff] %vm536_vm0, %v4379_v1  ;;  %552 = vst.msk [vmem:[#allocation2 + $0x88] sm:$0xff] %vm536_vm0, %v4379_v1  ;;  %v567_v6 = vand.u32 15, %v555_v4  ;;  %vm4708_vm1 = vcmp.eq.s32.totalorder %v560_v5, 0  ;;  %vm4717_vm2 = vcmp.eq.s32.totalorder %v560_v5, 15  ;;  %s4384_s15 = smov 111  }
  0x9a   : > { %606 = vrot.lane.b32.xlu1 %v595_v21, %s4380_s20  ;;  %s4385_s27 = smov 110   ;;  %s5488_s10 = smov 96   ;;  %vm935_vm15 = vcmask 1031168   ;;  %vm1050_vm0 = vcmask 916480  }
  0x9b   : > { %vm581_vm3 = vcmp.eq.s32.totalorder %v567_v6, 0  ;;  %vm583_vm4 = vcmp.eq.s32.totalorder %v567_v6, 15  ;;  %602 = vrot.lane.b32.xlu0 %v593_v23, %s4380_s20  ;;  %s5486_s28 = smov 95   ;;  %s5484_s29 = smov 94  }
  0x9c   : > { %vm625_vm5 = vmpackc.low %vm581_vm3, %vm4708_vm1  ;;  %vm1153_vm1 = vcmask 908288   ;;  %vm1359_vm3 = vcmask 785408   ;;  %s5525_s19 = sld [smem:[#allocation21_spill]]  ;;  %s5526_s23 = sld [smem:[#allocation20_spill]] }
  0x9d   : > { %v626_v22 = vsel %vm625_vm5, 65537, %v4379_v1  ;;  %vm668_vm6 = vmpackc.low %vm583_vm4, %vm4717_vm2  ;;  %vm1256_vm2 = vcmask 900096   ;;  %vm1462_vm4 = vcmask 777216   ;;  %vm1565_vm5 = vcmask 769024   ;;  %s3721_s24 = sshll.u32 %s4494_s13, 10  ;;  %s5528_s25 = sshll.u32 %s4672_s21, 6 }
  0x9e   : > { %v630_v24 = vrot.slane %v626_v22, %v4715_v11  ;;  %v4734_v25 = vrot.slane %v626_v22, %v633_v12  ;;  %v669_v26 = vsel %vm668_vm6, 65537, %v4379_v1  ;;  %vm4390_vm6 = vmmov 0   ;;  %s5529_s26 = sld [smem:[#allocation24_spill]] }
  0x9f   : > { %v673_v27 = vrot.slane %v669_v26, %v4715_v11  ;;  %v4738_v28 = vrot.slane %v669_v26, %v633_v12 }
  0xa0   : > { %vm4740_vm7 = vcmp.ne.s16.totalorder %v630_v24, 0  ;;  %vm636_vm8 = vcmp.ne.s16.totalorder %v4734_v25, 0  ;;  %v4114_v24 = vld [vmem:[%s5461_s1 + $0x18] sm:$0xff]  }
  0xa1   : > { %v637_v30 = vsel %vm4740_vm7, 0, %v592_v18  ;;  %v638_v31 = vsel %vm636_vm8, 0, %v593_v23  ;;  %vm4751_vm9 = vcmp.ne.s16.totalorder %v673_v27, 0  ;;  %vm679_vm10 = vcmp.ne.s16.totalorder %v4738_v28, 0 }
  0xa2   : > { %v640_v33 = vsel %vm636_vm8, 0, %v595_v21  ;;  %v639_v34 = vsel %vm4740_vm7, 0, %v594_v14  ;;  %v680_v35 = vsel %vm4751_vm9, 0, %v592_v18  ;;  %v681_v36 = vsel %vm679_vm10, 0, %v593_v23  ;;  %647 = vrot.lane.b32.xlu1 %v638_v31, %s4380_s20  ;;  %645 = vrot.lane.b32.xlu0 %v637_v30, %s4380_s20  ;;  %v4113_v18 = vld [vmem:[%s5461_s1 + $0x10] sm:$0xff]   ;;  %v1642_v30 = vld [vmem:[%s5462_s2 + $0x8] sm:$0xff] }
  0xa3   : > { %v683_v37 = vsel %vm679_vm10, 0, %v595_v21  ;;  %v682_v38 = vsel %vm4751_vm9, 0, %v594_v14  ;;  %v1641_v31 = vld [vmem:[%s5462_s2] sm:$0xff] }
  0xa6   : > { %651 = vrot.lane.b32.xlu1 %v640_v33, %s4380_s20  ;;  %649 = vrot.lane.b32.xlu0 %v639_v34, %s4380_s20  ;;  %v1673_v33 = vld [vmem:[%s5463_s3] sm:$0xff] }
  0xaa   : > { %690 = vrot.lane.b32.xlu1 %v681_v36, %s4380_s20  ;;  %688 = vrot.lane.b32.xlu0 %v680_v35, %s4380_s20  ;;  %v1674_v36 = vld [vmem:[%s5463_s3 + $0x8] sm:$0xff] }
  0xae   : > { %694 = vrot.lane.b32.xlu1 %v683_v37, %s4380_s20  ;;  %692 = vrot.lane.b32.xlu0 %v682_v38, %s4380_s20  ;;  %v4115_v37 = vld [vmem:[%s5461_s1] sm:$0xff]  }
 0x108   : > { %v605_v39 = vpop.permute.xlu1 %604 }
 0x109   : > { %622 = vst.msk [vmem:[#allocation2 + $0x18] sm:$0xff] %vm617_vm11, %v605_v39  ;;  %v601_v40 = vpop.permute.xlu0 %600 }
 0x10a   : > { %618 = vst.msk [vmem:[#allocation2] sm:$0xff] %vm617_vm11, %v601_v40 }
 0x10c   : > { %v607_v41 = vpop.permute.xlu1 %606 }
 0x10d   : > { %624 = vst.msk [vmem:[#allocation2 + $0x28] sm:$0xff] %vm608_vm12, %v607_v41  ;;  %v603_v42 = vpop.permute.xlu0 %602  ;;  %v610_v52 = vsel %vm608_vm12, %v605_v39, %v607_v41  ;;  %v1643_v41 = vld [vmem:[%s5462_s2 + $0x10] sm:$0xff] }
 0x10e   : > { %621 = vst.msk [vmem:[#allocation2 + $0x10] sm:$0xff] %vm608_vm12, %v603_v42  ;;  %v4787_v47 = vsel %vm608_vm12, %v601_v40, %v603_v42 }
 0x110   : > { %v722_v56 = vld [vmem:[#allocation2 + $0x18] sm:$0xff] }
 0x111   : > { %v4780_v44 = vld [vmem:[#allocation2] sm:$0xff] }
 0x112   : > { %746 = vrot.lane.b32.xlu0 %v4780_v44, %s4381_s22 }
 0x114   : > { %v648_v43 = vpop.permute.xlu1 %647  ;;  %v646_v45 = vpop.permute.xlu0 %645  ;;  %v4797_v50 = vld [vmem:[#allocation2 + $0x28] sm:$0xff] }
 0x115   : > { %664 = vst.msk [vmem:[#allocation2 + $0x40] sm:$0xff] %vm608_vm12, %v648_v43  ;;  %v4789_v48 = vld [vmem:[#allocation2 + $0x10] sm:$0xff]  ;;  %v653_v58 = vsel %vm608_vm12, %v646_v45, %v648_v43  ;;  %v1644_v43 = vld [vmem:[%s5462_s2 + $0x18] sm:$0xff] }
 0x116   : > { %662 = vst.msk [vmem:[#allocation2 + $0x30] sm:$0xff] %vm617_vm11, %v646_v45  ;;  %750 = vrot.lane.b32.xlu1 %v4789_v48, %s4381_s22  ;;  %748 = vrot.lane.b32.xlu0 %v4787_v47, %s4381_s22 }
 0x118   : > { %v652_v46 = vpop.permute.xlu1 %651  ;;  %v650_v49 = vpop.permute.xlu0 %649 }
 0x119   : > { %667 = vst.msk [vmem:[#allocation2 + $0x58] sm:$0xff] %vm608_vm12, %v652_v46  ;;  %v654_v60 = vsel %vm608_vm12, %v650_v49, %v652_v46  ;;  %v1675_v46 = vld [vmem:[%s5463_s3 + $0x10] sm:$0xff] }
 0x11a   : > { %665 = vst.msk [vmem:[#allocation2 + $0x48] sm:$0xff] %vm617_vm11, %v650_v49  ;;  %754 = vrot.lane.b32.xlu1 %v610_v52, %s4381_s22  ;;  %756 = vrot.lane.b32.xlu0 %v4797_v50, %s4381_s22  ;;  %v4116_v49 = vld [vmem:[%s5461_s1 + $0x8] sm:$0xff]  }
 0x11c   : > { %v691_v51 = vpop.permute.xlu1 %690  ;;  %v689_v53 = vpop.permute.xlu0 %688  ;;  %v898_v59 = vld [vmem:[#allocation2 + $0x40] sm:$0xff] }
 0x11d   : > { %707 = vst.msk [vmem:[#allocation2 + $0x70] sm:$0xff] %vm608_vm12, %v691_v51  ;;  %v896_v54 = vld [vmem:[#allocation2 + $0x30] sm:$0xff]  ;;  %v696_v0 = vsel %vm608_vm12, %v689_v53, %v691_v51 }
 0x11e   : > { %705 = vst.msk [vmem:[#allocation2 + $0x60] sm:$0xff] %vm617_vm11, %v689_v53  ;;  %752 = vrot.lane.b32.xlu1 %v722_v56, %s4381_s22  ;;  %923 = vrot.lane.b32.xlu0 %v896_v54, %s4382_s7  ;;  %v4117_v53 = vld [vmem:[%s5461_s1 + $0x20] sm:$0xff]  }
 0x120   : > { %v695_v55 = vpop.permute.xlu1 %694  ;;  %v693_v57 = vpop.permute.xlu0 %692  ;;  %v901_v61 = vld [vmem:[#allocation2 + $0x58] sm:$0xff] }
 0x121   : > { %710 = vst.msk [vmem:[#allocation2 + $0x88] sm:$0xff] %vm608_vm12, %v695_v55  ;;  %v899_v62 = vld [vmem:[#allocation2 + $0x48] sm:$0xff]  ;;  %v4824_v3 = vsel %vm608_vm12, %v693_v57, %v695_v55 }
 0x122   : > { %708 = vst.msk [vmem:[#allocation2 + $0x78] sm:$0xff] %vm617_vm11, %v693_v57  ;;  %927 = vrot.lane.b32.xlu1 %v898_v59, %s4382_s7  ;;  %925 = vrot.lane.b32.xlu0 %v653_v58, %s4382_s7 }
 0x124   : > { %v1013_v2 = vld [vmem:[#allocation2 + $0x70] sm:$0xff] }
 0x125   : > { %v4815_v63 = vld [vmem:[#allocation2 + $0x60] sm:$0xff] }
 0x126   : > { %931 = vrot.lane.b32.xlu1 %v654_v60, %s4382_s7  ;;  %933 = vrot.lane.b32.xlu0 %v901_v61, %s4382_s7 }
 0x128   : > { %v1016_v4 = vld [vmem:[#allocation2 + $0x88] sm:$0xff] }
 0x129   : > { %v4829_v5 = vld [vmem:[#allocation2 + $0x78] sm:$0xff] }
 0x12a   : > { %929 = vrot.lane.b32.xlu1 %v899_v62, %s4382_s7  ;;  %1038 = vrot.lane.b32.xlu0 %v4815_v63, %s4383_s8 }
 0x12e   : > { %1042 = vrot.lane.b32.xlu1 %v1013_v2, %s4383_s8  ;;  %1040 = vrot.lane.b32.xlu0 %v696_v0, %s4383_s8 }
 0x132   : > { %1046 = vrot.lane.b32.xlu1 %v4824_v3, %s4383_s8  ;;  %1048 = vrot.lane.b32.xlu0 %v1016_v4, %s4383_s8 }
 0x136   : > { %1044 = vrot.lane.b32.xlu1 %v4829_v5, %s4383_s8  ;;  %1143 = vrot.lane.b32.xlu0 %v4787_v47, %s4384_s15 }
 0x13a   : > { %1145 = vrot.lane.b32.xlu1 %v4789_v48, %s4384_s15  ;;  %1141 = vrot.lane.b32.xlu0 %v4780_v44, %s4384_s15 }
 0x13e   : > { %1149 = vrot.lane.b32.xlu1 %v610_v52, %s4384_s15  ;;  %1151 = vrot.lane.b32.xlu0 %v4797_v50, %s4384_s15 }
 0x142   : > { %1147 = vrot.lane.b32.xlu1 %v722_v56, %s4384_s15  ;;  %1244 = vrot.lane.b32.xlu0 %v896_v54, %s4385_s27 }
 0x146   : > { %1248 = vrot.lane.b32.xlu1 %v898_v59, %s4385_s27  ;;  %1246 = vrot.lane.b32.xlu0 %v653_v58, %s4385_s27 }
 0x14a   : > { %1252 = vrot.lane.b32.xlu1 %v654_v60, %s4385_s27  ;;  %1254 = vrot.lane.b32.xlu0 %v901_v61, %s4385_s27 }
 0x14e   : > { %1250 = vrot.lane.b32.xlu1 %v899_v62, %s4385_s27  ;;  %1347 = vrot.lane.b32.xlu0 %v4815_v63, %s5488_s10 }
 0x152   : > { %1351 = vrot.lane.b32.xlu1 %v1013_v2, %s5488_s10  ;;  %1349 = vrot.lane.b32.xlu0 %v696_v0, %s5488_s10  ;;  %v4119_v2 = vld [vmem:[%s5461_s1 + $0x30] sm:$0xff]  }
 0x156   : > { %1355 = vrot.lane.b32.xlu1 %v4824_v3, %s5488_s10  ;;  %1357 = vrot.lane.b32.xlu0 %v1016_v4, %s5488_s10 }
 0x15a   : > { %1353 = vrot.lane.b32.xlu1 %v4829_v5, %s5488_s10  ;;  %1452 = vrot.lane.b32.xlu0 %v4787_v47, %s5486_s28 }
 0x15e   : > { %1454 = vrot.lane.b32.xlu1 %v4789_v48, %s5486_s28  ;;  %1450 = vrot.lane.b32.xlu0 %v4780_v44, %s5486_s28 }
 0x162   : > { %1458 = vrot.lane.b32.xlu1 %v610_v52, %s5486_s28  ;;  %1460 = vrot.lane.b32.xlu0 %v4797_v50, %s5486_s28  ;;  %v1676_v50 = vld [vmem:[%s5463_s3 + $0x18] sm:$0xff] }
 0x166   : > { %1456 = vrot.lane.b32.xlu1 %v722_v56, %s5486_s28  ;;  %1553 = vrot.lane.b32.xlu0 %v896_v54, %s5484_s29 }
 0x16a   : > { %1557 = vrot.lane.b32.xlu1 %v898_v59, %s5484_s29  ;;  %1555 = vrot.lane.b32.xlu0 %v653_v58, %s5484_s29  ;;  %v4118_v59 = vld [vmem:[%s5461_s1 + $0x28] sm:$0xff]  }
 0x16e   : > { %1561 = vrot.lane.b32.xlu1 %v654_v60, %s5484_s29  ;;  %1563 = vrot.lane.b32.xlu0 %v901_v61, %s5484_s29 }
 0x172   : > { %1559 = vrot.lane.b32.xlu1 %v899_v62, %s5484_s29  ;;  %1647 = vperm.xlu0 %4111, %v1641_v31   ;;  %s5524_s29 = sld [smem:[#allocation23_spill]] }
 0x176   : > { %1652 = vperm.xlu1 %4112, %v1642_v30   ;;  %1684 = vperm.xlu0 %4111, %v1674_v36  }
 0x17a   : > { %1679 = vperm.xlu1 %4112, %v1673_v33   ;;  %1662 = vperm.xlu0 %4111, %v1644_v43  }
 0x17e   : > { %1657 = vperm.xlu1 %4112, %v1643_v41   ;;  %1694 = vperm.xlu0 %4111, %v1676_v50   ;;  %v4125_v41 = vld [vmem:[%s5461_s1 + $0x60] sm:$0xff]   ;;  %v4127_v50 = vld [vmem:[%s5461_s1 + $0x70] sm:$0xff]  }
 0x182   : > { %1689 = vperm.xlu1 %4112, %v1675_v46  }
 0x184   : > { %v747_v6 = vpop.permute.xlu0 %746 }
 0x188   : > { %v751_v7 = vpop.permute.xlu1 %750  ;;  %v749_v8 = vpop.permute.xlu0 %748 }
 0x189   : > { %v760_v9 = vsel %vm758_vm13, %v749_v8, %v751_v7  ;;  %v759_v10 = vsel %vm758_vm13, %v747_v6, %v749_v8  ;;  %v4120_v8 = vld [vmem:[%s5461_s1 + $0x38] sm:$0xff]  }
 0x18a   : > { %774 = vmatprep.subr.bf16.mxu0 %v760_v9 }
 0x18b   : > { %775 = vmatpush1.bf16.msra.mxu0 %v759_v10 }
 0x18c   : > { %v755_v12 = vpop.permute.xlu1 %754  ;;  %v757_v13 = vpop.permute.xlu0 %756 }
 0x18d   : > { %v762_v14 = vsel %vm758_vm13, %v755_v12, %v757_v13  ;;  %v4121_v13 = vld [vmem:[%s5461_s1 + $0x40] sm:$0xff]  }
 0x18e   : > { %776 = vmatprep.subr.bf16.mxu0 %v762_v14 }
 0x190   : > { %v753_v15 = vpop.permute.xlu1 %752  ;;  %v924_v16 = vpop.permute.xlu0 %923 }
 0x191   : > { %v761_v17 = vsel %vm758_vm13, %v753_v15, %v755_v12 }
 0x192   : > { %777 = vmatpush1.bf16.msra.mxu0 %v761_v17 }
 0x193   : > { %843 = vmatprep.subr.bf16.mxu0 %v696_v0 }
 0x194   : > { %v928_v19 = vpop.permute.xlu1 %927  ;;  %v926_v20 = vpop.permute.xlu0 %925 }
 0x195   : > { %3605 = vmatmul.mubr.msk.bf16.vlgmr.msra.gmra.mrb[0].mxu0 %vm767_vm14, %v4113_v18  ;;  %v937_v23 = vsel %vm935_vm15, %v926_v20, %v928_v19  ;;  %v936_v42 = vsel %vm935_vm15, %v924_v16, %v926_v20 }
 0x196   : > { %844 = vmatpush1.bf16.msra.mxu0 %v4815_v63  ;;  %816 = vmatprep.mubr.bf16.mxu0 %v4379_v1 }
 0x197   : > { %845 = vmatprep.subr.bf16.mxu0 %v4824_v3 }
 0x198   : > { %v932_v21 = vpop.permute.xlu1 %931  ;;  %v934_v22 = vpop.permute.xlu0 %933 }
 0x199   : > { %v939_v40 = vsel %vm935_vm15, %v932_v21, %v934_v22 }
 0x19a   : > { %846 = vmatpush1.bf16.msra.mxu0 %v4829_v5 }
 0x19b   : > { %950 = vmatprep.subr.bf16.mxu0 %v937_v23 }
 0x19c   : > { %v930_v26 = vpop.permute.xlu1 %929  ;;  %v1039_v27 = vpop.permute.xlu0 %1038 }
 0x19d   : > { %3606 = vmatmul.mubr.msk.bf16.gmra.mrb[4].mxu0 %vm767_vm14, %v4114_v24  ;;  %v938_v44 = vsel %vm935_vm15, %v930_v26, %v932_v21  ;;  %v4122_v21 = vld [vmem:[%s5461_s1 + $0x48] sm:$0xff]   ;;  %v4123_v26 = vld [vmem:[%s5461_s1 + $0x50] sm:$0xff]  }
 0x19e   : > { %875 = vmatprep.mubr.bf16.mxu0 %v4379_v1 }
 0x1a0   : > { %v1043_v34 = vpop.permute.xlu1 %1042  ;;  %v1041_v35 = vpop.permute.xlu0 %1040 }
 0x1a1   : > { %v1052_v45 = vsel %vm1050_vm0, %v1041_v35, %v1043_v34  ;;  %v1051_v57 = vsel %vm1050_vm0, %v1039_v27, %v1041_v35  ;;  %v4124_v35 = vld [vmem:[%s5461_s1 + $0x58] sm:$0xff]  }
 0x1a4   : > { %v1047_v38 = vpop.permute.xlu1 %1046  ;;  %v1049_v39 = vpop.permute.xlu0 %1048 }
 0x1a5   : > { %3609 = vmatmul.mubr.msk.bf16.vlgmr.msra.gmra.mrb[0].mxu0 %vm767_vm14, %v4115_v37  ;;  %v1054_v54 = vsel %vm1050_vm0, %v1047_v38, %v1049_v39 }
 0x1a6   : > { %951 = vmatpush1.bf16.msra.mxu0 %v936_v42  ;;  %885 = vmatprep.mubr.bf16.mxu0 %v4379_v1 }
 0x1a7   : > { %952 = vmatprep.subr.bf16.mxu0 %v939_v40 }
 0x1a8   : > { %v1045_v47 = vpop.permute.xlu1 %1044  ;;  %v1144_v48 = vpop.permute.xlu0 %1143 }
 0x1a9   : > { %v1053_v58 = vsel %vm1050_vm0, %v1045_v47, %v1047_v38  ;;  %v4126_v47 = vld [vmem:[%s5461_s1 + $0x68] sm:$0xff]  }
 0x1aa   : > { %953 = vmatpush1.bf16.msra.mxu0 %v938_v44 }
 0x1ab   : > { %1065 = vmatprep.subr.bf16.mxu0 %v1052_v45 }
 0x1ac   : > { %v1146_v51 = vpop.permute.xlu1 %1145  ;;  %v1142_v52 = vpop.permute.xlu0 %1141 }
 0x1ad   : > { %3610 = vmatmul.mubr.msk.bf16.gmra.mrb[4].mxu0 %vm767_vm14, %v4116_v49  ;;  %v1155_v60 = vsel %vm1153_vm1, %v1144_v48, %v1146_v51  ;;  %v1154_v3 = vsel %vm1153_vm1, %v1142_v52, %v1144_v48 }
 0x1ae   : > { %982 = vmatprep.mubr.bf16.mxu0 %v4379_v1 }
 0x1b0   : > { %v1150_v55 = vpop.permute.xlu1 %1149  ;;  %v1152_v56 = vpop.permute.xlu0 %1151 }
 0x1b1   : > { %v1157_v4 = vsel %vm1153_vm1, %v1150_v55, %v1152_v56  ;;  %v4128_v56 = vld [vmem:[%s5461_s1 + $0x78] sm:$0xff]  }
 0x1b4   : > { %v1148_v61 = vpop.permute.xlu1 %1147  ;;  %v1245_v62 = vpop.permute.xlu0 %1244 }
 0x1b5   : > { %3617 = vmatmul.mubr.msk.bf16.vlgmr.msra.gmra.mrb[0].mxu0 %vm767_vm14, %v4117_v53  ;;  %v1156_v7 = vsel %vm1153_vm1, %v1148_v61, %v1150_v55 }
 0x1b6   : > { %1066 = vmatpush1.bf16.msra.mxu0 %v1051_v57  ;;  %992 = vmatprep.mubr.bf16.mxu0 %v4379_v1  ;;  %v4129_v57 = vld [vmem:[%s5461_s1 + $0x80] sm:$0xff]  }
 0x1b7   : > { %1067 = vmatprep.subr.bf16.mxu0 %v1054_v54 }
 0x1b8   : > { %v1249_v63 = vpop.permute.xlu1 %1248  ;;  %v1247_v0 = vpop.permute.xlu0 %1246 }
 0x1b9   : > { %v1258_v9 = vsel %vm1256_vm2, %v1247_v0, %v1249_v63  ;;  %v1257_v16 = vsel %vm1256_vm2, %v1245_v62, %v1247_v0 }
 0x1ba   : > { %1068 = vmatpush1.bf16.msra.mxu0 %v1053_v58  ;;  %v4130_v58 = vld [vmem:[%s5461_s1 + $0x88] sm:$0xff]  }
 0x1bb   : > { %1168 = vmatprep.subr.bf16.mxu0 %v1155_v60 }
 0x1bc   : > { %v1253_v5 = vpop.permute.xlu1 %1252  ;;  %v1255_v6 = vpop.permute.xlu0 %1254 }
 0x1bd   : > { %3618 = vmatmul.mubr.msk.bf16.gmra.mrb[4].mxu0 %vm767_vm14, %v4118_v59  ;;  %v1260_v17 = vsel %vm1256_vm2, %v1253_v5, %v1255_v6 }
 0x1be   : > { %1097 = vmatprep.mubr.bf16.mxu0 %v4379_v1 }
 0x1c0   : > { %v1251_v10 = vpop.permute.xlu1 %1250  ;;  %v1348_v12 = vpop.permute.xlu0 %1347 }
 0x1c1   : > { %v1259_v18 = vsel %vm1256_vm2, %v1251_v10, %v1253_v5 }
 0x1c4   : > { %v1352_v14 = vpop.permute.xlu1 %1351  ;;  %v1350_v15 = vpop.permute.xlu0 %1349 }
 0x1c5   : > { %3625 = vmatmul.mubr.msk.bf16.vlgmr.msra.gmra.mrb[0].mxu0 %vm767_vm14, %v4119_v2  ;;  %v1361_v22 = vsel %vm1359_vm3, %v1350_v15, %v1352_v14  ;;  %v1360_v31 = vsel %vm1359_vm3, %v1348_v12, %v1350_v15 }
 0x1c6   : > { %1169 = vmatpush1.bf16.msra.mxu0 %v1154_v3  ;;  %1107 = vmatprep.mubr.bf16.mxu0 %v4379_v1 }
 0x1c7   : > { %1170 = vmatprep.subr.bf16.mxu0 %v1157_v4 }
 0x1c8   : > { %v1356_v19 = vpop.permute.xlu1 %1355  ;;  %v1358_v20 = vpop.permute.xlu0 %1357 }
 0x1c9   : > { %v1363_v33 = vsel %vm1359_vm3, %v1356_v19, %v1358_v20 }
 0x1ca   : > { %1171 = vmatpush1.bf16.msra.mxu0 %v1156_v7 }
 0x1cb   : > { %1271 = vmatprep.subr.bf16.mxu0 %v1258_v9 }
 0x1cc   : > { %v1354_v23 = vpop.permute.xlu1 %1353  ;;  %v1453_v24 = vpop.permute.xlu0 %1452 }
 0x1cd   : > { %3626 = vmatmul.mubr.msk.bf16.gmra.mrb[4].mxu0 %vm767_vm14, %v4120_v8  ;;  %v1362_v34 = vsel %vm1359_vm3, %v1354_v23, %v1356_v19 }
 0x1ce   : > { %1200 = vmatprep.mubr.bf16.mxu0 %v4379_v1 }
 0x1d0   : > { %v1455_v27 = vpop.permute.xlu1 %1454  ;;  %v1451_v30 = vpop.permute.xlu0 %1450 }
 0x1d1   : > { %v1464_v36 = vsel %vm1462_vm4, %v1453_v24, %v1455_v27  ;;  %v1463_v42 = vsel %vm1462_vm4, %v1451_v30, %v1453_v24 }
 0x1d4   : > { %v1459_v37 = vpop.permute.xlu1 %1458  ;;  %v1461_v38 = vpop.permute.xlu0 %1460 }
 0x1d5   : > { %3633 = vmatmul.mubr.msk.bf16.vlgmr.msra.gmra.mrb[0].mxu0 %vm767_vm14, %v4121_v13  ;;  %v1466_v43 = vsel %vm1462_vm4, %v1459_v37, %v1461_v38 }
 0x1d6   : > { %1272 = vmatpush1.bf16.msra.mxu0 %v1257_v16  ;;  %1210 = vmatprep.mubr.bf16.mxu0 %v4379_v1 }
 0x1d7   : > { %1273 = vmatprep.subr.bf16.mxu0 %v1260_v17 }
 0x1d8   : > { %v1457_v39 = vpop.permute.xlu1 %1456  ;;  %v1554_v40 = vpop.permute.xlu0 %1553 }
 0x1d9   : > { %v1465_v46 = vsel %vm1462_vm4, %v1457_v39, %v1459_v37 }
 0x1da   : > { %1274 = vmatpush1.bf16.msra.mxu0 %v1259_v18 }
 0x1db   : > { %1374 = vmatprep.subr.bf16.mxu0 %v1361_v22 }
 0x1dc   : > { %v1558_v44 = vpop.permute.xlu1 %1557  ;;  %v1556_v45 = vpop.permute.xlu0 %1555 }
 0x1dd   : > { %3634 = vmatmul.mubr.msk.bf16.gmra.mrb[4].mxu0 %vm767_vm14, %v4122_v21  ;;  %v1567_v48 = vsel %vm1565_vm5, %v1556_v45, %v1558_v44  ;;  %v1566_v52 = vsel %vm1565_vm5, %v1554_v40, %v1556_v45 }
 0x1de   : > { %1303 = vmatprep.mubr.bf16.mxu0 %v4379_v1 }
 0x1e0   : > { %v1562_v49 = vpop.permute.xlu1 %1561  ;;  %v1564_v51 = vpop.permute.xlu0 %1563 }
 0x1e1   : > { %v1569_v54 = vsel %vm1565_vm5, %v1562_v49, %v1564_v51 }
 0x1e4   : > { %v1560_v53 = vpop.permute.xlu1 %1559 }
 0x1e5   : > { %3641 = vmatmul.mubr.msk.bf16.vlgmr.msra.gmra.mrb[0].mxu0 %vm767_vm14, %v4123_v26  ;;  %v1568_v55 = vsel %vm1565_vm5, %v1560_v53, %v1562_v49 }
 0x1e6   : > { %1375 = vmatpush1.bf16.msra.mxu0 %v1360_v31  ;;  %1313 = vmatprep.mubr.bf16.mxu0 %v4379_v1 }
 0x1e7   : > { %1376 = vmatprep.subr.bf16.mxu0 %v1363_v33 }
 0x1ea   : > { %1377 = vmatpush1.bf16.msra.mxu0 %v1362_v34 }
 0x1eb   : > { %1477 = vmatprep.subr.bf16.mxu0 %v1464_v36 }
 0x1ed   : > { %3642 = vmatmul.mubr.msk.bf16.gmra.mrb[4].mxu0 %vm767_vm14, %v4124_v35 }
 0x1ee   : > { %1406 = vmatprep.mubr.bf16.mxu0 %v4379_v1 }
 0x1f1   : > { %v1648_v60 = vpop.permute.xlu0 %1647 }
 0x1f5   : > { %3649 = vmatmul.mubr.msk.bf16.vlgmr.msra.gmra.mrb[0].mxu0 %vm767_vm14, %v4125_v41  ;;  %v1653_v59 = vpop.permute.xlu1 %1652  ;;  %v1685_v62 = vpop.permute.xlu0 %1684 }
 0x1f6   : > { %1478 = vmatpush1.bf16.msra.mxu0 %v1463_v42  ;;  %1416 = vmatprep.mubr.bf16.mxu0 %v4379_v1 }
 0x1f7   : > { %1479 = vmatprep.subr.bf16.mxu0 %v1466_v43 }
 0x1f9   : > { %v1680_v61 = vpop.permute.xlu1 %1679  ;;  %v1663_v13 = vpop.permute.xlu0 %1662 }
 0x1fa   : > { %1480 = vmatpush1.bf16.msra.mxu0 %v1465_v46 }
 0x1fb   : > { %1580 = vmatprep.subr.bf16.mxu0 %v1567_v48 }
 0x1fd   : > { %3650 = vmatmul.mubr.msk.bf16.gmra.mrb[4].mxu0 %vm767_vm14, %v4126_v47  ;;  %v1658_v8 = vpop.permute.xlu1 %1657  ;;  %v1695_v34 = vpop.permute.xlu0 %1694 }
 0x1fe   : > { %1509 = vmatprep.mubr.bf16.mxu0 %v4379_v1 }
 0x201   : > { %v1690_v23 = vpop.permute.xlu1 %1689 }
 0x205   : > { %3657 = vmatmul.mubr.msk.bf16.vlgmr.msra.gmra.mrb[0].mxu0 %vm767_vm14, %v4127_v50 }
 0x206   : > { %1581 = vmatpush1.bf16.msra.mxu0 %v1566_v52  ;;  %1519 = vmatprep.mubr.bf16.mxu0 %v4379_v1 }
 0x207   : > { %1582 = vmatprep.subr.bf16.mxu0 %v1569_v54 }
 0x20a   : > { %1583 = vmatpush1.bf16.msra.mxu0 %v1568_v55 }
 0x20d   : > { %3658 = vmatmul.mubr.msk.bf16.gmra.mrb[4].mxu0 %vm767_vm14, %v4128_v56 }
 0x20e   : > { %1612 = vmatprep.mubr.bf16.mxu0 %v4379_v1 }
 0x215   : > { %3665 = vmatmul.mubr.msk.bf16.vlgmr.msra.gmra.mrb[0].mxu0 %vm767_vm14, %v4129_v57 }
 0x216   : > { %1622 = vmatprep.mubr.bf16.mxu0 %v4379_v1 }
 0x21d   : > { %3666 = vmatmul.mubr.msk.bf16.gmra.mrb[4].mxu0 %vm767_vm14, %v4130_v58 }
 0x2e8   : > { %v1614_v63 = vpop.f32.mrb[0].mxu0 }
 0x2e9   : > { %v1665_v0 = vmul.f32 %v1648_v60, %v1614_v63  ;;  %v1616_v2 = vpop.f32.mrb[1].mxu0 }
 0x2ea   : > { %v1666_v3 = vmul.f32 %v1648_v60, %v1616_v2  ;;  %v1618_v4 = vpop.f32.mrb[2].mxu0 }
 0x2eb   : > { %v1697_v5 = vadd.f32 %v1680_v61, %v1665_v0  ;;  %v1667_v6 = vmul.f32 %v1653_v59, %v1618_v4  ;;  %v1620_v7 = vpop.f32.mrb[3].mxu0 }
 0x2ec   : > { %v1698_v9 = vadd.f32 %v1680_v61, %v1666_v3  ;;  %v1668_v10 = vmul.f32 %v1653_v59, %v1620_v7 }
 0x2ed   : > { %v1699_v12 = vadd.f32 %v1685_v62, %v1667_v6  ;;  %v1705_v15 = vmax.f32 %v1697_v5, 0.0 }
 0x2ee   : > { %v1700_v14 = vadd.f32 %v1685_v62, %v1668_v10  ;;  %v1706_v17 = vmax.f32 %v1698_v9, 0.0 }
 0x2ef   : > { %v1707_v16 = vmax.f32 %v1699_v12, 0.0 }
 0x2f0   : > { %v1708_v18 = vmax.f32 %v1700_v14, 0.0  ;;  %v1624_v19 = vpop.f32.mrb[4].mxu0 }
 0x2f1   : > { %v1669_v20 = vmul.f32 %v1658_v8, %v1624_v19  ;;  %v1626_v21 = vpop.f32.mrb[5].mxu0  ;;  %v1713_v22 = vpack.c.bf16 %v1707_v16, %v1705_v15  ;;  %v2756_v19 = vld [vmem:[%s5466_s6] sm:$0xff] }
 0x2f2   : > { %v1670_v24 = vmul.f32 %v1658_v8, %v1626_v21  ;;  %v1628_v26 = vpop.f32.mrb[6].mxu0  ;;  %v1714_v27 = vpack.c.bf16 %v1708_v18, %v1706_v17  ;;  %v2724_v17 = vld [vmem:[%s5465_s5] sm:$0xff]  ;;  %v2725_v18 = vld [vmem:[%s5465_s5 + $0x8] sm:$0xff]  ;;  %v2726_v21 = vld [vmem:[%s5465_s5 + $0x10] sm:$0xff] }
 0x2f3   : > { %v1701_v30 = vadd.f32 %v1690_v23, %v1669_v20  ;;  %v1671_v31 = vmul.f32 %v1663_v13, %v1628_v26  ;;  %v1630_v33 = vpop.f32.mrb[7].mxu0  ;;  %1721 = vrot.lane.b32.xlu1 %v1713_v22, %s4380_s20  ;;  %v1743_v45 = vsel %vm4740_vm7, 0, %v1713_v22  ;;  %v1773_v49 = vsel %vm4751_vm9, 0, %v1713_v22  ;;  %v2757_v20 = vld [vmem:[%s5466_s6 + $0x8] sm:$0xff]  ;;  %v2727_v22 = vld [vmem:[%s5465_s5 + $0x18] sm:$0xff] }
 0x2f4   : > { %v1702_v35 = vadd.f32 %v1690_v23, %v1670_v24  ;;  %v1672_v36 = vmul.f32 %v1663_v13, %v1630_v33  ;;  %1723 = vrot.lane.b32.xlu0 %v1714_v27, %s4380_s20  ;;  %v1744_v46 = vsel %vm636_vm8, 0, %v1714_v27  ;;  %v1774_v50 = vsel %vm679_vm10, 0, %v1714_v27  ;;  %v2758_v23 = vld [vmem:[%s5466_s6 + $0x10] sm:$0xff]  ;;  %v2759_v24 = vld [vmem:[%s5466_s6 + $0x18] sm:$0xff] }
 0x2f5   : > { %v1703_v37 = vadd.f32 %v1695_v34, %v1671_v31  ;;  %v1709_v39 = vmax.f32 %v1701_v30, 0.0 }
 0x2f6   : > { %v1704_v38 = vadd.f32 %v1695_v34, %v1672_v36  ;;  %v1710_v41 = vmax.f32 %v1702_v35, 0.0 }
 0x2f7   : > { %v1711_v40 = vmax.f32 %v1703_v37, 0.0 }
 0x2f8   : > { %v1712_v42 = vmax.f32 %v1704_v38, 0.0 }
 0x2f9   : > { %v1715_v43 = vpack.c.bf16 %v1711_v40, %v1709_v39  ;;  %v4131_v39 = vld [vmem:[#allocation7 + $0x10] sm:$0xff]  }
 0x2fa   : > { %v1716_v44 = vpack.c.bf16 %v1712_v42, %v1710_v41 }
 0x2fb   : > { %1725 = vrot.lane.b32.xlu1 %v1715_v43, %s4380_s20  ;;  %v1745_v47 = vsel %vm4740_vm7, 0, %v1715_v43  ;;  %v1775_v29 = vsel %vm4751_vm9, 0, %v1715_v43  ;;  %vm2816_vm7 = vcmask 7168   ;;  %vm2943_vm9 = vcmask 1041408  }
 0x2fc   : > { %1727 = vrot.lane.b32.xlu0 %v1716_v44, %s4380_s20  ;;  %v1746_v48 = vsel %vm636_vm8, 0, %v1716_v44  ;;  %v1776_v25 = vsel %vm679_vm10, 0, %v1716_v44  ;;  %v4132_v44 = vld [vmem:[#allocation7 + $0x18] sm:$0xff]   ;;  %vm2930_vm8 = vcmask 15360  }
 0x2ff   : > { %1751 = vrot.lane.b32.xlu1 %v1743_v45, %s4380_s20 }
 0x300   : > { %1753 = vrot.lane.b32.xlu0 %v1744_v46, %s4380_s20 }
 0x303   : > { %1755 = vrot.lane.b32.xlu1 %v1745_v47, %s4380_s20 }
 0x304   : > { %1757 = vrot.lane.b32.xlu0 %v1746_v48, %s4380_s20 }
 0x307   : > { %1781 = vrot.lane.b32.xlu1 %v1773_v49, %s4380_s20 }
 0x308   : > { %1783 = vrot.lane.b32.xlu0 %v1774_v50, %s4380_s20  ;;  %v4133_v50 = vld [vmem:[#allocation7] sm:$0xff]  }
 0x30b   : > { %1785 = vrot.lane.b32.xlu1 %v1775_v29, %s4380_s20 }
 0x30c   : > { %1787 = vrot.lane.b32.xlu0 %v1776_v25, %s4380_s20  ;;  %s5521_s20 = smov 96  }
 0x365   : > { %v1722_v51 = vpop.permute.xlu1 %1721 }
 0x366   : > { %1737 = vst.msk [vmem:[#allocation2] sm:$0xff] %vm617_vm11, %v1722_v51  ;;  %v1724_v52 = vpop.permute.xlu0 %1723 }
 0x367   : > { %v5052_v53 = vsel %vm608_vm12, %v1722_v51, %v1724_v52  ;;  %1739 = vst.msk [vmem:[#allocation2 + $0x10] sm:$0xff] %vm608_vm12, %v1724_v52 }
 0x36d   : > { %v1726_v54 = vpop.permute.xlu1 %1725  ;;  %v5055_v55 = vld [vmem:[#allocation2] sm:$0xff] }
 0x36e   : > { %1740 = vst.msk [vmem:[#allocation2 + $0x18] sm:$0xff] %vm617_vm11, %v1726_v54  ;;  %1838 = vrot.lane.b32.xlu1 %v5055_v55, %s4381_s22  ;;  %v1728_v28 = vpop.permute.xlu0 %1727  ;;  %v5060_v32 = vld [vmem:[#allocation2 + $0x10] sm:$0xff] }
 0x36f   : > { %v5063_v56 = vsel %vm608_vm12, %v1726_v54, %v1728_v28  ;;  %1742 = vst.msk [vmem:[#allocation2 + $0x28] sm:$0xff] %vm608_vm12, %v1728_v28  ;;  %1842 = vrot.lane.b32.xlu0 %v5060_v32, %s4381_s22  ;;  %v4134_v28 = vld [vmem:[#allocation7 + $0x8] sm:$0xff]  }
 0x371   : > { %v1752_v57 = vpop.permute.xlu1 %1751 }
 0x372   : > { %1767 = vst.msk [vmem:[#allocation2 + $0x30] sm:$0xff] %vm617_vm11, %v1752_v57  ;;  %1840 = vrot.lane.b32.xlu1 %v5052_v53, %s4381_s22  ;;  %v1754_v58 = vpop.permute.xlu0 %1753 }
 0x373   : > { %v5072_v59 = vsel %vm608_vm12, %v1752_v57, %v1754_v58  ;;  %1769 = vst.msk [vmem:[#allocation2 + $0x40] sm:$0xff] %vm608_vm12, %v1754_v58  ;;  %1846 = vrot.lane.b32.xlu0 %v5063_v56, %s4381_s22  ;;  %v4135_v58 = vld [vmem:[#allocation7 + $0x20] sm:$0xff]  }
 0x375   : > { %v1756_v60 = vpop.permute.xlu1 %1755  ;;  %v1814_v61 = vld [vmem:[#allocation2 + $0x18] sm:$0xff] }
 0x376   : > { %1770 = vst.msk [vmem:[#allocation2 + $0x48] sm:$0xff] %vm617_vm11, %v1756_v60  ;;  %v1758_v62 = vpop.permute.xlu0 %1757  ;;  %v1816_v63 = vld [vmem:[#allocation2 + $0x28] sm:$0xff] }
 0x377   : > { %v1760_v0 = vsel %vm608_vm12, %v1756_v60, %v1758_v62  ;;  %1772 = vst.msk [vmem:[#allocation2 + $0x58] sm:$0xff] %vm608_vm12, %v1758_v62  ;;  %1848 = vrot.lane.b32.xlu1 %v1816_v63, %s4381_s22  ;;  %1844 = vrot.lane.b32.xlu0 %v1814_v61, %s4381_s22 }
 0x379   : > { %v1782_v2 = vpop.permute.xlu1 %1781  ;;  %v1986_v8 = vld [vmem:[#allocation2 + $0x30] sm:$0xff] }
 0x37a   : > { %1797 = vst.msk [vmem:[#allocation2 + $0x60] sm:$0xff] %vm617_vm11, %v1782_v2  ;;  %v1784_v3 = vpop.permute.xlu0 %1783  ;;  %v1988_v4 = vld [vmem:[#allocation2 + $0x40] sm:$0xff] }
 0x37b   : > { %v5084_v5 = vsel %vm608_vm12, %v1782_v2, %v1784_v3  ;;  %1799 = vst.msk [vmem:[#allocation2 + $0x70] sm:$0xff] %vm608_vm12, %v1784_v3  ;;  %2015 = vrot.lane.b32.xlu1 %v5072_v59, %s4382_s7  ;;  %2017 = vrot.lane.b32.xlu0 %v1988_v4, %s4382_s7 }
 0x37d   : > { %v1786_v6 = vpop.permute.xlu1 %1785  ;;  %v1989_v12 = vld [vmem:[#allocation2 + $0x48] sm:$0xff] }
 0x37e   : > { %1800 = vst.msk [vmem:[#allocation2 + $0x78] sm:$0xff] %vm617_vm11, %v1786_v6  ;;  %v1788_v7 = vpop.permute.xlu0 %1787  ;;  %v1991_v10 = vld [vmem:[#allocation2 + $0x58] sm:$0xff] }
 0x37f   : > { %v5092_v9 = vsel %vm608_vm12, %v1786_v6, %v1788_v7  ;;  %1802 = vst.msk [vmem:[#allocation2 + $0x88] sm:$0xff] %vm608_vm12, %v1788_v7  ;;  %2013 = vrot.lane.b32.xlu1 %v1986_v8, %s4382_s7  ;;  %2021 = vrot.lane.b32.xlu0 %v1760_v0, %s4382_s7  ;;  %v4137_v7 = vld [vmem:[#allocation7 + $0x30] sm:$0xff]  }
 0x381   : > { %v5102_v14 = vld [vmem:[#allocation2 + $0x60] sm:$0xff] }
 0x382   : > { %v2102_v13 = vld [vmem:[#allocation2 + $0x70] sm:$0xff] }
 0x383   : > { %2023 = vrot.lane.b32.xlu1 %v1991_v10, %s4382_s7  ;;  %2019 = vrot.lane.b32.xlu0 %v1989_v12, %s4382_s7  ;;  %s5522_s7 = smov 95  }
 0x385   : > { %v5108_v16 = vld [vmem:[#allocation2 + $0x78] sm:$0xff] }
 0x386   : > { %v2105_v15 = vld [vmem:[#allocation2 + $0x88] sm:$0xff] }
 0x387   : > { %2129 = vrot.lane.b32.xlu1 %v5084_v5, %s4383_s8  ;;  %2131 = vrot.lane.b32.xlu0 %v2102_v13, %s4383_s8 }
 0x38b   : > { %2127 = vrot.lane.b32.xlu1 %v5102_v14, %s4383_s8  ;;  %2135 = vrot.lane.b32.xlu0 %v5092_v9, %s4383_s8 }
 0x38f   : > { %2137 = vrot.lane.b32.xlu1 %v2105_v15, %s4383_s8  ;;  %2133 = vrot.lane.b32.xlu0 %v5108_v16, %s4383_s8  ;;  %s5523_s8 = smov 94  }
 0x393   : > { %2231 = vrot.lane.b32.xlu1 %v5052_v53, %s4384_s15  ;;  %2233 = vrot.lane.b32.xlu0 %v5060_v32, %s4384_s15 }
 0x397   : > { %2229 = vrot.lane.b32.xlu1 %v5055_v55, %s4384_s15  ;;  %2237 = vrot.lane.b32.xlu0 %v5063_v56, %s4384_s15 }
 0x39b   : > { %2239 = vrot.lane.b32.xlu1 %v1816_v63, %s4384_s15  ;;  %2235 = vrot.lane.b32.xlu0 %v1814_v61, %s4384_s15 }
 0x39f   : > { %2333 = vrot.lane.b32.xlu1 %v5072_v59, %s4385_s27  ;;  %2335 = vrot.lane.b32.xlu0 %v1988_v4, %s4385_s27 }
 0x3a3   : > { %2331 = vrot.lane.b32.xlu1 %v1986_v8, %s4385_s27  ;;  %2339 = vrot.lane.b32.xlu0 %v1760_v0, %s4385_s27 }
 0x3a7   : > { %2341 = vrot.lane.b32.xlu1 %v1991_v10, %s4385_s27  ;;  %2337 = vrot.lane.b32.xlu0 %v1989_v12, %s4385_s27 }
 0x3ab   : > { %2435 = vrot.lane.b32.xlu1 %v5084_v5, %s5521_s20  ;;  %2437 = vrot.lane.b32.xlu0 %v2102_v13, %s5521_s20 }
 0x3af   : > { %2433 = vrot.lane.b32.xlu1 %v5102_v14, %s5521_s20  ;;  %2441 = vrot.lane.b32.xlu0 %v5092_v9, %s5521_s20 }
 0x3b3   : > { %2443 = vrot.lane.b32.xlu1 %v2105_v15, %s5521_s20  ;;  %2439 = vrot.lane.b32.xlu0 %v5108_v16, %s5521_s20  ;;  %s5406_s20 = scalar_lea.hbm %s5529_s26, %s3721_s24 }
 0x3b7   : > { %2537 = vrot.lane.b32.xlu1 %v5052_v53, %s5522_s7  ;;  %2539 = vrot.lane.b32.xlu0 %v5060_v32, %s5522_s7 }
 0x3bb   : > { %2535 = vrot.lane.b32.xlu1 %v5055_v55, %s5522_s7  ;;  %2543 = vrot.lane.b32.xlu0 %v5063_v56, %s5522_s7 }
 0x3bf   : > { %2545 = vrot.lane.b32.xlu1 %v1816_v63, %s5522_s7  ;;  %2541 = vrot.lane.b32.xlu0 %v1814_v61, %s5522_s7 }
 0x3c3   : > { %2639 = vrot.lane.b32.xlu1 %v5072_v59, %s5523_s8  ;;  %2641 = vrot.lane.b32.xlu0 %v1988_v4, %s5523_s8 }
 0x3c7   : > { %2637 = vrot.lane.b32.xlu1 %v1986_v8, %s5523_s8  ;;  %2645 = vrot.lane.b32.xlu0 %v1760_v0, %s5523_s8  ;;  %v4136_v0 = vld [vmem:[#allocation7 + $0x28] sm:$0xff]  }
 0x3cb   : > { %2647 = vrot.lane.b32.xlu1 %v1991_v10, %s5523_s8  ;;  %2643 = vrot.lane.b32.xlu0 %v1989_v12, %s5523_s8  ;;  %s4392_s8 = smov [#allocation12]  }
 0x3cc   : > { %s4299_s15 = sshll.u32 %s4392_s8, 4  ;;  %s4300_s15 = int_to_ptr.vmem [resolvable:$false] %s4299_s15 }
 0x3cd   : > { %s4301_s27 = scalar_lea.vmem %s4300_s15, 2048 }
 0x3cf   : > { %2730 = vperm.xlu1 %4112, %v2724_v17   ;;  %2735 = vperm.xlu0 %4111, %v2725_v18   ;;  %v4139_v18 = vld [vmem:[#allocation7 + $0x40] sm:$0xff]  }
 0x3d3   : > { %2762 = vperm.xlu1 %4112, %v2756_v19   ;;  %2767 = vperm.xlu0 %4111, %v2757_v20  }
 0x3d7   : > { %2740 = vperm.xlu1 %4112, %v2726_v21   ;;  %2745 = vperm.xlu0 %4111, %v2727_v22  }
 0x3db   : > { %2772 = vperm.xlu1 %4112, %v2758_v23   ;;  %2777 = vperm.xlu0 %4111, %v2759_v24  }
 0x3e0   : > { %v1839_v26 = vpop.permute.xlu1 %1838 }
 0x3e1   : > { %v1843_v27 = vpop.permute.xlu0 %1842 }
 0x3e4   : > { %v1841_v30 = vpop.permute.xlu1 %1840 }
 0x3e5   : > { %v1851_v31 = vsel %vm758_vm13, %v1841_v30, %v1843_v27  ;;  %v1850_v33 = vsel %vm758_vm13, %v1839_v26, %v1841_v30  ;;  %v1847_v34 = vpop.permute.xlu0 %1846  ;;  %v4140_v27 = vld [vmem:[#allocation7 + $0x48] sm:$0xff]  }
 0x3e6   : > { %1864 = vmatprep.subr.bf16.mxu1 %v1851_v31 }
 0x3e7   : > { %1865 = vmatpush1.bf16.msra.mxu1 %v1850_v33 }
 0x3e9   : > { %v1849_v35 = vpop.permute.xlu1 %1848  ;;  %v1845_v36 = vpop.permute.xlu0 %1844 }
 0x3ea   : > { %v1853_v37 = vsel %vm758_vm13, %v1847_v34, %v1849_v35  ;;  %v1852_v38 = vsel %vm758_vm13, %v1845_v36, %v1847_v34  ;;  %v4141_v34 = vld [vmem:[#allocation7 + $0x50] sm:$0xff]  }
 0x3eb   : > { %1866 = vmatprep.subr.bf16.mxu1 %v1853_v37 }
 0x3ec   : > { %1867 = vmatpush1.bf16.msra.mxu1 %v1852_v38 }
 0x3ed   : > { %v2016_v40 = vpop.permute.xlu1 %2015  ;;  %1933 = vmatprep.subr.bf16.mxu1 %v5084_v5  ;;  %v2018_v41 = vpop.permute.xlu0 %2017 }
 0x3ee   : > { %v2026_v45 = vsel %vm935_vm15, %v2016_v40, %v2018_v41 }
 0x3ef   : > { %3669 = vmatmul.mubr.msk.bf16.vlgmr.msra.gmra.mrb[0].mxu1 %vm767_vm14, %v4131_v39 }
 0x3f0   : > { %1934 = vmatpush1.bf16.msra.mxu1 %v5102_v14  ;;  %1906 = vmatprep.mubr.bf16.mxu1 %v4379_v1  ;;  %v4138_v14 = vld [vmem:[#allocation7 + $0x38] sm:$0xff]  }
 0x3f1   : > { %v2014_v42 = vpop.permute.xlu1 %2013  ;;  %1935 = vmatprep.subr.bf16.mxu1 %v5092_v9  ;;  %v2022_v43 = vpop.permute.xlu0 %2021 }
 0x3f2   : > { %v2025_v51 = vsel %vm935_vm15, %v2014_v42, %v2016_v40  ;;  %v4142_v40 = vld [vmem:[#allocation7 + $0x58] sm:$0xff]  }
 0x3f4   : > { %1936 = vmatpush1.bf16.msra.mxu1 %v5108_v16 }
 0x3f5   : > { %v2024_v46 = vpop.permute.xlu1 %2023  ;;  %2039 = vmatprep.subr.bf16.mxu1 %v2026_v45  ;;  %v2020_v47 = vpop.permute.xlu0 %2019 }
 0x3f6   : > { %v2028_v52 = vsel %vm935_vm15, %v2022_v43, %v2024_v46  ;;  %v2027_v53 = vsel %vm935_vm15, %v2020_v47, %v2022_v43  ;;  %v4143_v46 = vld [vmem:[#allocation7 + $0x60] sm:$0xff]  }
 0x3f7   : > { %3670 = vmatmul.mubr.msk.bf16.gmra.mrb[4].mxu1 %vm767_vm14, %v4132_v44 }
 0x3f8   : > { %1965 = vmatprep.mubr.bf16.mxu1 %v4379_v1 }
 0x3f9   : > { %v2130_v48 = vpop.permute.xlu1 %2129  ;;  %v2132_v49 = vpop.permute.xlu0 %2131 }
 0x3fa   : > { %v2140_v32 = vsel %vm1050_vm0, %v2130_v48, %v2132_v49 }
 0x3fd   : > { %v2128_v29 = vpop.permute.xlu1 %2127  ;;  %v2136_v25 = vpop.permute.xlu0 %2135 }
 0x3fe   : > { %v2139_v59 = vsel %vm1050_vm0, %v2128_v29, %v2130_v48 }
 0x3ff   : > { %3673 = vmatmul.mubr.msk.bf16.vlgmr.msra.gmra.mrb[0].mxu1 %vm767_vm14, %v4133_v50 }
 0x400   : > { %2040 = vmatpush1.bf16.msra.mxu1 %v2025_v51  ;;  %1975 = vmatprep.mubr.bf16.mxu1 %v4379_v1 }
 0x401   : > { %2041 = vmatprep.subr.bf16.mxu1 %v2028_v52  ;;  %v2138_v54 = vpop.permute.xlu1 %2137  ;;  %v2134_v55 = vpop.permute.xlu0 %2133 }
 0x402   : > { %v2142_v62 = vsel %vm1050_vm0, %v2136_v25, %v2138_v54  ;;  %v2141_v63 = vsel %vm1050_vm0, %v2134_v55, %v2136_v25  ;;  %v4144_v25 = vld [vmem:[#allocation7 + $0x68] sm:$0xff]   ;;  %v4145_v54 = vld [vmem:[#allocation7 + $0x70] sm:$0xff]  }
 0x404   : > { %2042 = vmatpush1.bf16.msra.mxu1 %v2027_v53 }
 0x405   : > { %2153 = vmatprep.subr.bf16.mxu1 %v2140_v32  ;;  %v2232_v56 = vpop.permute.xlu1 %2231  ;;  %v2234_v57 = vpop.permute.xlu0 %2233 }
 0x406   : > { %v2242_v2 = vsel %vm1153_vm1, %v2232_v56, %v2234_v57 }
 0x407   : > { %3674 = vmatmul.mubr.msk.bf16.gmra.mrb[4].mxu1 %vm767_vm14, %v4134_v28 }
 0x408   : > { %2071 = vmatprep.mubr.bf16.mxu1 %v4379_v1 }
 0x409   : > { %v2230_v60 = vpop.permute.xlu1 %2229  ;;  %v2238_v61 = vpop.permute.xlu0 %2237 }
 0x40a   : > { %v2241_v8 = vsel %vm1153_vm1, %v2230_v60, %v2232_v56  ;;  %v4148_v60 = vld [vmem:[#allocation7 + $0x88] sm:$0xff]  }
 0x40d   : > { %v2240_v3 = vpop.permute.xlu1 %2239  ;;  %v2236_v4 = vpop.permute.xlu0 %2235 }
 0x40e   : > { %v2244_v9 = vsel %vm1153_vm1, %v2238_v61, %v2240_v3  ;;  %v2243_v13 = vsel %vm1153_vm1, %v2236_v4, %v2238_v61 }
 0x40f   : > { %3677 = vmatmul.mubr.msk.bf16.vlgmr.msra.gmra.mrb[0].mxu1 %vm767_vm14, %v4135_v58  ;;  %v4146_v58 = vld [vmem:[#allocation7 + $0x78] sm:$0xff]  }
 0x410   : > { %2154 = vmatpush1.bf16.msra.mxu1 %v2139_v59  ;;  %2081 = vmatprep.mubr.bf16.mxu1 %v4379_v1  ;;  %v4147_v59 = vld [vmem:[#allocation7 + $0x80] sm:$0xff]  }
 0x411   : > { %2155 = vmatprep.subr.bf16.mxu1 %v2142_v62  ;;  %v2334_v5 = vpop.permute.xlu1 %2333  ;;  %v2336_v6 = vpop.permute.xlu0 %2335 }
 0x412   : > { %v2344_v15 = vsel %vm1256_vm2, %v2334_v5, %v2336_v6 }
 0x414   : > { %2156 = vmatpush1.bf16.msra.mxu1 %v2141_v63 }
 0x415   : > { %2255 = vmatprep.subr.bf16.mxu1 %v2242_v2  ;;  %v2332_v10 = vpop.permute.xlu1 %2331  ;;  %v2340_v12 = vpop.permute.xlu0 %2339 }
 0x416   : > { %v2343_v21 = vsel %vm1256_vm2, %v2332_v10, %v2334_v5 }
 0x417   : > { %3678 = vmatmul.mubr.msk.bf16.gmra.mrb[4].mxu1 %vm767_vm14, %v4136_v0 }
 0x418   : > { %2185 = vmatprep.mubr.bf16.mxu1 %v4379_v1 }
 0x419   : > { %v2342_v16 = vpop.permute.xlu1 %2341  ;;  %v2338_v17 = vpop.permute.xlu0 %2337 }
 0x41a   : > { %v2346_v22 = vsel %vm1256_vm2, %v2340_v12, %v2342_v16  ;;  %v2345_v23 = vsel %vm1256_vm2, %v2338_v17, %v2340_v12 }
 0x41d   : > { %v2436_v19 = vpop.permute.xlu1 %2435  ;;  %v2438_v20 = vpop.permute.xlu0 %2437 }
 0x41e   : > { %v2446_v30 = vsel %vm1359_vm3, %v2436_v19, %v2438_v20 }
 0x41f   : > { %3681 = vmatmul.mubr.msk.bf16.vlgmr.msra.gmra.mrb[0].mxu1 %vm767_vm14, %v4137_v7 }
 0x420   : > { %2256 = vmatpush1.bf16.msra.mxu1 %v2241_v8  ;;  %2195 = vmatprep.mubr.bf16.mxu1 %v4379_v1 }
 0x421   : > { %2257 = vmatprep.subr.bf16.mxu1 %v2244_v9  ;;  %v2434_v24 = vpop.permute.xlu1 %2433  ;;  %v2442_v26 = vpop.permute.xlu0 %2441 }
 0x422   : > { %v2445_v35 = vsel %vm1359_vm3, %v2434_v24, %v2436_v19 }
 0x424   : > { %2258 = vmatpush1.bf16.msra.mxu1 %v2243_v13 }
 0x425   : > { %2357 = vmatprep.subr.bf16.mxu1 %v2344_v15  ;;  %v2444_v31 = vpop.permute.xlu1 %2443  ;;  %v2440_v33 = vpop.permute.xlu0 %2439 }
 0x426   : > { %v2448_v38 = vsel %vm1359_vm3, %v2442_v26, %v2444_v31  ;;  %v2447_v39 = vsel %vm1359_vm3, %v2440_v33, %v2442_v26 }
 0x427   : > { %3682 = vmatmul.mubr.msk.bf16.gmra.mrb[4].mxu1 %vm767_vm14, %v4138_v14 }
 0x428   : > { %2287 = vmatprep.mubr.bf16.mxu1 %v4379_v1 }
 0x429   : > { %v2538_v36 = vpop.permute.xlu1 %2537  ;;  %v2540_v37 = vpop.permute.xlu0 %2539 }
 0x42a   : > { %v2548_v41 = vsel %vm1462_vm4, %v2538_v36, %v2540_v37 }
 0x42d   : > { %v2536_v42 = vpop.permute.xlu1 %2535  ;;  %v2544_v43 = vpop.permute.xlu0 %2543 }
 0x42e   : > { %v2547_v47 = vsel %vm1462_vm4, %v2536_v42, %v2538_v36  ;;  %v4389_v42 = vmov 0.0|0.0  }
 0x42f   : > { %3685 = vmatmul.mubr.msk.bf16.vlgmr.msra.gmra.mrb[0].mxu1 %vm767_vm14, %v4139_v18  ;;  %3751 = vmatprep.subr.bf16.mxu0 %v4389_v42 }
 0x430   : > { %2358 = vmatpush1.bf16.msra.mxu1 %v2343_v21  ;;  %2297 = vmatprep.mubr.bf16.mxu1 %v4379_v1 }
 0x431   : > { %2359 = vmatprep.subr.bf16.mxu1 %v2346_v22  ;;  %v2546_v44 = vpop.permute.xlu1 %2545  ;;  %v2542_v45 = vpop.permute.xlu0 %2541 }
 0x432   : > { %v2550_v48 = vsel %vm1462_vm4, %v2544_v43, %v2546_v44  ;;  %v2549_v29 = vsel %vm1462_vm4, %v2542_v45, %v2544_v43  ;;  %v2906_v43 = vld [vmem:[%s5524_s29] sm:$0xff]  ;;  %v2907_v45 = vld [vmem:[%s5524_s29 + $0x8] sm:$0xff] }
 0x433   : > { %v2822_v44 = vld [vmem:[%s5525_s19] sm:$0x3]  ;;  %s5527_s19 = sld [smem:[#allocation22_spill]] }
 0x434   : > { %2360 = vmatpush1.bf16.msra.mxu1 %v2345_v23 }
 0x435   : > { %2459 = vmatprep.subr.bf16.mxu1 %v2446_v30  ;;  %v2640_v49 = vpop.permute.xlu1 %2639  ;;  %v2642_v50 = vpop.permute.xlu0 %2641 }
 0x436   : > { %v2650_v51 = vsel %vm1565_vm5, %v2640_v49, %v2642_v50 }
 0x437   : > { %3686 = vmatmul.mubr.msk.bf16.gmra.mrb[4].mxu1 %vm767_vm14, %v4140_v27 }
 0x438   : > { %2389 = vmatprep.mubr.bf16.mxu1 %v4379_v1 }
 0x439   : > { %v2638_v52 = vpop.permute.xlu1 %2637  ;;  %v2646_v53 = vpop.permute.xlu0 %2645 }
 0x43a   : > { %v2649_v28 = vsel %vm1565_vm5, %v2638_v52, %v2640_v49 }
 0x43d   : > { %v2648_v55 = vpop.permute.xlu1 %2647  ;;  %v2644_v32 = vpop.permute.xlu0 %2643 }
 0x43e   : > { %v2652_v56 = vsel %vm1565_vm5, %v2646_v53, %v2648_v55  ;;  %v2651_v57 = vsel %vm1565_vm5, %v2644_v32, %v2646_v53 }
 0x43f   : > { %3689 = vmatmul.mubr.msk.bf16.vlgmr.msra.gmra.mrb[0].mxu1 %vm767_vm14, %v4141_v34 }
 0x440   : > { %2460 = vmatpush1.bf16.msra.mxu1 %v2445_v35  ;;  %2399 = vmatprep.mubr.bf16.mxu1 %v4379_v1 }
 0x441   : > { %2461 = vmatprep.subr.bf16.mxu1 %v2448_v38 }
 0x444   : > { %2462 = vmatpush1.bf16.msra.mxu1 %v2447_v39 }
 0x445   : > { %2561 = vmatprep.subr.bf16.mxu1 %v2548_v41 }
 0x447   : > { %3690 = vmatmul.mubr.msk.bf16.gmra.mrb[4].mxu1 %vm767_vm14, %v4142_v40 }
 0x448   : > { %2491 = vmatprep.mubr.bf16.mxu1 %v4379_v1 }
 0x44e   : > { %v2731_v61 = vpop.permute.xlu1 %2730  ;;  %v2736_v62 = vpop.permute.xlu0 %2735 }
 0x44f   : > { %3693 = vmatmul.mubr.msk.bf16.vlgmr.msra.gmra.mrb[0].mxu1 %vm767_vm14, %v4143_v46  ;;  %v4391_v46 = vmov 0.0  }
 0x450   : > { %2562 = vmatpush1.bf16.msra.mxu1 %v2547_v47  ;;  %2501 = vmatprep.mubr.bf16.mxu1 %v4379_v1  ;;  %v2908_v47 = vld [vmem:[%s5524_s29 + $0x10] sm:$0xff] }
 0x451   : > { %2563 = vmatprep.subr.bf16.mxu1 %v2550_v48  ;;  %3740 = vmatprep.mubr.msk.f32.mxu0 %vm4390_vm6, %v4391_v46  ;;  %v2909_v48 = vld [vmem:[%s5524_s29 + $0x18] sm:$0xff] }
 0x452   : > { %v2763_v63 = vpop.permute.xlu1 %2762  ;;  %v2768_v0 = vpop.permute.xlu0 %2767 }
 0x454   : > { %2564 = vmatpush1.bf16.msra.mxu1 %v2549_v29 }
 0x455   : > { %2663 = vmatprep.subr.bf16.mxu1 %v2650_v51 }
 0x456   : > { %v2741_v10 = vpop.permute.xlu1 %2740  ;;  %v2746_v13 = vpop.permute.xlu0 %2745 }
 0x457   : > { %3694 = vmatmul.mubr.msk.bf16.gmra.mrb[4].mxu1 %vm767_vm14, %v4144_v25 }
 0x458   : > { %2593 = vmatprep.mubr.bf16.mxu1 %v4379_v1 }
 0x45a   : > { %v2773_v21 = vpop.permute.xlu1 %2772  ;;  %v2778_v33 = vpop.permute.xlu0 %2777 }
 0x45f   : > { %3697 = vmatmul.mubr.msk.bf16.vlgmr.msra.gmra.mrb[0].mxu1 %vm767_vm14, %v4145_v54 }
 0x460   : > { %2664 = vmatpush1.bf16.msra.mxu1 %v2649_v28  ;;  %2603 = vmatprep.mubr.bf16.mxu1 %v4379_v1 }
 0x461   : > { %2665 = vmatprep.subr.bf16.mxu1 %v2652_v56 }
 0x464   : > { %2666 = vmatpush1.bf16.msra.mxu1 %v2651_v57 }
 0x467   : > { %3698 = vmatmul.mubr.msk.bf16.gmra.mrb[4].mxu1 %vm767_vm14, %v4146_v58 }
 0x468   : > { %2695 = vmatprep.mubr.bf16.mxu1 %v4379_v1 }
 0x46f   : > { %3701 = vmatmul.mubr.msk.bf16.vlgmr.msra.gmra.mrb[0].mxu1 %vm767_vm14, %v4147_v59 }
 0x470   : > { %2705 = vmatprep.mubr.bf16.mxu1 %v4379_v1 }
 0x477   : > { %3702 = vmatmul.mubr.msk.bf16.gmra.mrb[4].mxu1 %vm767_vm14, %v4148_v60 }
 0x542   : > { %v2697_v2 = vpop.f32.mrb[0].mxu1 }
 0x543   : > { %v2748_v3 = vmul.f32 %v2731_v61, %v2697_v2  ;;  %v2699_v4 = vpop.f32.mrb[1].mxu1 }
 0x544   : > { %v2749_v5 = vmul.f32 %v2731_v61, %v2699_v4  ;;  %v2701_v6 = vpop.f32.mrb[2].mxu1 }
 0x545   : > { %v5252_v7 = vadd.f32 %v2763_v63, %v2748_v3  ;;  %v2750_v8 = vmul.f32 %v2736_v62, %v2701_v6  ;;  %v2703_v9 = vpop.f32.mrb[3].mxu1 }
 0x546   : > { %v5254_v12 = vadd.f32 %v2763_v63, %v2749_v5  ;;  %v2751_v1 = vmul.f32 %v2736_v62, %v2703_v9  ;;  %v2821_v63 = vld [vmem:[%s5526_s23] sm:$0x3]  ;;  %v2904_v9 = vld [vmem:[%s5527_s19 + $0x10] sm:$0xff]  ;;  %s5392_s23 = scalar_lea.vmem [#allocation12], %s5528_s25 }
 0x547   : > { %v5256_v14 = vadd.f32 %v2768_v0, %v2750_v8  ;;  %v2903_v8 = vld [vmem:[%s5527_s19 + $0x8] sm:$0xff]  ;;  %s3482_s10 = sshll.u32 %s5392_s23, 4  ;;  %s5408_s10 = int_to_ptr.vmem [resolvable:$true] %s3482_s10 }
 0x548   : > { %v5258_v15 = vadd.f32 %v2768_v0, %v2751_v1  ;;  %v2804_v16 = vmax.f32 %v5252_v7, %v5254_v12  ;;  %v2788_v17 = vadd.f32 %v5254_v12, %v5252_v7  ;;  %v2902_v0 = vld [vmem:[%s5527_s19] sm:$0xff]  ;;  %s4295_s7 = scalar_lea.vmem %s5408_s10, 1024  ;;  %p4302_p12 = scmp.lt.s32.totalorder %s5408_s10, %s4300_s15 }
 0x549   : > { %3745 = vmatprep.mubr.msk.f32.mxu1 %vm2930_vm8, %v2902_v0  ;;  %p4296_p10 = scmp.ne.s32.totalorder %s5408_s10, %s4295_s7  ;;  %p4303_p2 = scmp.lt.s32.totalorder %s4301_s27, %s4295_s7 }
 0x54a   : > { %2805 = vmax.xlane.f32.xlu0 %v2804_v16  ;;  %2789 = vadd.xlane.f32.xlu1 %v2788_v17  ;;  %v2707_v18 = vpop.f32.mrb[4].mxu1  ;;  %v2807_v24 = vmax.f32 %v5256_v14, %v5258_v15  ;;  %v2791_v26 = vadd.f32 %v5258_v15, %v5256_v14 }
 0x54b   : > { %v2752_v19 = vmul.f32 %v2741_v10, %v2707_v18  ;;  %v2709_v20 = vpop.f32.mrb[5].mxu1  ;;  %p4297_p3 = pnand %p4296_p10, %p4621_p5  ;;  %p4304_p1 = por %p4303_p2, %p4302_p12 }
 0x54c   : > { %v2753_v22 = vmul.f32 %v2741_v10, %v2709_v20  ;;  %v2711_v23 = vpop.f32.mrb[6].mxu1  ;;  %v2905_v10 = vld [vmem:[%s5527_s19 + $0x18] sm:$0xff] }
 0x54d   : > { %v5268_v27 = vadd.f32 %v2773_v21, %v2752_v19  ;;  %v2754_v30 = vmul.f32 %v2746_v13, %v2711_v23  ;;  %v2713_v31 = vpop.f32.mrb[7].mxu1  ;;  %p4298_p7 = pneg %p4297_p3 }
 0x54e   : > { %v5270_v34 = vadd.f32 %v2773_v21, %v2753_v22  ;;  %v2755_v35 = vmul.f32 %v2746_v13, %v2713_v31  ;;  %2808 = vmax.xlane.f32.xlu1 %v2807_v24  ;;  %2792 = vadd.xlane.f32.xlu0 %v2791_v26  ;;  %v3209_v31 = vld [vmem:[#allocation10 + $0x18] sm:$0xff] }
 0x54f   : > { %v5272_v36 = vadd.f32 %v2778_v33, %v2754_v30  ;;  %v3207_v30 = vld [vmem:[#allocation10 + $0x8] sm:$0xff]  ;;  %p4305_p4 = pnand %p4304_p1, %p4298_p7 }
 0x550   : > { %v5274_v37 = vadd.f32 %v2778_v33, %v2755_v35  ;;  %v2794_v38 = vadd.f32 %v5270_v34, %v5268_v27  ;;  %v2810_v40 = vmax.f32 %v5268_v27, %v5270_v34  ;;  %v3206_v33 = vld [vmem:[#allocation10] sm:$0xff]  ;;  %v3757_v35 = vpack.c.bf16 %v3209_v31, %v3207_v30 }
 0x552   : > { %2795 = vadd.xlane.f32.xlu0 %v2794_v38  ;;  %v2797_v39 = vadd.f32 %v5274_v37, %v5272_v36  ;;  %v2813_v41 = vmax.f32 %v5272_v36, %v5274_v37  ;;  %v3208_v38 = vld [vmem:[#allocation10 + $0x10] sm:$0xff] }
 0x554   : > { %2798 = vadd.xlane.f32.xlu1 %v2797_v39  ;;  %v3143_v39 = vld [vmem:[#allocation9 + $0x8] sm:$0xff] }
 0x556   : > { %2811 = vmax.xlane.f32.xlu0 %v2810_v40  ;;  %v3145_v40 = vld [vmem:[#allocation9 + $0x18] sm:$0xff] }
 0x558   : > { %2814 = vmax.xlane.f32.xlu1 %v2813_v41  ;;  %v3759_v41 = vpack.c.bf16 %v3208_v38, %v3206_v33  ;;  %v3222_v33 = vld [vmem:[#allocation10 + $0x80] sm:$0xff] }
 0x559   : > { %v3158_v38 = vld [vmem:[#allocation9 + $0x80] sm:$0xff] }
 0x569   : > { %2912 = vperm.xlu1 %4112, %v2906_v43   ;;  %v3142_v43 = vld [vmem:[#allocation9] sm:$0xff] }
 0x56c   : > { %2825 = vperm.xlu0 %4111, %v2822_v44   ;;  %v3144_v44 = vld [vmem:[#allocation9 + $0x10] sm:$0xff] }
 0x56d   : > { %2917 = vperm.xlu1 %4112, %v2907_v45   ;;  %v3211_v45 = vld [vmem:[#allocation10 + $0x28] sm:$0xff]  ;;  %v3823_v46 = vpack.c.bf16 %v3144_v44, %v3142_v43  ;;  %v3165_v44 = vld [vmem:[#allocation9 + $0xb8] sm:$0xff] }
 0x56e   : > { %v3163_v43 = vld [vmem:[#allocation9 + $0xa8] sm:$0xff] }
 0x570   : > { %2922 = vperm.xlu0 %4111, %v2908_v47   ;;  %v3213_v47 = vld [vmem:[#allocation10 + $0x38] sm:$0xff] }
 0x571   : > { %2927 = vperm.xlu1 %4112, %v2909_v48   ;;  %v3210_v48 = vld [vmem:[#allocation10 + $0x20] sm:$0xff] }
 0x5d7   : > { %v2790_v49 = vpop.xlane.xlu1 %2789  ;;  %v2806_v50 = vpop.xlane.xlu0 %2805 }
 0x5d8   : > { %v2800_v29 = vmul.f32 0.00390625, %v2790_v49  ;;  %v3212_v49 = vld [vmem:[#allocation10 + $0x30] sm:$0xff] }
 0x5da   : > { %v2817_v53 = vsel %vm2816_vm7, %v2800_v29, %v2806_v50  ;;  %v3761_v50 = vpack.c.bf16 %v3213_v47, %v3211_v45  ;;  %v3763_v29 = vpack.c.bf16 %v3212_v49, %v3210_v48  ;;  %v3226_v48 = vld [vmem:[#allocation10 + $0xa0] sm:$0xff]  ;;  %v3228_v49 = vld [vmem:[#allocation10 + $0xb0] sm:$0xff] }
 0x5db   : > { %v2793_v25 = vpop.xlane.xlu0 %2792  ;;  %v2809_v52 = vpop.xlane.xlu1 %2808 }
 0x5dc   : > { %v2801_v51 = vmul.f32 0.00390625, %v2793_v25  ;;  %v3147_v25 = vld [vmem:[#allocation9 + $0x28] sm:$0xff] }
 0x5de   : > { %v2818_v54 = vsel %vm2816_vm7, %v2801_v51, %v2809_v52  ;;  %v3149_v51 = vld [vmem:[#allocation9 + $0x38] sm:$0xff]  ;;  %v3146_v52 = vld [vmem:[#allocation9 + $0x20] sm:$0xff] }
 0x5df   : > { %v3752_v55 = vpack.c.bf16 %v2818_v54, %v2817_v53  ;;  %v2796_v28 = vpop.xlane.xlu0 %2795  ;;  %v3825_v53 = vpack.c.bf16 %v3149_v51, %v3147_v25  ;;  %v3148_v54 = vld [vmem:[#allocation9 + $0x30] sm:$0xff]  ;;  %v3231_v51 = vld [vmem:[#allocation10 + $0xc8] sm:$0xff] }
 0x5e0   : > { %v2802_v57 = vmul.f32 0.00390625, %v2796_v28  ;;  %v3217_v28 = vld [vmem:[#allocation10 + $0x58] sm:$0xff]  ;;  %v3164_v25 = vld [vmem:[#allocation9 + $0xb0] sm:$0xff] }
 0x5e1   : > { %v2799_v32 = vpop.xlane.xlu1 %2798  ;;  %3753 = vmatpush3.bf16.msra.mxu0 %v3752_v55  ;;  %v3215_v55 = vld [vmem:[#allocation10 + $0x48] sm:$0xff] }
 0x5e2   : > { %3754 = vmatprep.subr.bf16.mxu0 %v4389_v42  ;;  %v2803_v58 = vmul.f32 0.00390625, %v2799_v32  ;;  %v3821_v42 = vpack.c.bf16 %v3145_v40, %v3143_v39  ;;  %v3827_v32 = vpack.c.bf16 %v3148_v54, %v3146_v52  ;;  %v3160_v40 = vld [vmem:[#allocation9 + $0x90] sm:$0xff]  ;;  %v3233_v52 = vld [vmem:[#allocation10 + $0xd8] sm:$0xff] }
 0x5e3   : > { %v2812_v56 = vpop.xlane.xlu0 %2811  ;;  %v3169_v54 = vld [vmem:[#allocation9 + $0xd8] sm:$0xff] }
 0x5e4   : > { %v2819_v60 = vsel %vm2816_vm7, %v2802_v57, %v2812_v56  ;;  %v3765_v56 = vpack.c.bf16 %v3217_v28, %v3215_v55  ;;  %v3214_v57 = vld [vmem:[#allocation10 + $0x40] sm:$0xff]  ;;  %v3779_v55 = vpack.c.bf16 %v3228_v49, %v3226_v48  ;;  %v3180_v49 = vld [vmem:[#allocation9 + $0x130] sm:$0xff] }
 0x5e5   : > { %v2815_v59 = vpop.xlane.xlu1 %2814  ;;  %v3178_v48 = vld [vmem:[#allocation9 + $0x120] sm:$0xff] }
 0x5e6   : > { %v2820_v61 = vsel %vm2816_vm7, %v2803_v58, %v2815_v59  ;;  %v3216_v58 = vld [vmem:[#allocation10 + $0x50] sm:$0xff]  ;;  %v3151_v59 = vld [vmem:[#allocation9 + $0x48] sm:$0xff] }
 0x5e7   : > { %v3755_v62 = vpack.c.bf16 %v2820_v61, %v2819_v60  ;;  %v3153_v60 = vld [vmem:[#allocation9 + $0x58] sm:$0xff]  ;;  %v3150_v61 = vld [vmem:[#allocation9 + $0x40] sm:$0xff] }
 0x5e8   : > { %v3829_v0 = vpack.c.bf16 %v3153_v60, %v3151_v59  ;;  %v3168_v60 = vld [vmem:[#allocation9 + $0xd0] sm:$0xff] }
 0x5e9   : > { %3756 = vmatpush3.bf16.msra.mxu0 %v3755_v62  ;;  %v2913_v1 = vpop.permute.xlu1 %2912  ;;  %v3152_v62 = vld [vmem:[#allocation9 + $0x50] sm:$0xff] }
 0x5ea   : > { %3822 = vmatprep.subr.bf16.mxu0 %v3821_v42  ;;  %v3229_v42 = vld [vmem:[#allocation10 + $0xb8] sm:$0xff] }
 0x5eb   : > { %v2826_v2 = vpop.permute.xlu0 %2825 }
 0x5ec   : > { %3741 = vmatmul.mubr.msk.f32.vlgmr.msra.gmra.mrb[8].mxu0 %vm767_vm14, %v2821_v63  ;;  %v3767_v63 = vpack.c.bf16 %v3216_v58, %v3214_v57  ;;  %v3232_v57 = vld [vmem:[#allocation10 + $0xd0] sm:$0xff]  ;;  %v3166_v58 = vld [vmem:[#allocation9 + $0xc0] sm:$0xff] }
 0x5ed   : > { %v2918_v13 = vpop.permute.xlu1 %2917  ;;  %3824 = vmatpush1.bf16.msra.mxu0 %v3823_v46  ;;  %v3839_v46 = vpack.c.bf16 %v3160_v40, %v3158_v38  ;;  %v3243_v38 = vld [vmem:[#allocation10 + $0x128] sm:$0xff] }
 0x5ee   : > { %3826 = vmatprep.subr.bf16.mxu0 %v3825_v53  ;;  %v3167_v53 = vld [vmem:[#allocation9 + $0xc8] sm:$0xff] }
 0x5ef   : > { %v2923_v22 = vpop.permute.xlu0 %2922  ;;  %v3845_v59 = vpack.c.bf16 %v3169_v54, %v3167_v53  ;;  %v3179_v40 = vld [vmem:[#allocation9 + $0x128] sm:$0xff] }
 0x5f1   : > { %v2928_v20 = vpop.permute.xlu1 %2927  ;;  %3828 = vmatpush1.bf16.msra.mxu0 %v3827_v32  ;;  %v3781_v32 = vpack.c.bf16 %v3233_v52, %v3231_v51 }
 0x5f2   : > { %3830 = vmatprep.subr.bf16.mxu0 %v3829_v0  ;;  %v3173_v0 = vld [vmem:[#allocation9 + $0xf8] sm:$0xff] }
 0x6bf   : > { %v2897_v3 = vpop.f32.mrb[8].mxu0 }
 0x6c0   : > { %v2898_v4 = vadd.f32 %v2897_v3, %v2826_v2  ;;  %v3742_v5 = vpop.f32.mrb[9].mxu0  ;;  %v3219_v2 = vld [vmem:[#allocation10 + $0x68] sm:$0xff]  ;;  %v3221_v3 = vld [vmem:[#allocation10 + $0x78] sm:$0xff] }
 0x6c1   : > { %v3831_v5 = vpack.c.bf16 %v3152_v62, %v3150_v61  ;;  %v3235_v61 = vld [vmem:[#allocation10 + $0xe8] sm:$0xff]  ;;  %v3237_v62 = vld [vmem:[#allocation10 + $0xf8] sm:$0xff] }
 0x6c2   : > { %v2901_v6 = vmax.f32 %v2898_v4, 0.0  ;;  %v3218_v4 = vld [vmem:[#allocation10 + $0x60] sm:$0xff] }
 0x6c3   : > { %3832 = vmatpush1.bf16.msra.mxu0 %v3831_v5  ;;  %v3234_v5 = vld [vmem:[#allocation10 + $0xe0] sm:$0xff] }
 0x6c4   : > { %3743 = vmatprep.subr.msk.mxu1 %vm2943_vm9, %v2901_v6 }
 0x6c5   : > { %3744 = vmatpush3.msk.msra.mxu1 %vm2943_vm9, %v2901_v6  ;;  %v3769_v6 = vpack.c.bf16 %v3221_v3, %v3219_v2  ;;  %v3847_v3 = vpack.c.bf16 %v3168_v60, %v3166_v58 }
 0x6c6   : > { %3746 = vmatmul.mubr.msk.f32.vlgmr.msra.gmra.mrb[8].mxu1 %vm2930_vm8, %v2903_v8  ;;  %3758 = vmatprep.subr.bf16.mxu1 %v3757_v35  ;;  %v3220_v8 = vld [vmem:[#allocation10 + $0x70] sm:$0xff] }
 0x6c7   : > { %3748 = vmatprep.mubr.msk.f32.mxu1 %vm2930_vm8, %v2904_v9  ;;  %3760 = vmatpush1.bf16.msra.mxu1 %v3759_v41  ;;  %v3155_v9 = vld [vmem:[#allocation9 + $0x68] sm:$0xff]  ;;  %v3224_v35 = vld [vmem:[#allocation10 + $0x90] sm:$0xff] }
 0x6c8   : > { %3762 = vmatprep.subr.bf16.mxu1 %v3761_v50  ;;  %v3227_v41 = vld [vmem:[#allocation10 + $0xa8] sm:$0xff]  ;;  %v3775_v45 = vpack.c.bf16 %v3224_v35, %v3222_v33  ;;  %v3162_v50 = vld [vmem:[#allocation9 + $0xa0] sm:$0xff]  ;;  %v3176_v35 = vld [vmem:[#allocation9 + $0x110] sm:$0xff] }
 0x6c9   : > { %v3777_v47 = vpack.c.bf16 %v3229_v42, %v3227_v41  ;;  %v3843_v28 = vpack.c.bf16 %v3164_v25, %v3162_v50  ;;  %v3181_v41 = vld [vmem:[#allocation9 + $0x138] sm:$0xff] }
 0x6ca   : > { %3749 = vmatmul.mubr.msk.f32.gmra.mrb[10].mxu1 %vm2930_vm8, %v2905_v10  ;;  %v3157_v10 = vld [vmem:[#allocation9 + $0x78] sm:$0xff] }
 0x6cb   : > { %3764 = vmatpush1.bf16.msra.mxu1 %v3763_v29  ;;  %v3841_v29 = vpack.c.bf16 %v3165_v44, %v3163_v43 }
 0x6cc   : > { %3766 = vmatprep.subr.bf16.mxu1 %v3765_v56  ;;  %v3230_v56 = vld [vmem:[#allocation10 + $0xc0] sm:$0xff] }
 0x6cd   : > { %v3783_v2 = vpack.c.bf16 %v3232_v57, %v3230_v56 }
 0x6cf   : > { %3768 = vmatpush1.bf16.msra.mxu1 %v3767_v63  ;;  %v3171_v63 = vld [vmem:[#allocation9 + $0xe8] sm:$0xff] }
 0x6d0   : > { %3770 = vmatprep.subr.bf16.mxu1 %v3769_v6  ;;  %v3236_v6 = vld [vmem:[#allocation10 + $0xf0] sm:$0xff] }
 0x799   : > { %v3747_v16 = vpop.f32.mrb[8].mxu1 }
 0x79a   : > { %v5319_v17 = vadd.f32 %v3747_v16, %v2918_v13  ;;  %v3013_v18 = vpop.f32.mrb[9].mxu1  ;;  %v3154_v13 = vld [vmem:[#allocation9 + $0x60] sm:$0xff]  ;;  %v3156_v16 = vld [vmem:[#allocation9 + $0x70] sm:$0xff] }
 0x79b   : > { %v5321_v19 = vadd.f32 %v3013_v18, %v2913_v1  ;;  %v3833_v1 = vpack.c.bf16 %v3157_v10, %v3155_v9  ;;  %v3223_v18 = vld [vmem:[#allocation10 + $0x88] sm:$0xff]  ;;  %v3835_v30 = vpack.c.bf16 %v3156_v16, %v3154_v13  ;;  %v3849_v9 = vpack.c.bf16 %v3173_v0, %v3171_v63  ;;  %v3172_v10 = vld [vmem:[#allocation9 + $0xf0] sm:$0xff]  ;;  %v3241_v13 = vld [vmem:[#allocation10 + $0x118] sm:$0xff] }
 0x79c   : > { %3038 = vrot.lane.b32.xlu1 %v5319_v17, %s4381_s22  ;;  %v3175_v16 = vld [vmem:[#allocation9 + $0x108] sm:$0xff] }
 0x79d   : > { %v3750_v21 = vpop.f32.mrb[10].mxu1  ;;  %3036 = vrot.lane.b32.xlu0 %v5321_v19, %s4381_s22  ;;  %3834 = vmatprep.subr.bf16.mxu0 %v3833_v1  ;;  %v3239_v1 = vld [vmem:[#allocation10 + $0x108] sm:$0xff] }
 0x79e   : > { %v5327_v23 = vadd.f32 %v3750_v21, %v2928_v20  ;;  %v3023_v24 = vpop.f32.mrb[11].mxu1  ;;  %v3225_v20 = vld [vmem:[#allocation10 + $0x98] sm:$0xff]  ;;  %v3771_v21 = vpack.c.bf16 %v3220_v8, %v3218_v4  ;;  %3836 = vmatpush1.bf16.msra.mxu0 %v3835_v30  ;;  %v3785_v4 = vpack.c.bf16 %v3237_v62, %v3235_v61  ;;  %v3170_v8 = vld [vmem:[#allocation9 + $0xe0] sm:$0xff]  ;;  %v3240_v30 = vld [vmem:[#allocation10 + $0x110] sm:$0xff] }
 0x79f   : > { %v5329_v26 = vadd.f32 %v3023_v24, %v2923_v22  ;;  %v3159_v22 = vld [vmem:[#allocation9 + $0x88] sm:$0xff]  ;;  %v3161_v24 = vld [vmem:[#allocation9 + $0x98] sm:$0xff]  ;;  %v3773_v31 = vpack.c.bf16 %v3225_v20, %v3223_v18  ;;  %v3787_v20 = vpack.c.bf16 %v3236_v6, %v3234_v5  ;;  %v3246_v5 = vld [vmem:[#allocation10 + $0x140] sm:$0xff] }
 0x7a0   : > { %3042 = vrot.lane.b32.xlu1 %v5327_v23, %s4381_s22  ;;  %v3837_v39 = vpack.c.bf16 %v3161_v24, %v3159_v22  ;;  %3772 = vmatpush1.bf16.msra.mxu1 %v3771_v21  ;;  %v3177_v18 = vld [vmem:[#allocation9 + $0x118] sm:$0xff]  ;;  %v3851_v21 = vpack.c.bf16 %v3172_v10, %v3170_v8  ;;  %v3789_v22 = vpack.c.bf16 %v3241_v13, %v3239_v1  ;;  %v3238_v24 = vld [vmem:[#allocation10 + $0x100] sm:$0xff]  ;;  %v3248_v6 = vld [vmem:[#allocation10 + $0x150] sm:$0xff] }
 0x7a1   : > { %3040 = vrot.lane.b32.xlu0 %v5329_v26, %s4381_s22  ;;  %3774 = vmatprep.subr.bf16.mxu1 %v3773_v31  ;;  %v3174_v31 = vld [vmem:[#allocation9 + $0x100] sm:$0xff]  ;;  %v3853_v33 = vpack.c.bf16 %v3177_v18, %v3175_v16  ;;  %v3791_v42 = vpack.c.bf16 %v3240_v30, %v3238_v24  ;;  %v3183_v10 = vld [vmem:[#allocation9 + $0x148] sm:$0xff]  ;;  %v3185_v1 = vld [vmem:[#allocation9 + $0x158] sm:$0xff]  ;;  %s3412_s22 = sld [smem:[#allocation3]] }
 0x7a2   : > { %3838 = vmatprep.subr.bf16.mxu0 %v3837_v39  ;;  %v3245_v39 = vld [vmem:[#allocation10 + $0x138] sm:$0xff]  ;;  %v3855_v43 = vpack.c.bf16 %v3176_v35, %v3174_v31  ;;  %v3861_v13 = vpack.c.bf16 %v3185_v1, %v3183_v10  ;;  %v3182_v16 = vld [vmem:[#allocation9 + $0x140] sm:$0xff]  ;;  %v3184_v18 = vld [vmem:[#allocation9 + $0x150] sm:$0xff] }
 0x7a3   : > { %3840 = vmatpush1.bf16.msra.mxu0 %v3839_v46  ;;  %v3793_v44 = vpack.c.bf16 %v3245_v39, %v3243_v38  ;;  %v3244_v46 = vld [vmem:[#allocation10 + $0x130] sm:$0xff]  ;;  %v3250_v31 = vld [vmem:[#allocation10 + $0x160] sm:$0xff]  ;;  %v3187_v39 = vld [vmem:[#allocation9 + $0x168] sm:$0xff] }
 0x7a4   : > { %3776 = vmatpush1.bf16.msra.mxu1 %v3775_v45  ;;  %3842 = vmatprep.subr.bf16.mxu0 %v3841_v29  ;;  %v3242_v45 = vld [vmem:[#allocation10 + $0x120] sm:$0xff]  ;;  %v3859_v29 = vpack.c.bf16 %v3180_v49, %v3178_v48  ;;  %v3256_v49 = vld [vmem:[#allocation10 + $0x190] sm:$0xff]  ;;  %v3267_v1 = vld [vmem:[#allocation10 + $0x1e8] sm:$0xff] }
 0x7a5   : > { %3778 = vmatprep.subr.bf16.mxu1 %v3777_v47  ;;  %v3857_v47 = vpack.c.bf16 %v3181_v41, %v3179_v40  ;;  %v3795_v50 = vpack.c.bf16 %v3244_v46, %v3242_v45  ;;  %v3189_v40 = vld [vmem:[#allocation9 + $0x178] sm:$0xff]  ;;  %v3255_v45 = vld [vmem:[#allocation10 + $0x188] sm:$0xff]  ;;  %v3254_v48 = vld [vmem:[#allocation10 + $0x180] sm:$0xff] }
 0x7a6   : > { %v3865_v41 = vpack.c.bf16 %v3189_v40, %v3187_v39  ;;  %v3257_v46 = vld [vmem:[#allocation10 + $0x198] sm:$0xff] }
 0x7a7   : > { %3844 = vmatpush1.bf16.msra.mxu0 %v3843_v28 }
 0x7a8   : > { %3780 = vmatpush1.bf16.msra.mxu1 %v3779_v55  ;;  %3846 = vmatprep.subr.bf16.mxu0 %v3845_v59 }
 0x7a9   : > { %3782 = vmatprep.subr.bf16.mxu1 %v3781_v32 }
 0x7ab   : > { %3848 = vmatpush1.bf16.msra.mxu0 %v3847_v3  ;;  %v3249_v3 = vld [vmem:[#allocation10 + $0x158] sm:$0xff] }
 0x7ac   : > { %3784 = vmatpush1.bf16.msra.mxu1 %v3783_v2  ;;  %3850 = vmatprep.subr.bf16.mxu0 %v3849_v9  ;;  %v3799_v9 = vpack.c.bf16 %v3248_v6, %v3246_v5  ;;  %v3201_v5 = vld [vmem:[#allocation9 + $0x1d8] sm:$0xff] }
 0x7ad   : > { %3786 = vmatprep.subr.bf16.mxu1 %v3785_v4 }
 0x7af   : > { %3852 = vmatpush1.bf16.msra.mxu0 %v3851_v21  ;;  %v3251_v21 = vld [vmem:[#allocation10 + $0x168] sm:$0xff] }
 0x7b0   : > { %3788 = vmatpush1.bf16.msra.mxu1 %v3787_v20  ;;  %3854 = vmatprep.subr.bf16.mxu0 %v3853_v33  ;;  %v3863_v20 = vpack.c.bf16 %v3184_v18, %v3182_v16  ;;  %v3252_v33 = vld [vmem:[#allocation10 + $0x170] sm:$0xff]  ;;  %v3266_v18 = vld [vmem:[#allocation10 + $0x1e0] sm:$0xff] }
 0x7b1   : > { %3790 = vmatprep.subr.bf16.mxu1 %v3789_v22  ;;  %v3253_v22 = vld [vmem:[#allocation10 + $0x178] sm:$0xff]  ;;  %v3803_v38 = vpack.c.bf16 %v3252_v33, %v3250_v31  ;;  %v3202_v31 = vld [vmem:[#allocation9 + $0x1e0] sm:$0xff]  ;;  %v3204_v33 = vld [vmem:[#allocation9 + $0x1f0] sm:$0xff] }
 0x7b2   : > { %v3801_v30 = vpack.c.bf16 %v3253_v22, %v3251_v21  ;;  %v3203_v21 = vld [vmem:[#allocation9 + $0x1e8] sm:$0xff] }
 0x7b3   : > { %3856 = vmatpush1.bf16.msra.mxu0 %v3855_v43  ;;  %v3188_v43 = vld [vmem:[#allocation9 + $0x170] sm:$0xff] }
 0x7b4   : > { %3792 = vmatpush1.bf16.msra.mxu1 %v3791_v42  ;;  %3858 = vmatprep.subr.bf16.mxu0 %v3857_v47  ;;  %v3186_v42 = vld [vmem:[#allocation9 + $0x160] sm:$0xff]  ;;  %v3805_v47 = vpack.c.bf16 %v3257_v46, %v3255_v45 }
 0x7b5   : > { %3794 = vmatprep.subr.bf16.mxu1 %v3793_v44  ;;  %v3867_v44 = vpack.c.bf16 %v3188_v43, %v3186_v42 }
 0x7b7   : > { %3860 = vmatpush1.bf16.msra.mxu0 %v3859_v29  ;;  %v3191_v29 = vld [vmem:[#allocation9 + $0x188] sm:$0xff] }
 0x7b8   : > { %3796 = vmatpush1.bf16.msra.mxu1 %v3795_v50  ;;  %3862 = vmatprep.subr.bf16.mxu0 %v3861_v13  ;;  %v3807_v50 = vpack.c.bf16 %v3256_v49, %v3254_v48  ;;  %v3269_v13 = vld [vmem:[#allocation10 + $0x1f8] sm:$0xff] }
 0x7b9   : > { %v3817_v16 = vpack.c.bf16 %v3269_v13, %v3267_v1 }
 0x7bb   : > { %3864 = vmatpush1.bf16.msra.mxu0 %v3863_v20  ;;  %v3268_v20 = vld [vmem:[#allocation10 + $0x1f0] sm:$0xff] }
 0x7bc   : > { %3866 = vmatprep.subr.bf16.mxu0 %v3865_v41  ;;  %v3819_v22 = vpack.c.bf16 %v3268_v20, %v3266_v18 }
 0x7bf   : > { %3868 = vmatpush1.bf16.msra.mxu0 %v3867_v44 }
 0x80e   : > { %v3039_v25 = vpop.permute.xlu1 %3038 }
 0x80f   : > { %v3049_v51 = vadd.f32 %v3039_v25, %v5319_v17  ;;  %v3037_v52 = vpop.permute.xlu0 %3036  ;;  %v3193_v25 = vld [vmem:[#allocation9 + $0x198] sm:$0xff] }
 0x810   : > { %v3048_v53 = vadd.f32 %v3037_v52, %v5321_v19  ;;  %v3190_v52 = vld [vmem:[#allocation9 + $0x180] sm:$0xff] }
 0x811   : > { %v3710_v54 = vmul.f32 -1.442695, %v3049_v51  ;;  %v3869_v51 = vpack.c.bf16 %v3193_v25, %v3191_v29 }
 0x812   : > { %v3709_v55 = vmul.f32 -1.442695, %v3048_v53  ;;  %v3043_v28 = vpop.permute.xlu1 %3042  ;;  %v3192_v53 = vld [vmem:[#allocation9 + $0x190] sm:$0xff] }
 0x813   : > { %4149 = vpow2.f32 %v3710_v54  ;;  %v3051_v32 = vadd.f32 %v3043_v28, %v5327_v23  ;;  %v3041_v56 = vpop.permute.xlu0 %3040  ;;  %v3247_v23 = vld [vmem:[#allocation10 + $0x148] sm:$0xff]  ;;  %v3871_v54 = vpack.c.bf16 %v3192_v53, %v3190_v52  ;;  %v3261_v28 = vld [vmem:[#allocation10 + $0x1b8] sm:$0xff]  ;;  %3870 = vmatprep.subr.bf16.mxu0 %v3869_v51 }
 0x814   : > { %4151 = vpow2.f32 %v3709_v55  ;;  %v3050_v57 = vadd.f32 %v3041_v56, %v5329_v26  ;;  %v3797_v26 = vpack.c.bf16 %v3249_v3, %v3247_v23  ;;  %v3259_v55 = vld [vmem:[#allocation10 + $0x1a8] sm:$0xff]  ;;  %v3258_v56 = vld [vmem:[#allocation10 + $0x1a0] sm:$0xff]  ;;  %v3264_v3 = vld [vmem:[#allocation10 + $0x1d0] sm:$0xff] }
 0x815   : > { %v3712_v58 = vmul.f32 -1.442695, %v3051_v32  ;;  %v3809_v32 = vpack.c.bf16 %v3261_v28, %v3259_v55  ;;  %3872 = vmatpush1.bf16.msra.mxu0 %v3871_v54  ;;  %v3262_v23 = vld [vmem:[#allocation10 + $0x1c0] sm:$0xff] }
 0x816   : > { %v3711_v59 = vmul.f32 -1.442695, %v3050_v57  ;;  %3798 = vmatprep.subr.bf16.mxu1 %v3797_v26  ;;  %v3260_v57 = vld [vmem:[#allocation10 + $0x1b0] sm:$0xff]  ;;  %v3199_v26 = vld [vmem:[#allocation9 + $0x1c8] sm:$0xff] }
 0x817   : > { %4153 = vpow2.f32 %v3712_v58  ;;  %3800 = vmatpush1.bf16.msra.mxu1 %v3799_v9  ;;  %v3811_v58 = vpack.c.bf16 %v3260_v57, %v3258_v56  ;;  %v3877_v6 = vpack.c.bf16 %v3201_v5, %v3199_v26  ;;  %v3200_v9 = vld [vmem:[#allocation9 + $0x1d0] sm:$0xff] }
 0x818   : > { %4155 = vpow2.f32 %v3711_v59  ;;  %3802 = vmatprep.subr.bf16.mxu1 %v3801_v30  ;;  %v3195_v59 = vld [vmem:[#allocation9 + $0x1a8] sm:$0xff] }
 0x81b   : > { %3804 = vmatpush1.bf16.msra.mxu1 %v3803_v38 }
 0x81c   : > { %3806 = vmatprep.subr.bf16.mxu1 %v3805_v47 }
 0x81d   : > { %v4150_v60 = vpop.eup %4149 }
 0x81e   : > { %v4152_v61 = vpop.eup %4151  ;;  %v3065_v17 = vadd.f32 1.0, %v4150_v60  ;;  %v3197_v60 = vld [vmem:[#allocation9 + $0x1b8] sm:$0xff] }
 0x81f   : > { %v3064_v62 = vadd.f32 1.0, %v4152_v61  ;;  %3808 = vmatpush1.bf16.msra.mxu1 %v3807_v50  ;;  %v3873_v61 = vpack.c.bf16 %v3197_v60, %v3195_v59 }
 0x820   : > { %4157 = vrcp.f32 %v3065_v17  ;;  %3810 = vmatprep.subr.bf16.mxu1 %v3809_v32  ;;  %v3194_v17 = vld [vmem:[#allocation9 + $0x1a0] sm:$0xff] }
 0x821   : > { %v4154_v19 = vpop.eup %4153  ;;  %4159 = vrcp.f32 %v3064_v62  ;;  %v3196_v62 = vld [vmem:[#allocation9 + $0x1b0] sm:$0xff]  ;;  %3874 = vmatprep.subr.bf16.mxu0 %v3873_v61 }
 0x822   : > { %v4156_v63 = vpop.eup %4155  ;;  %v3067_v0 = vadd.f32 1.0, %v4154_v19  ;;  %v3875_v19 = vpack.c.bf16 %v3196_v62, %v3194_v17 }
 0x823   : > { %v3066_v2 = vadd.f32 1.0, %v4156_v63  ;;  %3812 = vmatpush1.bf16.msra.mxu1 %v3811_v58  ;;  %v3263_v63 = vld [vmem:[#allocation10 + $0x1c8] sm:$0xff] }
 0x824   : > { %4161 = vrcp.f32 %v3067_v0  ;;  %v3265_v0 = vld [vmem:[#allocation10 + $0x1d8] sm:$0xff]  ;;  %3876 = vmatpush1.bf16.msra.mxu0 %v3875_v19 }
 0x825   : > { %4163 = vrcp.f32 %v3066_v2  ;;  %v3813_v2 = vpack.c.bf16 %v3265_v0, %v3263_v63  ;;  %3878 = vmatprep.subr.bf16.mxu0 %v3877_v6 }
 0x827   : > { %3814 = vmatprep.subr.bf16.mxu1 %v3813_v2 }
 0x82a   : > { %v4158_v4 = vpop.eup %4157 }
 0x82b   : > { %v4160_v8 = vpop.eup %4159  ;;  %3083 = vperm.xlu1 %4112, %v4158_v4   ;;  %v3815_v4 = vpack.c.bf16 %v3264_v3, %v3262_v23 }
 0x82c   : > { %3078 = vperm.xlu0 %4111, %v4160_v8   ;;  %v3198_v8 = vld [vmem:[#allocation9 + $0x1c0] sm:$0xff] }
 0x82d   : > { %3816 = vmatpush1.bf16.msra.mxu1 %v3815_v4  ;;  %v3879_v10 = vpack.c.bf16 %v3200_v9, %v3198_v8 }
 0x82e   : > { %v4162_v24 = vpop.eup %4161  ;;  %3818 = vmatprep.subr.bf16.mxu1 %v3817_v16  ;;  %v3413_v16 = vstv %s3412_s22 }
 0x82f   : > { %v4164_v35 = vpop.eup %4163  ;;  %3093 = vperm.xlu1 %4112, %v4162_v24   ;;  %3880 = vmatpush1.bf16.msra.mxu0 %v3879_v10  ;;  %v3205_v24 = vld [vmem:[#allocation9 + $0x1f8] sm:$0xff] }
 0x830   : > { %3088 = vperm.xlu0 %4111, %v4164_v35   ;;  %v3881_v30 = vpack.c.bf16 %v3205_v24, %v3203_v21  ;;  %v3883_v35 = vpack.c.bf16 %v3204_v33, %v3202_v31 }
 0x831   : > { %3820 = vmatpush1.bf16.msra.mxu1 %v3819_v22 }
 0x832   : > { %3882 = vmatprep.subr.bf16.mxu0 %v3881_v30 }
 0x833   : > { %3884 = vmatpush1.bf16.msra.mxu0 %v3883_v35 }
 0x8aa   : > { %v3084_v38 = vpop.permute.xlu1 %3083 }
 0x8ab   : > { %v3079_v39 = vpop.permute.xlu0 %3078  ;;  %v5340_v40 = vmul.f32 %v3084_v38, %v5256_v14  ;;  %v5343_v41 = vmul.f32 %v3084_v38, %v5258_v15 }
 0x8ac   : > { %v5346_v42 = vmul.f32 %v3079_v39, %v5252_v7  ;;  %v5349_v43 = vmul.f32 %v3079_v39, %v5254_v12 }
 0x8ae   : > { %v3094_v44 = vpop.permute.xlu1 %3093  ;;  %v3104_v14 = vadd.f32 %v5340_v40, %v5346_v42  ;;  %v3113_v15 = vadd.f32 %v5343_v41, %v5349_v43 }
 0x8af   : > { %v5352_v45 = vmul.f32 %v3094_v44, %v5272_v36  ;;  %v5355_v46 = vmul.f32 %v3094_v44, %v5274_v37  ;;  %v3089_v47 = vpop.permute.xlu0 %3088 }
 0x8b0   : > { %v5362_v7 = vmul.f32 %v3089_v47, %v5268_v27  ;;  %v5365_v12 = vmul.f32 %v3089_v47, %v5270_v34 }
 0x8b1   : > { %v3125_v36 = vmax.f32 %v5340_v40, %v5352_v45  ;;  %v3134_v37 = vmax.f32 %v5343_v41, %v5355_v46 }
 0x8b2   : > { %v3105_v48 = vadd.f32 %v3104_v14, %v5362_v7  ;;  %v3114_v49 = vadd.f32 %v3113_v15, %v5365_v12  ;;  %v3124_v50 = vmax.f32 %v5346_v42, %v5362_v7  ;;  %v3133_v27 = vmax.f32 %v5349_v43, %v5365_v12 }
 0x8b4   : > { %v3106_v29 = vadd.f32 %v3105_v48, %v5352_v45  ;;  %v3115_v34 = vadd.f32 %v3114_v49, %v5355_v46  ;;  %v3126_v25 = vmax.f32 %v3124_v50, %v3125_v36  ;;  %v3135_v51 = vmax.f32 %v3133_v27, %v3134_v37 }
 0x8b6   : > { %v3107_v52 = vrot.slane %v3106_v29, 4  ;;  %v3116_v53 = vrot.slane %v3115_v34, 4  ;;  %v3127_v54 = vrot.slane %v3126_v25, 4  ;;  %v3136_v55 = vrot.slane %v3135_v51, 4 }
 0x8b8   : > { %v3108_v28 = vadd.f32 %v3107_v52, %v3106_v29  ;;  %v3128_v32 = vmax.f32 %v3126_v25, %v3127_v54  ;;  %v3137_v56 = vmax.f32 %v3135_v51, %v3136_v55  ;;  %v3117_v57 = vadd.f32 %v3116_v53, %v3115_v34  ;;  %v4177_v51 = vld [vmem:[%s4678_s4 + $0x8] sm:$0xff]  ;;  %v4178_v52 = vld [vmem:[%s4678_s4 + $0x18] sm:$0xff] }
 0x8b9   : > { %v4179_v53 = vld [vmem:[%s4678_s4 + $0x28] sm:$0xff]  ;;  %v4180_v55 = vld [vmem:[%s4678_s4 + $0x38] sm:$0xff] }
 0x8ba   : > { %v3109_v58 = vrot.slane %v3108_v28, 2  ;;  %v3129_v59 = vrot.slane %v3128_v32, 2  ;;  %v3138_v60 = vrot.slane %v3137_v56, 2  ;;  %v3118_v61 = vrot.slane %v3117_v57, 2 }
 0x8bc   : > { %v3130_v17 = vmax.f32 %v3128_v32, %v3129_v59  ;;  %v3139_v62 = vmax.f32 %v3137_v56, %v3138_v60  ;;  %v3119_v19 = vadd.f32 %v3118_v61, %v3117_v57  ;;  %v3110_v63 = vadd.f32 %v3109_v58, %v3108_v28 }
 0x8be   : > { %v3131_v0 = vrot.slane %v3130_v17, 1  ;;  %v3140_v2 = vrot.slane %v3139_v62, 1  ;;  %v3120_v23 = vrot.slane %v3119_v19, 1  ;;  %v3111_v3 = vrot.slane %v3110_v63, 1 }
 0x8c0   : > { %v3141_v4 = vmax.f32 %v3139_v62, %v3140_v2  ;;  %v3132_v26 = vmax.f32 %v3130_v17, %v3131_v0  ;;  %v3121_v5 = vadd.f32 %v3120_v23, %v3119_v19  ;;  %v3112_v6 = vadd.f32 %v3111_v3, %v3110_v63 }
 0x8c2   : > { %3334 = vmatprep.mubr.f32.mxu1 %v3141_v4  ;;  %v3123_v8 = vmul.f32 0.03125, %v3121_v5  ;;  %v3122_v9 = vmul.f32 0.03125, %v3112_v6 }
 0x8c3   : > { %3335 = vmatmul.mubr.f32.vlgmr.msra.gmra.mrb[12].mxu1 %v3132_v26 }
 0x8c4   : > { %3405 = vmatprep.mubr.f32.mxu0 %v3123_v8 }
 0x8c5   : > { %3406 = vmatmul.mubr.f32.vlgmr.msra.gmra.mrb[10].mxu0 %v3122_v9 }
 0x996   : > { %v3336_v10 = vpop.f32.mrb[12].mxu1 }
 0x997   : > { %v3338_v1 = vpop.f32.mrb[13].mxu1 }
 0x998   : > { %v3407_v13 = vpop.f32.mrb[10].mxu0 }
 0x999   : > { %v3408_v18 = vadd.f32 %v3407_v13, %v3336_v10  ;;  %v3409_v20 = vpop.f32.mrb[11].mxu0 }
 0x99a   : > { %v3410_v21 = vadd.f32 %v3409_v20, %v3338_v1 }
 0x99b   : > { %v3414_v22 = vadd.f32 %v3413_v16, %v3408_v18 }
 0x99c   : > { %v3415_v24 = vadd.f32 %v3413_v16, %v3410_v21 }
 0x99d   : > { %v3713_v30 = vmul.f32 -1.442695, %v3414_v22 }
 0x99e   : > { %v3714_v31 = vmul.f32 -1.442695, %v3415_v24 }
 0x99f   : > { %4165 = vpow2.f32 %v3713_v30 }
 0x9a0   : > { %4167 = vpow2.f32 %v3714_v31 }
 0x9a9   : > { %v4166_v33 = vpop.eup %4165 }
 0x9aa   : > { %v4168_v35 = vpop.eup %4167  ;;  %v3422_v38 = vadd.f32 1.0, %v4166_v33 }
 0x9ab   : > { %v3423_v39 = vadd.f32 1.0, %v4168_v35 }
 0x9ac   : > { %4169 = vrcp.f32 %v3422_v38 }
 0x9ad   : > { %4171 = vrcp.f32 %v3423_v39 }
 0x9b6   : > { %v4170_v44 = vpop.eup %4169 }
 0x9b7   : > { %v4172_v47 = vpop.eup %4171  ;;  %v3431_v14 = vrot.slane %v4170_v44, %v4715_v11 }
 0x9b8   : > { %v3435_v15 = vrot.slane %v4172_v47, %v4715_v11 }
 0x9b9   : > { %v3436_v36 = vmul.f32 %v3431_v14, %v5346_v42  ;;  %v3438_v37 = vmul.f32 %v3431_v14, %v5340_v40  ;;  %v3440_v48 = vmul.f32 %v3431_v14, %v5362_v7  ;;  %v3442_v49 = vmul.f32 %v3431_v14, %v5352_v45  ;;  %v4173_v40 = vld [vmem:[%s4678_s4] sm:$0xff]  ;;  %v4174_v45 = vld [vmem:[%s4678_s4 + $0x10] sm:$0xff] }
 0x9ba   : > { %v3437_v50 = vmul.f32 %v3435_v15, %v5349_v43  ;;  %v3439_v27 = vmul.f32 %v3435_v15, %v5343_v41  ;;  %v3441_v29 = vmul.f32 %v3435_v15, %v5365_v12  ;;  %v3443_v11 = vmul.f32 %v3435_v15, %v5355_v46  ;;  %v4175_v43 = vld [vmem:[%s4678_s4 + $0x20] sm:$0xff]  ;;  %v4176_v41 = vld [vmem:[%s4678_s4 + $0x30] sm:$0xff]  ;;  %s3469_s4 = scalar_lea.sflag [#allocation6], %s4672_s21 }
 0x9bb   : > { %v3444_v42 = vadd.f32 %v4173_v40, %v3436_v36  ;;  %v3446_v7 = vadd.f32 %v4174_v45, %v3438_v37  ;;  %v3448_v34 = vadd.f32 %v4175_v43, %v3440_v48  ;;  %v3450_v25 = vadd.f32 %v4176_v41, %v3442_v49 }
 0x9bc   : > { %v3445_v12 = vadd.f32 %v4177_v51, %v3437_v50  ;;  %v3447_v46 = vadd.f32 %v4178_v52, %v3439_v27  ;;  %v3449_v54 = vadd.f32 %v4179_v53, %v3441_v29  ;;  %v3451_v28 = vadd.f32 %v4180_v55, %v3443_v11 }
 0x9bd   : > { %v3452_v32 = vmax.f32 %v3444_v42, 0.0  ;;  %v3454_v56 = vmax.f32 %v3446_v7, 0.0  ;;  %v3456_v57 = vmax.f32 %v3448_v34, 0.0  ;;  %v3458_v58 = vmax.f32 %v3450_v25, 0.0 }
 0x9be   : > { %v3453_v59 = vmax.f32 %v3445_v12, 0.0  ;;  %v3455_v60 = vmax.f32 %v3447_v46, 0.0  ;;  %v3457_v61 = vmax.f32 %v3449_v54, 0.0  ;;  %v3459_v17 = vmax.f32 %v3451_v28, 0.0 }
 0x9bf   : > { %3460 = vst [vmem:[%s5392_s23] sm:$0xff] %v3452_v32  ;;  %3462 = vst [vmem:[%s5392_s23 + $0x10] sm:$0xff] %v3454_v56 }
 0x9c0   : > { %3464 = vst [vmem:[%s5392_s23 + $0x20] sm:$0xff] %v3456_v57  ;;  %3466 = vst [vmem:[%s5392_s23 + $0x30] sm:$0xff] %v3458_v58 }
 0x9c1   : > { %3461 = vst [vmem:[%s5392_s23 + $0x8] sm:$0xff] %v3453_v59  ;;  %3463 = vst [vmem:[%s5392_s23 + $0x18] sm:$0xff] %v3455_v60 }
 0x9c2   : > { %3465 = vst [vmem:[%s5392_s23 + $0x28] sm:$0xff] %v3457_v61  ;;  %3467 = vst [vmem:[%s5392_s23 + $0x38] sm:$0xff] %v3459_v17 }
 0x9c3   : > { %4308 = shalt.err (!%p4305_p4)
}
 0x9c4   : > { %s4309_s22 = scalar_lea.hbm %s5406_s20, 1024  ;;  %s4313_s23 = scalar_lea.hbm %s5529_s26, 2048 }
 0x9c5   : > { %p4310_p9 = scmp.ne.s32.totalorder %s5406_s20, %s4309_s22  ;;  %p4314_p8 = scmp.lt.u32.totalorder %s5406_s20, %s5529_s26 }
 0x9c6   : > { %p4315_p13 = scmp.lt.u32.totalorder %s4313_s23, %s4309_s22  ;;  %p4317_p10 = scmp.lt.u32.totalorder %s4309_s22, %s5406_s20 }
 0x9c7   : > { %p4311_p0 = pnand %p4310_p9, %p4621_p5 }
 0x9c8   : > { %p4316_p6 = por %p4315_p13, %p4314_p8 }
 0x9c9   : > { %p4312_p11 = pneg %p4311_p0 }
 0x9ca   : > { %p4318_p3 = por %p4317_p10, %p4316_p6 }
 0x9cc   : > { %p4319_p7 = pnand %p4318_p3, %p4312_p11 }
 0x9ce   : > { %4322 = shalt.err (!%p4319_p7)
}
 0x9cf   : > { %s4393_s7 = smov 256   ;;  %s4394_s8 = smov 16  }
 0x9d0   : > { %4029 = dma.vmem_to_hbm [thread:$0]  (%p4621_p5), %s5408_s10, 1024, %s5406_s20, %s3469_s4, %s4393_s7, %s4393_s7, %s4394_s8  }
 0x9d1 PF: > { %s5530_s15 = sld [smem:[#allocation17_spill]]  ;;  %s5531_s27 = sld [smem:[#allocation18_spill]] }
 0x9d2   : > { %p5533_p2 = scmp.ge.s32.totalorder %s4369_s18, 2 }
 0x9d7   : > { %s3497_s24 = sand.u32 1, %s5530_s15   ;;  %p5532_p12 = scmp.ne.s32.totalorder %s5531_s27, 0 }
 0x9d8   : > { %s3498_s22 = scalar_lea.sflag [#allocation6], %s3497_s24 }
 0x9d9   : > { %p4046_p1 = pnand %p5533_p2, %p5532_p12 }
 0x9db   : > { %4352 = dma.done.wait (!%p4046_p1), %s3498_s22, 1024  }
 0x9dc   : > { %4354 = vsyncadd (!%p4046_p1), %s3498_s22, 4294966272  ;;  %p30_p4 = scmp.ge.s32.totalorder %s4586_s30, 4   ;;  %s5534_s15 = smov %s4361_s16 }
 0x9dd   : > { %s5535_s16 = smov %s4365_s17  ;;  %s5536_s17 = smov %s4617_s9 }
 0x9de   : > { %s5537_s18 = smov %s4586_s30  ;;  %32 = sbr.rel (!%p30_p4) target bundleno = 15 (0xf), region = 151 }
 0x9e5   :  { %3503 = vsyncpa [#allocation5], 1 }
 0x9e6   :  { %3505 = vsyncpa [#allocation5 + $0x1], 1 }
 0x9e7   :  { %3506 = vsyncpa [#allocation8], 1 }
 0x9e8   :  { %3507 = vsyncpa [#allocation11], 1 }
 0x9e9   :  { %3508 = vsyncpa [#allocation6], 1 }
 0x9ea   :  { %3510 = vsyncpa [#allocation6 + $0x1], 1 }

</bundles_post_ra>
